<compile_context>
chip_gen: v5e
topology: v5e:2x2
jax: 0.10.0
libtpu: 0.0.40
codegen_flags: <defaults>
</compile_context>

<pallas_src>
import functools
import math

import jax
import jax.numpy as jnp
from jax import lax
from jax.experimental import pallas as pl
from jax.experimental.pallas import tpu as pltpu

# ---- config (SamMaskDecoderConfig, small synthetic sizes) -------------------
HIDDEN = 32          # config.hidden_size
NUM_HEADS = 2        # config.num_attention_heads
MLP_DIM = 64         # config.mlp_dim
LN_EPS = 1e-6        # config.layer_norm_eps
DOWNSAMPLE = 2       # attention_downsample_rate
I_X = HIDDEN // DOWNSAMPLE   # internal dim of the two cross-attentions

# ---- packed parameter-table layout ------------------------------------------
# wtab (W_ROWS, 128): all matmul weights, zero padded.  Weights that feed a single fused matmul
# are column-concatenated.  All row offsets / sizes are multiples of 8 (sublane aligned).
ROW_SA = 0                    # 32 rows : self-attn  [Wq | Wk | Wv | Wo]       (32 lanes each)
ROW_X = ROW_SA + HIDDEN       # 32 rows : cross t2i [Wq|Wk|Wv] then i2t [Wq|Wk|Wv] (16 lanes each)
ROW_M1 = ROW_X + HIDDEN       # 32 rows : MLP W1 (64 lanes)
ROW_M2 = ROW_M1 + HIDDEN      # 64 rows : MLP W2 (32 lanes)
ROW_XO = ROW_M2 + MLP_DIM     # 16 rows : cross out-proj  [t2i Wo | i2t Wo]    (32 lanes each)
W_ROWS = ROW_XO + I_X         # 176
W_COLS = 128

# btab (48, 128): one logical parameter row per group, placed on 8-aligned rows.
B_SA, B_T, B_I, B_MLP, B_LN12, B_LN34 = 0, 8, 16, 24, 32, 40
B_ROWS = 48


def _pack_params(p):
    """Pack all block parameters into two lane-padded f32 tables (done once per call here;
    in a real deployment this would be precomputed offline)."""
    sa, t, i = p["self_attn"], p["cross_t2i"], p["cross_i2t"]
    h, ix, md = HIDDEN, I_X, MLP_DIM

    w = jnp.zeros((W_ROWS, W_COLS), jnp.float32)
    w = w.at[ROW_SA:ROW_SA + h, 0:h].set(sa["wq"])
    w = w.at[ROW_SA:ROW_SA + h, h:2 * h].set(sa["wk"])
    w = w.at[ROW_SA:ROW_SA + h, 2 * h:3 * h].set(sa["wv"])
    w = w.at[ROW_SA:ROW_SA + h, 3 * h:4 * h].set(sa["wo"])
    w = w.at[ROW_X:ROW_X + h, 0:ix].set(t["wq"])
    w = w.at[ROW_X:ROW_X + h, ix:2 * ix].set(t["wk"])
    w = w.at[ROW_X:ROW_X + h, 2 * ix:3 * ix].set(t["wv"])
    w = w.at[ROW_X:ROW_X + h, 3 * ix:4 * ix].set(i["wq"])
    w = w.at[ROW_X:ROW_X + h, 4 * ix:5 * ix].set(i["wk"])
    w = w.at[ROW_X:ROW_X + h, 5 * ix:6 * ix].set(i["wv"])
    w = w.at[ROW_M1:ROW_M1 + h, 0:md].set(p["mlp_w1"])
    w = w.at[ROW_M2:ROW_M2 + md, 0:h].set(p["mlp_w2"])
    w = w.at[ROW_XO:ROW_XO + ix, 0:h].set(t["wo"])
    w = w.at[ROW_XO:ROW_XO + ix, h:2 * h].set(i["wo"])

    b = jnp.zeros((B_ROWS, W_COLS), jnp.float32)
    b = b.at[B_SA, 0:h].set(sa["bq"][0])
    b = b.at[B_SA, h:2 * h].set(sa["bk"][0])
    b = b.at[B_SA, 2 * h:3 * h].set(sa["bv"][0])
    b = b.at[B_SA, 3 * h:4 * h].set(sa["bo"][0])
    for row, a in ((B_T, t), (B_I, i)):
        b = b.at[row, 0:ix].set(a["bq"][0])
        b = b.at[row, ix:2 * ix].set(a["bk"][0])
        b = b.at[row, 2 * ix:3 * ix].set(a["bv"][0])
        b = b.at[row, 3 * ix:3 * ix + h].set(a["bo"][0])
    b = b.at[B_MLP, 0:md].set(p["mlp_b1"][0])
    b = b.at[B_MLP, md:md + h].set(p["mlp_b2"][0])
    b = b.at[B_LN12, 0:h].set(p["ln1_g"][0])
    b = b.at[B_LN12, h:2 * h].set(p["ln1_b"][0])
    b = b.at[B_LN12, 2 * h:3 * h].set(p["ln2_g"][0])
    b = b.at[B_LN12, 3 * h:4 * h].set(p["ln2_b"][0])
    b = b.at[B_LN34, 0:h].set(p["ln3_g"][0])
    b = b.at[B_LN34, h:2 * h].set(p["ln3_b"][0])
    b = b.at[B_LN34, 2 * h:3 * h].set(p["ln4_g"][0])
    b = b.at[B_LN34, 3 * h:4 * h].set(p["ln4_b"][0])
    return w, b


# ============================ fused Pallas kernel ============================

def _two_way_block_kernel(q_ref, k_ref, qpe_ref, kpe_ref, w_ref, b_ref, out_ref,
                          *, eps, num_heads, bp, nq, nk, skip_first_layer_pe):
    f32 = jnp.float32
    h = q_ref.shape[-1]
    ix = I_X

    q = q_ref[...].astype(f32)        # (bp*nq, h)  samples stacked on sublanes
    k = k_ref[...].astype(f32)        # (bp*nk, h)
    qpe = qpe_ref[...].astype(f32)
    kpe = kpe_ref[...].astype(f32)

    def dotf(a, b):
        return jnp.dot(a, b, preferred_element_type=f32)

    def mha(qp, kp, vp, wo, bo, m, n):
        """Attention core on pre-projected activations.
        qp: (bp*m, d), kp/vp: (bp*n, d), wo: (d, h), bo: (1, h).  Heads live on the lane axis of
        the projections; the out-proj is folded per head (== concat-heads-then-matmul)."""
        d = qp.shape[-1]
        c = d // num_heads
        scale = 1.0 / math.sqrt(c)
        outs = []
        for b in range(bp):                       # static, tiny: bp * num_heads = 4 iterations
            qs = qp[b * m:(b + 1) * m, :]
            ks = kp[b * n:(b + 1) * n, :]
            vs = vp[b * n:(b + 1) * n, :]
            acc = bo
            for hd in range(num_heads):
                lo = hd * c
                logits = lax.dot_general(
                    qs[:, lo:lo + c], ks[:, lo:lo + c],
                    (((1,), (1,)), ((), ())),
                    preferred_element_type=f32) * scale           # (m, n), no transpose needed
                logits = logits - jnp.max(logits, axis=-1, keepdims=True)
                e = jnp.exp(logits)
                p = e * pl.reciprocal(jnp.sum(e, axis=-1, keepdims=True), approx=False)
                oh = dotf(p, vs[:, lo:lo + c])                    # (m, c)
                acc = acc + dotf(oh, wo[lo:lo + c, :])            # (m, h)  per-head out-proj slice
            outs.append(acc)
        return jnp.concatenate(outs, axis=0)                      # (bp*m, h)

    def layernorm(x, g, b):
        mu = jnp.mean(x, axis=-1, keepdims=True)
        cen = x - mu
        var = jnp.mean(cen * cen, axis=-1, keepdims=True)
        return cen * lax.rsqrt(var + eps) * g + b

    # ---- (1) self attention on sparse tokens (internal dim == hidden) ------
    sa_wo = w_ref[ROW_SA:ROW_SA + h, 3 * h:4 * h]
    sa_bo = b_ref[B_SA:B_SA + 1, 3 * h:4 * h]
    if skip_first_layer_pe:
        # q == k == v input: one fused QKV projection matmul.
        qkv = dotf(q, w_ref[ROW_SA:ROW_SA + h, 0:3 * h]) + b_ref[B_SA:B_SA + 1, 0:3 * h]
        qc = mha(qkv[:, 0:h], qkv[:, h:2 * h], qkv[:, 2 * h:3 * h], sa_wo, sa_bo, nq, nq)
    else:
        x = q + qpe                                    # q and k inputs coincide: fused QK matmul
        qkp = dotf(x, w_ref[ROW_SA:ROW_SA + h, 0:2 * h]) + b_ref[B_SA:B_SA + 1, 0:2 * h]
        vp = dotf(q, w_ref[ROW_SA:ROW_SA + h, 2 * h:3 * h]) + b_ref[B_SA:B_SA + 1, 2 * h:3 * h]
        qc = q + mha(qkp[:, 0:h], qkp[:, h:2 * h], vp, sa_wo, sa_bo, nq, nq)
    qc = layernorm(qc, b_ref[B_LN12:B_LN12 + 1, 0:h], b_ref[B_LN12:B_LN12 + 1, h:2 * h])

    # ---- (2) cross attention: tokens -> image --------------------------------
    qp = dotf(qc + qpe, w_ref[ROW_X:ROW_X + h, 0:ix]) + b_ref[B_T:B_T + 1, 0:ix]
    kp = dotf(k + kpe, w_ref[ROW_X:ROW_X + h, ix:2 * ix]) + b_ref[B_T:B_T + 1, ix:2 * ix]
    vp = dotf(k, w_ref[ROW_X:ROW_X + h, 2 * ix:3 * ix]) + b_ref[B_T:B_T + 1, 2 * ix:3 * ix]
    att = mha(qp, kp, vp,
              w_ref[ROW_XO:ROW_XO + ix, 0:h],
              b_ref[B_T:B_T + 1, 3 * ix:3 * ix + h], nq, nk)
    qc = layernorm(qc + att,
                   b_ref[B_LN12:B_LN12 + 1, 2 * h:3 * h], b_ref[B_LN12:B_LN12 + 1, 3 * h:4 * h])

    # ---- (3) MLP on sparse tokens ---------------------------------------------
    hid = jnp.maximum(
        dotf(qc, w_ref[ROW_M1:ROW_M1 + h, 0:MLP_DIM]) + b_ref[B_MLP:B_MLP + 1, 0:MLP_DIM], 0.0)
    mlp = (dotf(hid, w_ref[ROW_M2:ROW_M2 + MLP_DIM, 0:h])
           + b_ref[B_MLP:B_MLP + 1, MLP_DIM:MLP_DIM + h])
    qc = layernorm(qc + mlp,
                   b_ref[B_LN34:B_LN34 + 1, 0:h], b_ref[B_LN34:B_LN34 + 1, h:2 * h])

    # ---- (4) cross attention: image -> tokens ---------------------------------
    qp = dotf(k + kpe, w_ref[ROW_X:ROW_X + h, 3 * ix:4 * ix]) + b_ref[B_I:B_I + 1, 0:ix]
    kp = dotf(qc + qpe, w_ref[ROW_X:ROW_X + h, 4 * ix:5 * ix]) + b_ref[B_I:B_I + 1, ix:2 * ix]
    vp = dotf(qc, w_ref[ROW_X:ROW_X + h, 5 * ix:6 * ix]) + b_ref[B_I:B_I + 1, 2 * ix:3 * ix]
    att = mha(qp, kp, vp,
              w_ref[ROW_XO:ROW_XO + ix, h:2 * h],
              b_ref[B_I:B_I + 1, 3 * ix:3 * ix + h], nk, nq)
    kc = layernorm(k + att,
                   b_ref[B_LN34:B_LN34 + 1, 2 * h:3 * h], b_ref[B_LN34:B_LN34 + 1, 3 * h:4 * h])

    # single merged output: [queries ; keys]  (bp*nq is a multiple of 8 -> aligned stores)
    out_ref[0:bp * nq, :] = qc.astype(out_ref.dtype)
    out_ref[bp * nq:bp * (nq + nk), :] = kc.astype(out_ref.dtype)


# ============================ wrapper ========================================

@functools.partial(jax.jit, static_argnames=("skip_first_layer_pe",))
def two_way_attention_block(queries, keys, query_point_embedding, key_point_embedding,
                            params, skip_first_layer_pe=False):
    """Fused Pallas implementation of SamTwoWayAttentionBlock.forward."""
    B, P, Nq, H = queries.shape
    Nk = keys.shape[2]
    BP = B * P

    # (B, P, N, H) -> (BP*N, H): samples ride the sublane axis so projections / MLP are batched.
    q = queries.reshape(BP * Nq, H)
    k = keys.reshape(BP * Nk, H)
    qpe = query_point_embedding.reshape(BP * Nq, H)
    kpe = key_point_embedding.reshape(BP * Nk, H)

    wtab, btab = _pack_params(params)

    # whole problem fits comfortably in VMEM -> no grid, whole-array blocks, one invocation.
    vmem_spec = lambda: pl.BlockSpec(memory_space=pltpu.MemorySpace.VMEM)

    out = pl.pallas_call(
        functools.partial(_two_way_block_kernel, eps=LN_EPS, num_heads=NUM_HEADS,
                          bp=BP, nq=Nq, nk=Nk,
                          skip_first_layer_pe=skip_first_layer_pe),
        out_shape=jax.ShapeDtypeStruct((BP * (Nq + Nk), H), queries.dtype),
        in_specs=[vmem_spec() for _ in range(6)],
        out_specs=vmem_spec(),
    )(q, k, qpe, kpe, wtab, btab)

    q_out = out[:BP * Nq].reshape(B, P, Nq, H)
    k_out = out[BP * Nq:].reshape(B, P, Nk, H)
    return q_out, k_out


# ============================ parameter init =================================

def make_attn_params(key, hidden, internal, scale=0.1):
    ks = jax.random.split(key, 8)
    w = lambda kk, shp: scale * jax.random.normal(kk, shp, jnp.float32)
    return dict(
        wq=w(ks[0], (hidden, internal)), bq=w(ks[1], (1, internal)),
        wk=w(ks[2], (hidden, internal)), bk=w(ks[3], (1, internal)),
        wv=w(ks[4], (hidden, internal)), bv=w(ks[5], (1, internal)),
        wo=w(ks[6], (internal, hidden)), bo=w(ks[7], (1, hidden)),
    )


def make_params(key):
    ks = jax.random.split(key, 8)
    p = {
        "self_attn": make_attn_params(ks[0], HIDDEN, HIDDEN),                 # downsample_rate=1
        "cross_t2i": make_attn_params(ks[1], HIDDEN, HIDDEN // DOWNSAMPLE),   # downsample_rate=2
        "cross_i2t": make_attn_params(ks[2], HIDDEN, HIDDEN // DOWNSAMPLE),   # downsample_rate=2
    }
    for i, kk in zip((1, 2, 3, 4), ks[3:7]):
        p[f"ln{i}_g"] = 1.0 + 0.1 * jax.random.normal(kk, (1, HIDDEN), jnp.float32)
        p[f"ln{i}_b"] = 0.1 * jax.random.normal(jax.random.fold_in(kk, 1), (1, HIDDEN), jnp.float32)
    km = jax.random.split(ks[7], 4)
    p["mlp_w1"] = 0.1 * jax.random.normal(km[0], (HIDDEN, MLP_DIM), jnp.float32)
    p["mlp_b1"] = 0.1 * jax.random.normal(km[1], (1, MLP_DIM), jnp.float32)
    p["mlp_w2"] = 0.1 * jax.random.normal(km[2], (MLP_DIM, HIDDEN), jnp.float32)
    p["mlp_b2"] = 0.1 * jax.random.normal(km[3], (1, HIDDEN), jnp.float32)
    return p


# ============================ pure-JAX reference =============================

def _ref_attention(q, k, v, p, num_heads):
    d_int = p["wq"].shape[1]
    qp = q @ p["wq"] + p["bq"][0]
    kp = k @ p["wk"] + p["bk"][0]
    vp = v @ p["wv"] + p["bv"][0]
    bp, n_q, _ = qp.shape
    n_k = kp.shape[1]
    c = d_int // num_heads
    split = lambda x, n: x.reshape(bp, n, num_heads, c).transpose(0, 2, 1, 3)
    qh, kh, vh = split(qp, n_q), split(kp, n_k), split(vp, n_k)
    attn = jnp.einsum("bhqc,bhkc->bhqk", qh, kh) / math.sqrt(c)
    attn = jax.nn.softmax(attn, axis=-1)
    o = jnp.einsum("bhqk,bhkc->bhqc", attn, vh)
    o = o.transpose(0, 2, 1, 3).reshape(bp, n_q, d_int)
    return o @ p["wo"] + p["bo"][0]


def _ref_ln(x, g, b):
    mean = jnp.mean(x, axis=-1, keepdims=True)
    var = jnp.mean((x - mean) ** 2, axis=-1, keepdims=True)
    return (x - mean) / jnp.sqrt(var + LN_EPS) * g[0] + b[0]


def ref_block(queries, keys, qpe, kpe, p, skip_first_layer_pe):
    B, P, Nq, H = queries.shape
    Nk = keys.shape[2]
    q = queries.reshape(B * P, Nq, H)
    k = keys.reshape(B * P, Nk, H)
    qp = qpe.reshape(B * P, Nq, H)
    kp = kpe.reshape(B * P, Nk, H)
    if skip_first_layer_pe:
        q = _ref_attention(q, q, q, p["self_attn"], NUM_HEADS)
    else:
        q_in = q + qp
        q = q + _ref_attention(q_in, q_in, q, p["self_attn"], NUM_HEADS)
    q = _ref_ln(q, p["ln1_g"], p["ln1_b"])
    q = _ref_ln(q + _ref_attention(q + qp, k + kp, k, p["cross_t2i"], NUM_HEADS),
                p["ln2_g"], p["ln2_b"])
    mlp = jnp.maximum(q @ p["mlp_w1"] + p["mlp_b1"][0], 0.0) @ p["mlp_w2"] + p["mlp_b2"][0]
    q = _ref_ln(q + mlp, p["ln3_g"], p["ln3_b"])
    k = _ref_ln(k + _ref_attention(k + kp, q + qp, q, p["cross_i2t"], NUM_HEADS),
                p["ln4_g"], p["ln4_b"])
    return q.reshape(B, P, Nq, H), k.reshape(B, P, Nk, H)


# ================================== main =====================================

if __name__ == "__main__":
    key = jax.random.PRNGKey(0)
    kq, kk, kqp, kkp, kp_ = jax.random.split(key, 5)

    B, P, Nq, Nk = 2, 1, 8, 16   # batch, point_batch, prompt tokens, image tokens
    queries = jax.random.normal(kq, (B, P, Nq, HIDDEN), jnp.float32)
    keys_t = jax.random.normal(kk, (B, P, Nk, HIDDEN), jnp.float32)
    qpe = jax.random.normal(kqp, (B, P, Nq, HIDDEN), jnp.float32)
    kpe = jax.random.normal(kkp, (B, P, Nk, HIDDEN), jnp.float32)
    params = make_params(kp_)

    for skip in (False, True):
        q_out, k_out = two_way_attention_block(queries, keys_t, qpe, kpe, params,
                                               skip_first_layer_pe=skip)
        jax.block_until_ready((q_out, k_out))
        q_ref, k_ref = ref_block(queries, keys_t, qpe, kpe, params, skip)
        assert q_out.shape == (B, P, Nq, HIDDEN) and k_out.shape == (B, P, Nk, HIDDEN)
        assert jnp.allclose(q_out, q_ref, rtol=1e-4, atol=1e-4), f"q mismatch (skip={skip})"
        assert jnp.allclose(k_out, k_ref, rtol=1e-4, atol=1e-4), f"k mismatch (skip={skip})"

    print("KERNEL_OK")
</pallas_src>

<mosaic_0001>
module attributes {stable_mosaic.version = 11 : i64} {
  func.func @_two_way_block_kernel(%arg0: memref<16x32xf32, #tpu.memory_space<vmem>>, %arg1: memref<32x32xf32, #tpu.memory_space<vmem>>, %arg2: memref<16x32xf32, #tpu.memory_space<vmem>>, %arg3: memref<32x32xf32, #tpu.memory_space<vmem>>, %arg4: memref<176x128xf32, #tpu.memory_space<vmem>>, %arg5: memref<48x128xf32, #tpu.memory_space<vmem>>, %arg6: memref<48x32xf32, #tpu.memory_space<vmem>>) attributes {dimension_semantics = [], scalar_prefetch = 0 : i64, scratch_operands = 0 : i64, tpu.core_type = #tpu.core_type<tc>} {
    %c0 = arith.constant 0 : index
    %c0_0 = arith.constant 0 : index
    %0 = vector.load %arg0[%c0, %c0_0] : memref<16x32xf32, #tpu.memory_space<vmem>>, vector<16x32xf32>
    %c0_1 = arith.constant 0 : index
    %c0_2 = arith.constant 0 : index
    %1 = vector.load %arg1[%c0_1, %c0_2] : memref<32x32xf32, #tpu.memory_space<vmem>>, vector<32x32xf32>
    %c0_3 = arith.constant 0 : index
    %c0_4 = arith.constant 0 : index
    %2 = vector.load %arg2[%c0_3, %c0_4] : memref<16x32xf32, #tpu.memory_space<vmem>>, vector<16x32xf32>
    %c0_5 = arith.constant 0 : index
    %c0_6 = arith.constant 0 : index
    %3 = vector.load %arg3[%c0_5, %c0_6] : memref<32x32xf32, #tpu.memory_space<vmem>>, vector<32x32xf32>
    %c0_7 = arith.constant 0 : index
    %c96 = arith.constant 96 : index
    %4 = vector.load %arg4[%c0_7, %c96] : memref<176x128xf32, #tpu.memory_space<vmem>>, vector<32x32xf32>
    %c0_8 = arith.constant 0 : index
    %c96_9 = arith.constant 96 : index
    %5 = vector.load %arg5[%c0_8, %c96_9] : memref<48x128xf32, #tpu.memory_space<vmem>>, vector<1x32xf32>
    %6 = arith.addf %0, %2 : vector<16x32xf32>
    %c0_10 = arith.constant 0 : index
    %c0_11 = arith.constant 0 : index
    %7 = vector.load %arg4[%c0_10, %c0_11] : memref<176x128xf32, #tpu.memory_space<vmem>>, vector<32x64xf32>
    %cst = arith.constant dense<0.000000e+00> : vector<16x64xf32>
    %8 = tpu.matmul %6, %7, %cst {dimension_numbers = #tpu.dot_dimension_numbers<[1], [0], [0], [1], [0, 0, 1, 1], [], []>} : vector<16x32xf32>, vector<32x64xf32>, vector<16x64xf32> -> vector<16x64xf32>
    %c0_12 = arith.constant 0 : index
    %c0_13 = arith.constant 0 : index
    %9 = vector.load %arg5[%c0_12, %c0_13] : memref<48x128xf32, #tpu.memory_space<vmem>>, vector<1x64xf32>
    %10 = vector.broadcast %9 : vector<1x64xf32> to vector<16x64xf32>
    %11 = arith.addf %8, %10 : vector<16x64xf32>
    %c0_14 = arith.constant 0 : index
    %c64 = arith.constant 64 : index
    %12 = vector.load %arg4[%c0_14, %c64] : memref<176x128xf32, #tpu.memory_space<vmem>>, vector<32x32xf32>
    %cst_15 = arith.constant dense<0.000000e+00> : vector<16x32xf32>
    %13 = tpu.matmul %0, %12, %cst_15 {dimension_numbers = #tpu.dot_dimension_numbers<[1], [0], [0], [1], [0, 0, 1, 1], [], []>} : vector<16x32xf32>, vector<32x32xf32>, vector<16x32xf32> -> vector<16x32xf32>
    %c0_16 = arith.constant 0 : index
    %c64_17 = arith.constant 64 : index
    %14 = vector.load %arg5[%c0_16, %c64_17] : memref<48x128xf32, #tpu.memory_space<vmem>>, vector<1x32xf32>
    %15 = vector.broadcast %14 : vector<1x32xf32> to vector<16x32xf32>
    %16 = arith.addf %13, %15 : vector<16x32xf32>
    %17 = vector.extract_strided_slice %11 {offsets = [0, 0], sizes = [16, 32], strides = [1, 1]} : vector<16x64xf32> to vector<16x32xf32>
    %18 = vector.extract_strided_slice %11 {offsets = [0, 32], sizes = [16, 32], strides = [1, 1]} : vector<16x64xf32> to vector<16x32xf32>
    %19 = vector.extract_strided_slice %17 {offsets = [0, 0], sizes = [8, 32], strides = [1, 1]} : vector<16x32xf32> to vector<8x32xf32>
    %20 = vector.extract_strided_slice %18 {offsets = [0, 0], sizes = [8, 32], strides = [1, 1]} : vector<16x32xf32> to vector<8x32xf32>
    %21 = vector.extract_strided_slice %16 {offsets = [0, 0], sizes = [8, 32], strides = [1, 1]} : vector<16x32xf32> to vector<8x32xf32>
    %22 = vector.extract_strided_slice %19 {offsets = [0, 0], sizes = [8, 16], strides = [1, 1]} : vector<8x32xf32> to vector<8x16xf32>
    %23 = vector.extract_strided_slice %20 {offsets = [0, 0], sizes = [8, 16], strides = [1, 1]} : vector<8x32xf32> to vector<8x16xf32>
    %cst_18 = arith.constant dense<0.000000e+00> : vector<8x8xf32>
    %24 = tpu.matmul %22, %23, %cst_18 {dimension_numbers = #tpu.dot_dimension_numbers<[1], [1], [0], [0], [0, 0, 1, 0], [], []>} : vector<8x16xf32>, vector<8x16xf32>, vector<8x8xf32> -> vector<8x8xf32>
    %cst_19 = arith.constant 2.500000e-01 : f32
    %25 = vector.broadcast %cst_19 : f32 to vector<8x8xf32>
    %26 = arith.mulf %24, %25 : vector<8x8xf32>
    %cst_20 = arith.constant dense<0xFF800000> : vector<8xf32>
    %27 = vector.multi_reduction <maximumf>, %26, %cst_20 [1] : vector<8x8xf32> to vector<8xf32>
    %28 = vector.shape_cast %27 : vector<8xf32> to vector<8x1xf32>
    %29 = vector.broadcast %28 : vector<8x1xf32> to vector<8x8xf32>
    %30 = arith.subf %26, %29 : vector<8x8xf32>
    %31 = math.exp %30 : vector<8x8xf32>
    %cst_21 = arith.constant dense<0.000000e+00> : vector<8xf32>
    %32 = vector.multi_reduction <add>, %31, %cst_21 [1] : vector<8x8xf32> to vector<8xf32>
    %33 = vector.shape_cast %32 : vector<8xf32> to vector<8x1xf32>
    %34 = tpu.reciprocal %33 : vector<8x1xf32> -> vector<8x1xf32>
    %35 = vector.broadcast %34 : vector<8x1xf32> to vector<8x8xf32>
    %36 = arith.mulf %31, %35 : vector<8x8xf32>
    %37 = vector.extract_strided_slice %21 {offsets = [0, 0], sizes = [8, 16], strides = [1, 1]} : vector<8x32xf32> to vector<8x16xf32>
    %cst_22 = arith.constant dense<0.000000e+00> : vector<8x16xf32>
    %38 = tpu.matmul %36, %37, %cst_22 {dimension_numbers = #tpu.dot_dimension_numbers<[1], [0], [0], [1], [0, 0, 1, 1], [], []>} : vector<8x8xf32>, vector<8x16xf32>, vector<8x16xf32> -> vector<8x16xf32>
    %39 = vector.extract_strided_slice %4 {offsets = [0, 0], sizes = [16, 32], strides = [1, 1]} : vector<32x32xf32> to vector<16x32xf32>
    %cst_23 = arith.constant dense<0.000000e+00> : vector<8x32xf32>
    %40 = tpu.matmul %38, %39, %cst_23 {dimension_numbers = #tpu.dot_dimension_numbers<[1], [0], [0], [1], [0, 0, 1, 1], [], []>} : vector<8x16xf32>, vector<16x32xf32>, vector<8x32xf32> -> vector<8x32xf32>
    %41 = vector.broadcast %5 : vector<1x32xf32> to vector<8x32xf32>
    %42 = arith.addf %41, %40 : vector<8x32xf32>
    %43 = vector.extract_strided_slice %19 {offsets = [0, 16], sizes = [8, 16], strides = [1, 1]} : vector<8x32xf32> to vector<8x16xf32>
    %44 = vector.extract_strided_slice %20 {offsets = [0, 16], sizes = [8, 16], strides = [1, 1]} : vector<8x32xf32> to vector<8x16xf32>
    %cst_24 = arith.constant dense<0.000000e+00> : vector<8x8xf32>
    %45 = tpu.matmul %43, %44, %cst_24 {dimension_numbers = #tpu.dot_dimension_numbers<[1], [1], [0], [0], [0, 0, 1, 0], [], []>} : vector<8x16xf32>, vector<8x16xf32>, vector<8x8xf32> -> vector<8x8xf32>
    %cst_25 = arith.constant 2.500000e-01 : f32
    %46 = vector.broadcast %cst_25 : f32 to vector<8x8xf32>
    %47 = arith.mulf %45, %46 : vector<8x8xf32>
    %cst_26 = arith.constant dense<0xFF800000> : vector<8xf32>
    %48 = vector.multi_reduction <maximumf>, %47, %cst_26 [1] : vector<8x8xf32> to vector<8xf32>
    %49 = vector.shape_cast %48 : vector<8xf32> to vector<8x1xf32>
    %50 = vector.broadcast %49 : vector<8x1xf32> to vector<8x8xf32>
    %51 = arith.subf %47, %50 : vector<8x8xf32>
    %52 = math.exp %51 : vector<8x8xf32>
    %cst_27 = arith.constant dense<0.000000e+00> : vector<8xf32>
    %53 = vector.multi_reduction <add>, %52, %cst_27 [1] : vector<8x8xf32> to vector<8xf32>
    %54 = vector.shape_cast %53 : vector<8xf32> to vector<8x1xf32>
    %55 = tpu.reciprocal %54 : vector<8x1xf32> -> vector<8x1xf32>
    %56 = vector.broadcast %55 : vector<8x1xf32> to vector<8x8xf32>
    %57 = arith.mulf %52, %56 : vector<8x8xf32>
    %58 = vector.extract_strided_slice %21 {offsets = [0, 16], sizes = [8, 16], strides = [1, 1]} : vector<8x32xf32> to vector<8x16xf32>
    %cst_28 = arith.constant dense<0.000000e+00> : vector<8x16xf32>
    %59 = tpu.matmul %57, %58, %cst_28 {dimension_numbers = #tpu.dot_dimension_numbers<[1], [0], [0], [1], [0, 0, 1, 1], [], []>} : vector<8x8xf32>, vector<8x16xf32>, vector<8x16xf32> -> vector<8x16xf32>
    %60 = vector.extract_strided_slice %4 {offsets = [16, 0], sizes = [16, 32], strides = [1, 1]} : vector<32x32xf32> to vector<16x32xf32>
    %cst_29 = arith.constant dense<0.000000e+00> : vector<8x32xf32>
    %61 = tpu.matmul %59, %60, %cst_29 {dimension_numbers = #tpu.dot_dimension_numbers<[1], [0], [0], [1], [0, 0, 1, 1], [], []>} : vector<8x16xf32>, vector<16x32xf32>, vector<8x32xf32> -> vector<8x32xf32>
    %62 = arith.addf %42, %61 : vector<8x32xf32>
    %63 = vector.extract_strided_slice %17 {offsets = [8, 0], sizes = [8, 32], strides = [1, 1]} : vector<16x32xf32> to vector<8x32xf32>
    %64 = vector.extract_strided_slice %18 {offsets = [8, 0], sizes = [8, 32], strides = [1, 1]} : vector<16x32xf32> to vector<8x32xf32>
    %65 = vector.extract_strided_slice %16 {offsets = [8, 0], sizes = [8, 32], strides = [1, 1]} : vector<16x32xf32> to vector<8x32xf32>
    %66 = vector.extract_strided_slice %63 {offsets = [0, 0], sizes = [8, 16], strides = [1, 1]} : vector<8x32xf32> to vector<8x16xf32>
    %67 = vector.extract_strided_slice %64 {offsets = [0, 0], sizes = [8, 16], strides = [1, 1]} : vector<8x32xf32> to vector<8x16xf32>
    %cst_30 = arith.constant dense<0.000000e+00> : vector<8x8xf32>
    %68 = tpu.matmul %66, %67, %cst_30 {dimension_numbers = #tpu.dot_dimension_numbers<[1], [1], [0], [0], [0, 0, 1, 0], [], []>} : vector<8x16xf32>, vector<8x16xf32>, vector<8x8xf32> -> vector<8x8xf32>
    %cst_31 = arith.constant 2.500000e-01 : f32
    %69 = vector.broadcast %cst_31 : f32 to vector<8x8xf32>
    %70 = arith.mulf %68, %69 : vector<8x8xf32>
    %cst_32 = arith.constant dense<0xFF800000> : vector<8xf32>
    %71 = vector.multi_reduction <maximumf>, %70, %cst_32 [1] : vector<8x8xf32> to vector<8xf32>
    %72 = vector.shape_cast %71 : vector<8xf32> to vector<8x1xf32>
    %73 = vector.broadcast %72 : vector<8x1xf32> to vector<8x8xf32>
    %74 = arith.subf %70, %73 : vector<8x8xf32>
    %75 = math.exp %74 : vector<8x8xf32>
    %cst_33 = arith.constant dense<0.000000e+00> : vector<8xf32>
    %76 = vector.multi_reduction <add>, %75, %cst_33 [1] : vector<8x8xf32> to vector<8xf32>
    %77 = vector.shape_cast %76 : vector<8xf32> to vector<8x1xf32>
    %78 = tpu.reciprocal %77 : vector<8x1xf32> -> vector<8x1xf32>
    %79 = vector.broadcast %78 : vector<8x1xf32> to vector<8x8xf32>
    %80 = arith.mulf %75, %79 : vector<8x8xf32>
    %81 = vector.extract_strided_slice %65 {offsets = [0, 0], sizes = [8, 16], strides = [1, 1]} : vector<8x32xf32> to vector<8x16xf32>
    %cst_34 = arith.constant dense<0.000000e+00> : vector<8x16xf32>
    %82 = tpu.matmul %80, %81, %cst_34 {dimension_numbers = #tpu.dot_dimension_numbers<[1], [0], [0], [1], [0, 0, 1, 1], [], []>} : vector<8x8xf32>, vector<8x16xf32>, vector<8x16xf32> -> vector<8x16xf32>
    %83 = vector.extract_strided_slice %4 {offsets = [0, 0], sizes = [16, 32], strides = [1, 1]} : vector<32x32xf32> to vector<16x32xf32>
    %cst_35 = arith.constant dense<0.000000e+00> : vector<8x32xf32>
    %84 = tpu.matmul %82, %83, %cst_35 {dimension_numbers = #tpu.dot_dimension_numbers<[1], [0], [0], [1], [0, 0, 1, 1], [], []>} : vector<8x16xf32>, vector<16x32xf32>, vector<8x32xf32> -> vector<8x32xf32>
    %85 = vector.broadcast %5 : vector<1x32xf32> to vector<8x32xf32>
    %86 = arith.addf %85, %84 : vector<8x32xf32>
    %87 = vector.extract_strided_slice %63 {offsets = [0, 16], sizes = [8, 16], strides = [1, 1]} : vector<8x32xf32> to vector<8x16xf32>
    %88 = vector.extract_strided_slice %64 {offsets = [0, 16], sizes = [8, 16], strides = [1, 1]} : vector<8x32xf32> to vector<8x16xf32>
    %cst_36 = arith.constant dense<0.000000e+00> : vector<8x8xf32>
    %89 = tpu.matmul %87, %88, %cst_36 {dimension_numbers = #tpu.dot_dimension_numbers<[1], [1], [0], [0], [0, 0, 1, 0], [], []>} : vector<8x16xf32>, vector<8x16xf32>, vector<8x8xf32> -> vector<8x8xf32>
    %cst_37 = arith.constant 2.500000e-01 : f32
    %90 = vector.broadcast %cst_37 : f32 to vector<8x8xf32>
    %91 = arith.mulf %89, %90 : vector<8x8xf32>
    %cst_38 = arith.constant dense<0xFF800000> : vector<8xf32>
    %92 = vector.multi_reduction <maximumf>, %91, %cst_38 [1] : vector<8x8xf32> to vector<8xf32>
    %93 = vector.shape_cast %92 : vector<8xf32> to vector<8x1xf32>
    %94 = vector.broadcast %93 : vector<8x1xf32> to vector<8x8xf32>
    %95 = arith.subf %91, %94 : vector<8x8xf32>
    %96 = math.exp %95 : vector<8x8xf32>
    %cst_39 = arith.constant dense<0.000000e+00> : vector<8xf32>
    %97 = vector.multi_reduction <add>, %96, %cst_39 [1] : vector<8x8xf32> to vector<8xf32>
    %98 = vector.shape_cast %97 : vector<8xf32> to vector<8x1xf32>
    %99 = tpu.reciprocal %98 : vector<8x1xf32> -> vector<8x1xf32>
    %100 = vector.broadcast %99 : vector<8x1xf32> to vector<8x8xf32>
    %101 = arith.mulf %96, %100 : vector<8x8xf32>
    %102 = vector.extract_strided_slice %65 {offsets = [0, 16], sizes = [8, 16], strides = [1, 1]} : vector<8x32xf32> to vector<8x16xf32>
    %cst_40 = arith.constant dense<0.000000e+00> : vector<8x16xf32>
    %103 = tpu.matmul %101, %102, %cst_40 {dimension_numbers = #tpu.dot_dimension_numbers<[1], [0], [0], [1], [0, 0, 1, 1], [], []>} : vector<8x8xf32>, vector<8x16xf32>, vector<8x16xf32> -> vector<8x16xf32>
    %104 = vector.extract_strided_slice %4 {offsets = [16, 0], sizes = [16, 32], strides = [1, 1]} : vector<32x32xf32> to vector<16x32xf32>
    %cst_41 = arith.constant dense<0.000000e+00> : vector<8x32xf32>
    %105 = tpu.matmul %103, %104, %cst_41 {dimension_numbers = #tpu.dot_dimension_numbers<[1], [0], [0], [1], [0, 0, 1, 1], [], []>} : vector<8x16xf32>, vector<16x32xf32>, vector<8x32xf32> -> vector<8x32xf32>
    %106 = arith.addf %86, %105 : vector<8x32xf32>
    %107 = tpu.concatenate %62, %106 in 0 : vector<8x32xf32>, vector<8x32xf32> -> vector<16x32xf32>
    %108 = arith.addf %0, %107 : vector<16x32xf32>
    %c32 = arith.constant 32 : index
    %c0_42 = arith.constant 0 : index
    %109 = vector.load %arg5[%c32, %c0_42] : memref<48x128xf32, #tpu.memory_space<vmem>>, vector<1x32xf32>
    %c32_43 = arith.constant 32 : index
    %c32_44 = arith.constant 32 : index
    %110 = vector.load %arg5[%c32_43, %c32_44] : memref<48x128xf32, #tpu.memory_space<vmem>>, vector<1x32xf32>
    %cst_45 = arith.constant dense<0.000000e+00> : vector<16xf32>
    %111 = vector.multi_reduction <add>, %108, %cst_45 [1] : vector<16x32xf32> to vector<16xf32>
    %112 = vector.shape_cast %111 : vector<16xf32> to vector<16x1xf32>
    %cst_46 = arith.constant 3.200000e+01 : f32
    %113 = vector.broadcast %cst_46 : f32 to vector<16x1xf32>
    %114 = arith.divf %112, %113 : vector<16x1xf32>
    %115 = vector.broadcast %114 : vector<16x1xf32> to vector<16x32xf32>
    %116 = arith.subf %108, %115 : vector<16x32xf32>
    %117 = arith.mulf %116, %116 : vector<16x32xf32>
    %cst_47 = arith.constant dense<0.000000e+00> : vector<16xf32>
    %118 = vector.multi_reduction <add>, %117, %cst_47 [1] : vector<16x32xf32> to vector<16xf32>
    %119 = vector.shape_cast %118 : vector<16xf32> to vector<16x1xf32>
    %cst_48 = arith.constant 3.200000e+01 : f32
    %120 = vector.broadcast %cst_48 : f32 to vector<16x1xf32>
    %121 = arith.divf %119, %120 : vector<16x1xf32>
    %cst_49 = arith.constant 9.99999997E-7 : f32
    %122 = vector.broadcast %cst_49 : f32 to vector<16x1xf32>
    %123 = arith.addf %121, %122 : vector<16x1xf32>
    %124 = math.rsqrt %123 : vector<16x1xf32>
    %125 = vector.broadcast %124 : vector<16x1xf32> to vector<16x32xf32>
    %126 = arith.mulf %116, %125 : vector<16x32xf32>
    %127 = vector.broadcast %109 : vector<1x32xf32> to vector<16x32xf32>
    %128 = arith.mulf %126, %127 : vector<16x32xf32>
    %129 = vector.broadcast %110 : vector<1x32xf32> to vector<16x32xf32>
    %130 = arith.addf %128, %129 : vector<16x32xf32>
    %131 = arith.addf %130, %2 : vector<16x32xf32>
    %c32_50 = arith.constant 32 : index
    %c0_51 = arith.constant 0 : index
    %132 = vector.load %arg4[%c32_50, %c0_51] : memref<176x128xf32, #tpu.memory_space<vmem>>, vector<32x16xf32>
    %cst_52 = arith.constant dense<0.000000e+00> : vector<16x16xf32>
    %133 = tpu.matmul %131, %132, %cst_52 {dimension_numbers = #tpu.dot_dimension_numbers<[1], [0], [0], [1], [0, 0, 1, 1], [], []>} : vector<16x32xf32>, vector<32x16xf32>, vector<16x16xf32> -> vector<16x16xf32>
    %c8 = arith.constant 8 : index
    %c0_53 = arith.constant 0 : index
    %134 = vector.load %arg5[%c8, %c0_53] : memref<48x128xf32, #tpu.memory_space<vmem>>, vector<1x16xf32>
    %135 = vector.broadcast %134 : vector<1x16xf32> to vector<16x16xf32>
    %136 = arith.addf %133, %135 : vector<16x16xf32>
    %137 = arith.addf %1, %3 : vector<32x32xf32>
    %c32_54 = arith.constant 32 : index
    %c16 = arith.constant 16 : index
    %138 = vector.load %arg4[%c32_54, %c16] : memref<176x128xf32, #tpu.memory_space<vmem>>, vector<32x16xf32>
    %cst_55 = arith.constant dense<0.000000e+00> : vector<32x16xf32>
    %139 = tpu.matmul %137, %138, %cst_55 {dimension_numbers = #tpu.dot_dimension_numbers<[1], [0], [0], [1], [0, 0, 1, 1], [], []>} : vector<32x32xf32>, vector<32x16xf32>, vector<32x16xf32> -> vector<32x16xf32>
    %c8_56 = arith.constant 8 : index
    %c16_57 = arith.constant 16 : index
    %140 = vector.load %arg5[%c8_56, %c16_57] : memref<48x128xf32, #tpu.memory_space<vmem>>, vector<1x16xf32>
    %141 = vector.broadcast %140 : vector<1x16xf32> to vector<32x16xf32>
    %142 = arith.addf %139, %141 : vector<32x16xf32>
    %c32_58 = arith.constant 32 : index
    %c32_59 = arith.constant 32 : index
    %143 = vector.load %arg4[%c32_58, %c32_59] : memref<176x128xf32, #tpu.memory_space<vmem>>, vector<32x16xf32>
    %cst_60 = arith.constant dense<0.000000e+00> : vector<32x16xf32>
    %144 = tpu.matmul %1, %143, %cst_60 {dimension_numbers = #tpu.dot_dimension_numbers<[1], [0], [0], [1], [0, 0, 1, 1], [], []>} : vector<32x32xf32>, vector<32x16xf32>, vector<32x16xf32> -> vector<32x16xf32>
    %c8_61 = arith.constant 8 : index
    %c32_62 = arith.constant 32 : index
    %145 = vector.load %arg5[%c8_61, %c32_62] : memref<48x128xf32, #tpu.memory_space<vmem>>, vector<1x16xf32>
    %146 = vector.broadcast %145 : vector<1x16xf32> to vector<32x16xf32>
    %147 = arith.addf %144, %146 : vector<32x16xf32>
    %c160 = arith.constant 160 : index
    %c0_63 = arith.constant 0 : index
    %148 = vector.load %arg4[%c160, %c0_63] : memref<176x128xf32, #tpu.memory_space<vmem>>, vector<16x32xf32>
    %c8_64 = arith.constant 8 : index
    %c48 = arith.constant 48 : index
    %149 = vector.load %arg5[%c8_64, %c48] : memref<48x128xf32, #tpu.memory_space<vmem>>, vector<1x32xf32>
    %150 = vector.extract_strided_slice %136 {offsets = [0, 0], sizes = [8, 16], strides = [1, 1]} : vector<16x16xf32> to vector<8x16xf32>
    %151 = vector.extract_strided_slice %142 {offsets = [0, 0], sizes = [16, 16], strides = [1, 1]} : vector<32x16xf32> to vector<16x16xf32>
    %152 = vector.extract_strided_slice %147 {offsets = [0, 0], sizes = [16, 16], strides = [1, 1]} : vector<32x16xf32> to vector<16x16xf32>
    %153 = vector.extract_strided_slice %150 {offsets = [0, 0], sizes = [8, 8], strides = [1, 1]} : vector<8x16xf32> to vector<8x8xf32>
    %154 = vector.extract_strided_slice %151 {offsets = [0, 0], sizes = [16, 8], strides = [1, 1]} : vector<16x16xf32> to vector<16x8xf32>
    %cst_65 = arith.constant dense<0.000000e+00> : vector<8x16xf32>
    %155 = tpu.matmul %153, %154, %cst_65 {dimension_numbers = #tpu.dot_dimension_numbers<[1], [1], [0], [0], [0, 0, 1, 0], [], []>} : vector<8x8xf32>, vector<16x8xf32>, vector<8x16xf32> -> vector<8x16xf32>
    %cst_66 = arith.constant 0.353553385 : f32
    %156 = vector.broadcast %cst_66 : f32 to vector<8x16xf32>
    %157 = arith.mulf %155, %156 : vector<8x16xf32>
    %cst_67 = arith.constant dense<0xFF800000> : vector<8xf32>
    %158 = vector.multi_reduction <maximumf>, %157, %cst_67 [1] : vector<8x16xf32> to vector<8xf32>
    %159 = vector.shape_cast %158 : vector<8xf32> to vector<8x1xf32>
    %160 = vector.broadcast %159 : vector<8x1xf32> to vector<8x16xf32>
    %161 = arith.subf %157, %160 : vector<8x16xf32>
    %162 = math.exp %161 : vector<8x16xf32>
    %cst_68 = arith.constant dense<0.000000e+00> : vector<8xf32>
    %163 = vector.multi_reduction <add>, %162, %cst_68 [1] : vector<8x16xf32> to vector<8xf32>
    %164 = vector.shape_cast %163 : vector<8xf32> to vector<8x1xf32>
    %165 = tpu.reciprocal %164 : vector<8x1xf32> -> vector<8x1xf32>
    %166 = vector.broadcast %165 : vector<8x1xf32> to vector<8x16xf32>
    %167 = arith.mulf %162, %166 : vector<8x16xf32>
    %168 = vector.extract_strided_slice %152 {offsets = [0, 0], sizes = [16, 8], strides = [1, 1]} : vector<16x16xf32> to vector<16x8xf32>
    %cst_69 = arith.constant dense<0.000000e+00> : vector<8x8xf32>
    %169 = tpu.matmul %167, %168, %cst_69 {dimension_numbers = #tpu.dot_dimension_numbers<[1], [0], [0], [1], [0, 0, 1, 1], [], []>} : vector<8x16xf32>, vector<16x8xf32>, vector<8x8xf32> -> vector<8x8xf32>
    %170 = vector.extract_strided_slice %148 {offsets = [0, 0], sizes = [8, 32], strides = [1, 1]} : vector<16x32xf32> to vector<8x32xf32>
    %cst_70 = arith.constant dense<0.000000e+00> : vector<8x32xf32>
    %171 = tpu.matmul %169, %170, %cst_70 {dimension_numbers = #tpu.dot_dimension_numbers<[1], [0], [0], [1], [0, 0, 1, 1], [], []>} : vector<8x8xf32>, vector<8x32xf32>, vector<8x32xf32> -> vector<8x32xf32>
    %172 = vector.broadcast %149 : vector<1x32xf32> to vector<8x32xf32>
    %173 = arith.addf %172, %171 : vector<8x32xf32>
    %174 = vector.extract_strided_slice %150 {offsets = [0, 8], sizes = [8, 8], strides = [1, 1]} : vector<8x16xf32> to vector<8x8xf32>
    %175 = vector.extract_strided_slice %151 {offsets = [0, 8], sizes = [16, 8], strides = [1, 1]} : vector<16x16xf32> to vector<16x8xf32>
    %cst_71 = arith.constant dense<0.000000e+00> : vector<8x16xf32>
    %176 = tpu.matmul %174, %175, %cst_71 {dimension_numbers = #tpu.dot_dimension_numbers<[1], [1], [0], [0], [0, 0, 1, 0], [], []>} : vector<8x8xf32>, vector<16x8xf32>, vector<8x16xf32> -> vector<8x16xf32>
    %cst_72 = arith.constant 0.353553385 : f32
    %177 = vector.broadcast %cst_72 : f32 to vector<8x16xf32>
    %178 = arith.mulf %176, %177 : vector<8x16xf32>
    %cst_73 = arith.constant dense<0xFF800000> : vector<8xf32>
    %179 = vector.multi_reduction <maximumf>, %178, %cst_73 [1] : vector<8x16xf32> to vector<8xf32>
    %180 = vector.shape_cast %179 : vector<8xf32> to vector<8x1xf32>
    %181 = vector.broadcast %180 : vector<8x1xf32> to vector<8x16xf32>
    %182 = arith.subf %178, %181 : vector<8x16xf32>
    %183 = math.exp %182 : vector<8x16xf32>
    %cst_74 = arith.constant dense<0.000000e+00> : vector<8xf32>
    %184 = vector.multi_reduction <add>, %183, %cst_74 [1] : vector<8x16xf32> to vector<8xf32>
    %185 = vector.shape_cast %184 : vector<8xf32> to vector<8x1xf32>
    %186 = tpu.reciprocal %185 : vector<8x1xf32> -> vector<8x1xf32>
    %187 = vector.broadcast %186 : vector<8x1xf32> to vector<8x16xf32>
    %188 = arith.mulf %183, %187 : vector<8x16xf32>
    %189 = vector.extract_strided_slice %152 {offsets = [0, 8], sizes = [16, 8], strides = [1, 1]} : vector<16x16xf32> to vector<16x8xf32>
    %cst_75 = arith.constant dense<0.000000e+00> : vector<8x8xf32>
    %190 = tpu.matmul %188, %189, %cst_75 {dimension_numbers = #tpu.dot_dimension_numbers<[1], [0], [0], [1], [0, 0, 1, 1], [], []>} : vector<8x16xf32>, vector<16x8xf32>, vector<8x8xf32> -> vector<8x8xf32>
    %191 = vector.extract_strided_slice %148 {offsets = [8, 0], sizes = [8, 32], strides = [1, 1]} : vector<16x32xf32> to vector<8x32xf32>
    %cst_76 = arith.constant dense<0.000000e+00> : vector<8x32xf32>
    %192 = tpu.matmul %190, %191, %cst_76 {dimension_numbers = #tpu.dot_dimension_numbers<[1], [0], [0], [1], [0, 0, 1, 1], [], []>} : vector<8x8xf32>, vector<8x32xf32>, vector<8x32xf32> -> vector<8x32xf32>
    %193 = arith.addf %173, %192 : vector<8x32xf32>
    %194 = vector.extract_strided_slice %136 {offsets = [8, 0], sizes = [8, 16], strides = [1, 1]} : vector<16x16xf32> to vector<8x16xf32>
    %195 = vector.extract_strided_slice %142 {offsets = [16, 0], sizes = [16, 16], strides = [1, 1]} : vector<32x16xf32> to vector<16x16xf32>
    %196 = vector.extract_strided_slice %147 {offsets = [16, 0], sizes = [16, 16], strides = [1, 1]} : vector<32x16xf32> to vector<16x16xf32>
    %197 = vector.extract_strided_slice %194 {offsets = [0, 0], sizes = [8, 8], strides = [1, 1]} : vector<8x16xf32> to vector<8x8xf32>
    %198 = vector.extract_strided_slice %195 {offsets = [0, 0], sizes = [16, 8], strides = [1, 1]} : vector<16x16xf32> to vector<16x8xf32>
    %cst_77 = arith.constant dense<0.000000e+00> : vector<8x16xf32>
    %199 = tpu.matmul %197, %198, %cst_77 {dimension_numbers = #tpu.dot_dimension_numbers<[1], [1], [0], [0], [0, 0, 1, 0], [], []>} : vector<8x8xf32>, vector<16x8xf32>, vector<8x16xf32> -> vector<8x16xf32>
    %cst_78 = arith.constant 0.353553385 : f32
    %200 = vector.broadcast %cst_78 : f32 to vector<8x16xf32>
    %201 = arith.mulf %199, %200 : vector<8x16xf32>
    %cst_79 = arith.constant dense<0xFF800000> : vector<8xf32>
    %202 = vector.multi_reduction <maximumf>, %201, %cst_79 [1] : vector<8x16xf32> to vector<8xf32>
    %203 = vector.shape_cast %202 : vector<8xf32> to vector<8x1xf32>
    %204 = vector.broadcast %203 : vector<8x1xf32> to vector<8x16xf32>
    %205 = arith.subf %201, %204 : vector<8x16xf32>
    %206 = math.exp %205 : vector<8x16xf32>
    %cst_80 = arith.constant dense<0.000000e+00> : vector<8xf32>
    %207 = vector.multi_reduction <add>, %206, %cst_80 [1] : vector<8x16xf32> to vector<8xf32>
    %208 = vector.shape_cast %207 : vector<8xf32> to vector<8x1xf32>
    %209 = tpu.reciprocal %208 : vector<8x1xf32> -> vector<8x1xf32>
    %210 = vector.broadcast %209 : vector<8x1xf32> to vector<8x16xf32>
    %211 = arith.mulf %206, %210 : vector<8x16xf32>
    %212 = vector.extract_strided_slice %196 {offsets = [0, 0], sizes = [16, 8], strides = [1, 1]} : vector<16x16xf32> to vector<16x8xf32>
    %cst_81 = arith.constant dense<0.000000e+00> : vector<8x8xf32>
    %213 = tpu.matmul %211, %212, %cst_81 {dimension_numbers = #tpu.dot_dimension_numbers<[1], [0], [0], [1], [0, 0, 1, 1], [], []>} : vector<8x16xf32>, vector<16x8xf32>, vector<8x8xf32> -> vector<8x8xf32>
    %214 = vector.extract_strided_slice %148 {offsets = [0, 0], sizes = [8, 32], strides = [1, 1]} : vector<16x32xf32> to vector<8x32xf32>
    %cst_82 = arith.constant dense<0.000000e+00> : vector<8x32xf32>
    %215 = tpu.matmul %213, %214, %cst_82 {dimension_numbers = #tpu.dot_dimension_numbers<[1], [0], [0], [1], [0, 0, 1, 1], [], []>} : vector<8x8xf32>, vector<8x32xf32>, vector<8x32xf32> -> vector<8x32xf32>
    %216 = vector.broadcast %149 : vector<1x32xf32> to vector<8x32xf32>
    %217 = arith.addf %216, %215 : vector<8x32xf32>
    %218 = vector.extract_strided_slice %194 {offsets = [0, 8], sizes = [8, 8], strides = [1, 1]} : vector<8x16xf32> to vector<8x8xf32>
    %219 = vector.extract_strided_slice %195 {offsets = [0, 8], sizes = [16, 8], strides = [1, 1]} : vector<16x16xf32> to vector<16x8xf32>
    %cst_83 = arith.constant dense<0.000000e+00> : vector<8x16xf32>
    %220 = tpu.matmul %218, %219, %cst_83 {dimension_numbers = #tpu.dot_dimension_numbers<[1], [1], [0], [0], [0, 0, 1, 0], [], []>} : vector<8x8xf32>, vector<16x8xf32>, vector<8x16xf32> -> vector<8x16xf32>
    %cst_84 = arith.constant 0.353553385 : f32
    %221 = vector.broadcast %cst_84 : f32 to vector<8x16xf32>
    %222 = arith.mulf %220, %221 : vector<8x16xf32>
    %cst_85 = arith.constant dense<0xFF800000> : vector<8xf32>
    %223 = vector.multi_reduction <maximumf>, %222, %cst_85 [1] : vector<8x16xf32> to vector<8xf32>
    %224 = vector.shape_cast %223 : vector<8xf32> to vector<8x1xf32>
    %225 = vector.broadcast %224 : vector<8x1xf32> to vector<8x16xf32>
    %226 = arith.subf %222, %225 : vector<8x16xf32>
    %227 = math.exp %226 : vector<8x16xf32>
    %cst_86 = arith.constant dense<0.000000e+00> : vector<8xf32>
    %228 = vector.multi_reduction <add>, %227, %cst_86 [1] : vector<8x16xf32> to vector<8xf32>
    %229 = vector.shape_cast %228 : vector<8xf32> to vector<8x1xf32>
    %230 = tpu.reciprocal %229 : vector<8x1xf32> -> vector<8x1xf32>
    %231 = vector.broadcast %230 : vector<8x1xf32> to vector<8x16xf32>
    %232 = arith.mulf %227, %231 : vector<8x16xf32>
    %233 = vector.extract_strided_slice %196 {offsets = [0, 8], sizes = [16, 8], strides = [1, 1]} : vector<16x16xf32> to vector<16x8xf32>
    %cst_87 = arith.constant dense<0.000000e+00> : vector<8x8xf32>
    %234 = tpu.matmul %232, %233, %cst_87 {dimension_numbers = #tpu.dot_dimension_numbers<[1], [0], [0], [1], [0, 0, 1, 1], [], []>} : vector<8x16xf32>, vector<16x8xf32>, vector<8x8xf32> -> vector<8x8xf32>
    %235 = vector.extract_strided_slice %148 {offsets = [8, 0], sizes = [8, 32], strides = [1, 1]} : vector<16x32xf32> to vector<8x32xf32>
    %cst_88 = arith.constant dense<0.000000e+00> : vector<8x32xf32>
    %236 = tpu.matmul %234, %235, %cst_88 {dimension_numbers = #tpu.dot_dimension_numbers<[1], [0], [0], [1], [0, 0, 1, 1], [], []>} : vector<8x8xf32>, vector<8x32xf32>, vector<8x32xf32> -> vector<8x32xf32>
    %237 = arith.addf %217, %236 : vector<8x32xf32>
    %238 = tpu.concatenate %193, %237 in 0 : vector<8x32xf32>, vector<8x32xf32> -> vector<16x32xf32>
    %239 = arith.addf %130, %238 : vector<16x32xf32>
    %c32_89 = arith.constant 32 : index
    %c64_90 = arith.constant 64 : index
    %240 = vector.load %arg5[%c32_89, %c64_90] : memref<48x128xf32, #tpu.memory_space<vmem>>, vector<1x32xf32>
    %c32_91 = arith.constant 32 : index
    %c96_92 = arith.constant 96 : index
    %241 = vector.load %arg5[%c32_91, %c96_92] : memref<48x128xf32, #tpu.memory_space<vmem>>, vector<1x32xf32>
    %cst_93 = arith.constant dense<0.000000e+00> : vector<16xf32>
    %242 = vector.multi_reduction <add>, %239, %cst_93 [1] : vector<16x32xf32> to vector<16xf32>
    %243 = vector.shape_cast %242 : vector<16xf32> to vector<16x1xf32>
    %cst_94 = arith.constant 3.200000e+01 : f32
    %244 = vector.broadcast %cst_94 : f32 to vector<16x1xf32>
    %245 = arith.divf %243, %244 : vector<16x1xf32>
    %246 = vector.broadcast %245 : vector<16x1xf32> to vector<16x32xf32>
    %247 = arith.subf %239, %246 : vector<16x32xf32>
    %248 = arith.mulf %247, %247 : vector<16x32xf32>
    %cst_95 = arith.constant dense<0.000000e+00> : vector<16xf32>
    %249 = vector.multi_reduction <add>, %248, %cst_95 [1] : vector<16x32xf32> to vector<16xf32>
    %250 = vector.shape_cast %249 : vector<16xf32> to vector<16x1xf32>
    %cst_96 = arith.constant 3.200000e+01 : f32
    %251 = vector.broadcast %cst_96 : f32 to vector<16x1xf32>
    %252 = arith.divf %250, %251 : vector<16x1xf32>
    %cst_97 = arith.constant 9.99999997E-7 : f32
    %253 = vector.broadcast %cst_97 : f32 to vector<16x1xf32>
    %254 = arith.addf %252, %253 : vector<16x1xf32>
    %255 = math.rsqrt %254 : vector<16x1xf32>
    %256 = vector.broadcast %255 : vector<16x1xf32> to vector<16x32xf32>
    %257 = arith.mulf %247, %256 : vector<16x32xf32>
    %258 = vector.broadcast %240 : vector<1x32xf32> to vector<16x32xf32>
    %259 = arith.mulf %257, %258 : vector<16x32xf32>
    %260 = vector.broadcast %241 : vector<1x32xf32> to vector<16x32xf32>
    %261 = arith.addf %259, %260 : vector<16x32xf32>
    %c64_98 = arith.constant 64 : index
    %c0_99 = arith.constant 0 : index
    %262 = vector.load %arg4[%c64_98, %c0_99] : memref<176x128xf32, #tpu.memory_space<vmem>>, vector<32x64xf32>
    %cst_100 = arith.constant dense<0.000000e+00> : vector<16x64xf32>
    %263 = tpu.matmul %261, %262, %cst_100 {dimension_numbers = #tpu.dot_dimension_numbers<[1], [0], [0], [1], [0, 0, 1, 1], [], []>} : vector<16x32xf32>, vector<32x64xf32>, vector<16x64xf32> -> vector<16x64xf32>
    %c24 = arith.constant 24 : index
    %c0_101 = arith.constant 0 : index
    %264 = vector.load %arg5[%c24, %c0_101] : memref<48x128xf32, #tpu.memory_space<vmem>>, vector<1x64xf32>
    %265 = vector.broadcast %264 : vector<1x64xf32> to vector<16x64xf32>
    %266 = arith.addf %263, %265 : vector<16x64xf32>
    %cst_102 = arith.constant 0.000000e+00 : f32
    %267 = vector.broadcast %cst_102 : f32 to vector<16x64xf32>
    %268 = arith.maximumf %266, %267 : vector<16x64xf32>
    %c96_103 = arith.constant 96 : index
    %c0_104 = arith.constant 0 : index
    %269 = vector.load %arg4[%c96_103, %c0_104] : memref<176x128xf32, #tpu.memory_space<vmem>>, vector<64x32xf32>
    %cst_105 = arith.constant dense<0.000000e+00> : vector<16x32xf32>
    %270 = tpu.matmul %268, %269, %cst_105 {dimension_numbers = #tpu.dot_dimension_numbers<[1], [0], [0], [1], [0, 0, 1, 1], [], []>} : vector<16x64xf32>, vector<64x32xf32>, vector<16x32xf32> -> vector<16x32xf32>
    %c24_106 = arith.constant 24 : index
    %c64_107 = arith.constant 64 : index
    %271 = vector.load %arg5[%c24_106, %c64_107] : memref<48x128xf32, #tpu.memory_space<vmem>>, vector<1x32xf32>
    %272 = vector.broadcast %271 : vector<1x32xf32> to vector<16x32xf32>
    %273 = arith.addf %270, %272 : vector<16x32xf32>
    %274 = arith.addf %261, %273 : vector<16x32xf32>
    %c40 = arith.constant 40 : index
    %c0_108 = arith.constant 0 : index
    %275 = vector.load %arg5[%c40, %c0_108] : memref<48x128xf32, #tpu.memory_space<vmem>>, vector<1x32xf32>
    %c40_109 = arith.constant 40 : index
    %c32_110 = arith.constant 32 : index
    %276 = vector.load %arg5[%c40_109, %c32_110] : memref<48x128xf32, #tpu.memory_space<vmem>>, vector<1x32xf32>
    %cst_111 = arith.constant dense<0.000000e+00> : vector<16xf32>
    %277 = vector.multi_reduction <add>, %274, %cst_111 [1] : vector<16x32xf32> to vector<16xf32>
    %278 = vector.shape_cast %277 : vector<16xf32> to vector<16x1xf32>
    %cst_112 = arith.constant 3.200000e+01 : f32
    %279 = vector.broadcast %cst_112 : f32 to vector<16x1xf32>
    %280 = arith.divf %278, %279 : vector<16x1xf32>
    %281 = vector.broadcast %280 : vector<16x1xf32> to vector<16x32xf32>
    %282 = arith.subf %274, %281 : vector<16x32xf32>
    %283 = arith.mulf %282, %282 : vector<16x32xf32>
    %cst_113 = arith.constant dense<0.000000e+00> : vector<16xf32>
    %284 = vector.multi_reduction <add>, %283, %cst_113 [1] : vector<16x32xf32> to vector<16xf32>
    %285 = vector.shape_cast %284 : vector<16xf32> to vector<16x1xf32>
    %cst_114 = arith.constant 3.200000e+01 : f32
    %286 = vector.broadcast %cst_114 : f32 to vector<16x1xf32>
    %287 = arith.divf %285, %286 : vector<16x1xf32>
    %cst_115 = arith.constant 9.99999997E-7 : f32
    %288 = vector.broadcast %cst_115 : f32 to vector<16x1xf32>
    %289 = arith.addf %287, %288 : vector<16x1xf32>
    %290 = math.rsqrt %289 : vector<16x1xf32>
    %291 = vector.broadcast %290 : vector<16x1xf32> to vector<16x32xf32>
    %292 = arith.mulf %282, %291 : vector<16x32xf32>
    %293 = vector.broadcast %275 : vector<1x32xf32> to vector<16x32xf32>
    %294 = arith.mulf %292, %293 : vector<16x32xf32>
    %295 = vector.broadcast %276 : vector<1x32xf32> to vector<16x32xf32>
    %296 = arith.addf %294, %295 : vector<16x32xf32>
    %297 = arith.addf %1, %3 : vector<32x32xf32>
    %c32_116 = arith.constant 32 : index
    %c48_117 = arith.constant 48 : index
    %298 = vector.load %arg4[%c32_116, %c48_117] : memref<176x128xf32, #tpu.memory_space<vmem>>, vector<32x16xf32>
    %cst_118 = arith.constant dense<0.000000e+00> : vector<32x16xf32>
    %299 = tpu.matmul %297, %298, %cst_118 {dimension_numbers = #tpu.dot_dimension_numbers<[1], [0], [0], [1], [0, 0, 1, 1], [], []>} : vector<32x32xf32>, vector<32x16xf32>, vector<32x16xf32> -> vector<32x16xf32>
    %c16_119 = arith.constant 16 : index
    %c0_120 = arith.constant 0 : index
    %300 = vector.load %arg5[%c16_119, %c0_120] : memref<48x128xf32, #tpu.memory_space<vmem>>, vector<1x16xf32>
    %301 = vector.broadcast %300 : vector<1x16xf32> to vector<32x16xf32>
    %302 = arith.addf %299, %301 : vector<32x16xf32>
    %303 = arith.addf %296, %2 : vector<16x32xf32>
    %c32_121 = arith.constant 32 : index
    %c64_122 = arith.constant 64 : index
    %304 = vector.load %arg4[%c32_121, %c64_122] : memref<176x128xf32, #tpu.memory_space<vmem>>, vector<32x16xf32>
    %cst_123 = arith.constant dense<0.000000e+00> : vector<16x16xf32>
    %305 = tpu.matmul %303, %304, %cst_123 {dimension_numbers = #tpu.dot_dimension_numbers<[1], [0], [0], [1], [0, 0, 1, 1], [], []>} : vector<16x32xf32>, vector<32x16xf32>, vector<16x16xf32> -> vector<16x16xf32>
    %c16_124 = arith.constant 16 : index
    %c16_125 = arith.constant 16 : index
    %306 = vector.load %arg5[%c16_124, %c16_125] : memref<48x128xf32, #tpu.memory_space<vmem>>, vector<1x16xf32>
    %307 = vector.broadcast %306 : vector<1x16xf32> to vector<16x16xf32>
    %308 = arith.addf %305, %307 : vector<16x16xf32>
    %c32_126 = arith.constant 32 : index
    %c80 = arith.constant 80 : index
    %309 = vector.load %arg4[%c32_126, %c80] : memref<176x128xf32, #tpu.memory_space<vmem>>, vector<32x16xf32>
    %cst_127 = arith.constant dense<0.000000e+00> : vector<16x16xf32>
    %310 = tpu.matmul %296, %309, %cst_127 {dimension_numbers = #tpu.dot_dimension_numbers<[1], [0], [0], [1], [0, 0, 1, 1], [], []>} : vector<16x32xf32>, vector<32x16xf32>, vector<16x16xf32> -> vector<16x16xf32>
    %c16_128 = arith.constant 16 : index
    %c32_129 = arith.constant 32 : index
    %311 = vector.load %arg5[%c16_128, %c32_129] : memref<48x128xf32, #tpu.memory_space<vmem>>, vector<1x16xf32>
    %312 = vector.broadcast %311 : vector<1x16xf32> to vector<16x16xf32>
    %313 = arith.addf %310, %312 : vector<16x16xf32>
    %c160_130 = arith.constant 160 : index
    %c32_131 = arith.constant 32 : index
    %314 = vector.load %arg4[%c160_130, %c32_131] : memref<176x128xf32, #tpu.memory_space<vmem>>, vector<16x32xf32>
    %c16_132 = arith.constant 16 : index
    %c48_133 = arith.constant 48 : index
    %315 = vector.load %arg5[%c16_132, %c48_133] : memref<48x128xf32, #tpu.memory_space<vmem>>, vector<1x32xf32>
    %316 = vector.extract_strided_slice %302 {offsets = [0, 0], sizes = [16, 16], strides = [1, 1]} : vector<32x16xf32> to vector<16x16xf32>
    %317 = vector.extract_strided_slice %308 {offsets = [0, 0], sizes = [8, 16], strides = [1, 1]} : vector<16x16xf32> to vector<8x16xf32>
    %318 = vector.extract_strided_slice %313 {offsets = [0, 0], sizes = [8, 16], strides = [1, 1]} : vector<16x16xf32> to vector<8x16xf32>
    %319 = vector.extract_strided_slice %316 {offsets = [0, 0], sizes = [16, 8], strides = [1, 1]} : vector<16x16xf32> to vector<16x8xf32>
    %320 = vector.extract_strided_slice %317 {offsets = [0, 0], sizes = [8, 8], strides = [1, 1]} : vector<8x16xf32> to vector<8x8xf32>
    %cst_134 = arith.constant dense<0.000000e+00> : vector<16x8xf32>
    %321 = tpu.matmul %319, %320, %cst_134 {dimension_numbers = #tpu.dot_dimension_numbers<[1], [1], [0], [0], [0, 0, 1, 0], [], []>} : vector<16x8xf32>, vector<8x8xf32>, vector<16x8xf32> -> vector<16x8xf32>
    %cst_135 = arith.constant 0.353553385 : f32
    %322 = vector.broadcast %cst_135 : f32 to vector<16x8xf32>
    %323 = arith.mulf %321, %322 : vector<16x8xf32>
    %cst_136 = arith.constant dense<0xFF800000> : vector<16xf32>
    %324 = vector.multi_reduction <maximumf>, %323, %cst_136 [1] : vector<16x8xf32> to vector<16xf32>
    %325 = vector.shape_cast %324 : vector<16xf32> to vector<16x1xf32>
    %326 = vector.broadcast %325 : vector<16x1xf32> to vector<16x8xf32>
    %327 = arith.subf %323, %326 : vector<16x8xf32>
    %328 = math.exp %327 : vector<16x8xf32>
    %cst_137 = arith.constant dense<0.000000e+00> : vector<16xf32>
    %329 = vector.multi_reduction <add>, %328, %cst_137 [1] : vector<16x8xf32> to vector<16xf32>
    %330 = vector.shape_cast %329 : vector<16xf32> to vector<16x1xf32>
    %331 = tpu.reciprocal %330 : vector<16x1xf32> -> vector<16x1xf32>
    %332 = vector.broadcast %331 : vector<16x1xf32> to vector<16x8xf32>
    %333 = arith.mulf %328, %332 : vector<16x8xf32>
    %334 = vector.extract_strided_slice %318 {offsets = [0, 0], sizes = [8, 8], strides = [1, 1]} : vector<8x16xf32> to vector<8x8xf32>
    %cst_138 = arith.constant dense<0.000000e+00> : vector<16x8xf32>
    %335 = tpu.matmul %333, %334, %cst_138 {dimension_numbers = #tpu.dot_dimension_numbers<[1], [0], [0], [1], [0, 0, 1, 1], [], []>} : vector<16x8xf32>, vector<8x8xf32>, vector<16x8xf32> -> vector<16x8xf32>
    %336 = vector.extract_strided_slice %314 {offsets = [0, 0], sizes = [8, 32], strides = [1, 1]} : vector<16x32xf32> to vector<8x32xf32>
    %cst_139 = arith.constant dense<0.000000e+00> : vector<16x32xf32>
    %337 = tpu.matmul %335, %336, %cst_139 {dimension_numbers = #tpu.dot_dimension_numbers<[1], [0], [0], [1], [0, 0, 1, 1], [], []>} : vector<16x8xf32>, vector<8x32xf32>, vector<16x32xf32> -> vector<16x32xf32>
    %338 = vector.broadcast %315 : vector<1x32xf32> to vector<16x32xf32>
    %339 = arith.addf %338, %337 : vector<16x32xf32>
    %340 = vector.extract_strided_slice %316 {offsets = [0, 8], sizes = [16, 8], strides = [1, 1]} : vector<16x16xf32> to vector<16x8xf32>
    %341 = vector.extract_strided_slice %317 {offsets = [0, 8], sizes = [8, 8], strides = [1, 1]} : vector<8x16xf32> to vector<8x8xf32>
    %cst_140 = arith.constant dense<0.000000e+00> : vector<16x8xf32>
    %342 = tpu.matmul %340, %341, %cst_140 {dimension_numbers = #tpu.dot_dimension_numbers<[1], [1], [0], [0], [0, 0, 1, 0], [], []>} : vector<16x8xf32>, vector<8x8xf32>, vector<16x8xf32> -> vector<16x8xf32>
    %cst_141 = arith.constant 0.353553385 : f32
    %343 = vector.broadcast %cst_141 : f32 to vector<16x8xf32>
    %344 = arith.mulf %342, %343 : vector<16x8xf32>
    %cst_142 = arith.constant dense<0xFF800000> : vector<16xf32>
    %345 = vector.multi_reduction <maximumf>, %344, %cst_142 [1] : vector<16x8xf32> to vector<16xf32>
    %346 = vector.shape_cast %345 : vector<16xf32> to vector<16x1xf32>
    %347 = vector.broadcast %346 : vector<16x1xf32> to vector<16x8xf32>
    %348 = arith.subf %344, %347 : vector<16x8xf32>
    %349 = math.exp %348 : vector<16x8xf32>
    %cst_143 = arith.constant dense<0.000000e+00> : vector<16xf32>
    %350 = vector.multi_reduction <add>, %349, %cst_143 [1] : vector<16x8xf32> to vector<16xf32>
    %351 = vector.shape_cast %350 : vector<16xf32> to vector<16x1xf32>
    %352 = tpu.reciprocal %351 : vector<16x1xf32> -> vector<16x1xf32>
    %353 = vector.broadcast %352 : vector<16x1xf32> to vector<16x8xf32>
    %354 = arith.mulf %349, %353 : vector<16x8xf32>
    %355 = vector.extract_strided_slice %318 {offsets = [0, 8], sizes = [8, 8], strides = [1, 1]} : vector<8x16xf32> to vector<8x8xf32>
    %cst_144 = arith.constant dense<0.000000e+00> : vector<16x8xf32>
    %356 = tpu.matmul %354, %355, %cst_144 {dimension_numbers = #tpu.dot_dimension_numbers<[1], [0], [0], [1], [0, 0, 1, 1], [], []>} : vector<16x8xf32>, vector<8x8xf32>, vector<16x8xf32> -> vector<16x8xf32>
    %357 = vector.extract_strided_slice %314 {offsets = [8, 0], sizes = [8, 32], strides = [1, 1]} : vector<16x32xf32> to vector<8x32xf32>
    %cst_145 = arith.constant dense<0.000000e+00> : vector<16x32xf32>
    %358 = tpu.matmul %356, %357, %cst_145 {dimension_numbers = #tpu.dot_dimension_numbers<[1], [0], [0], [1], [0, 0, 1, 1], [], []>} : vector<16x8xf32>, vector<8x32xf32>, vector<16x32xf32> -> vector<16x32xf32>
    %359 = arith.addf %339, %358 : vector<16x32xf32>
    %360 = vector.extract_strided_slice %302 {offsets = [16, 0], sizes = [16, 16], strides = [1, 1]} : vector<32x16xf32> to vector<16x16xf32>
    %361 = vector.extract_strided_slice %308 {offsets = [8, 0], sizes = [8, 16], strides = [1, 1]} : vector<16x16xf32> to vector<8x16xf32>
    %362 = vector.extract_strided_slice %313 {offsets = [8, 0], sizes = [8, 16], strides = [1, 1]} : vector<16x16xf32> to vector<8x16xf32>
    %363 = vector.extract_strided_slice %360 {offsets = [0, 0], sizes = [16, 8], strides = [1, 1]} : vector<16x16xf32> to vector<16x8xf32>
    %364 = vector.extract_strided_slice %361 {offsets = [0, 0], sizes = [8, 8], strides = [1, 1]} : vector<8x16xf32> to vector<8x8xf32>
    %cst_146 = arith.constant dense<0.000000e+00> : vector<16x8xf32>
    %365 = tpu.matmul %363, %364, %cst_146 {dimension_numbers = #tpu.dot_dimension_numbers<[1], [1], [0], [0], [0, 0, 1, 0], [], []>} : vector<16x8xf32>, vector<8x8xf32>, vector<16x8xf32> -> vector<16x8xf32>
    %cst_147 = arith.constant 0.353553385 : f32
    %366 = vector.broadcast %cst_147 : f32 to vector<16x8xf32>
    %367 = arith.mulf %365, %366 : vector<16x8xf32>
    %cst_148 = arith.constant dense<0xFF800000> : vector<16xf32>
    %368 = vector.multi_reduction <maximumf>, %367, %cst_148 [1] : vector<16x8xf32> to vector<16xf32>
    %369 = vector.shape_cast %368 : vector<16xf32> to vector<16x1xf32>
    %370 = vector.broadcast %369 : vector<16x1xf32> to vector<16x8xf32>
    %371 = arith.subf %367, %370 : vector<16x8xf32>
    %372 = math.exp %371 : vector<16x8xf32>
    %cst_149 = arith.constant dense<0.000000e+00> : vector<16xf32>
    %373 = vector.multi_reduction <add>, %372, %cst_149 [1] : vector<16x8xf32> to vector<16xf32>
    %374 = vector.shape_cast %373 : vector<16xf32> to vector<16x1xf32>
    %375 = tpu.reciprocal %374 : vector<16x1xf32> -> vector<16x1xf32>
    %376 = vector.broadcast %375 : vector<16x1xf32> to vector<16x8xf32>
    %377 = arith.mulf %372, %376 : vector<16x8xf32>
    %378 = vector.extract_strided_slice %362 {offsets = [0, 0], sizes = [8, 8], strides = [1, 1]} : vector<8x16xf32> to vector<8x8xf32>
    %cst_150 = arith.constant dense<0.000000e+00> : vector<16x8xf32>
    %379 = tpu.matmul %377, %378, %cst_150 {dimension_numbers = #tpu.dot_dimension_numbers<[1], [0], [0], [1], [0, 0, 1, 1], [], []>} : vector<16x8xf32>, vector<8x8xf32>, vector<16x8xf32> -> vector<16x8xf32>
    %380 = vector.extract_strided_slice %314 {offsets = [0, 0], sizes = [8, 32], strides = [1, 1]} : vector<16x32xf32> to vector<8x32xf32>
    %cst_151 = arith.constant dense<0.000000e+00> : vector<16x32xf32>
    %381 = tpu.matmul %379, %380, %cst_151 {dimension_numbers = #tpu.dot_dimension_numbers<[1], [0], [0], [1], [0, 0, 1, 1], [], []>} : vector<16x8xf32>, vector<8x32xf32>, vector<16x32xf32> -> vector<16x32xf32>
    %382 = vector.broadcast %315 : vector<1x32xf32> to vector<16x32xf32>
    %383 = arith.addf %382, %381 : vector<16x32xf32>
    %384 = vector.extract_strided_slice %360 {offsets = [0, 8], sizes = [16, 8], strides = [1, 1]} : vector<16x16xf32> to vector<16x8xf32>
    %385 = vector.extract_strided_slice %361 {offsets = [0, 8], sizes = [8, 8], strides = [1, 1]} : vector<8x16xf32> to vector<8x8xf32>
    %cst_152 = arith.constant dense<0.000000e+00> : vector<16x8xf32>
    %386 = tpu.matmul %384, %385, %cst_152 {dimension_numbers = #tpu.dot_dimension_numbers<[1], [1], [0], [0], [0, 0, 1, 0], [], []>} : vector<16x8xf32>, vector<8x8xf32>, vector<16x8xf32> -> vector<16x8xf32>
    %cst_153 = arith.constant 0.353553385 : f32
    %387 = vector.broadcast %cst_153 : f32 to vector<16x8xf32>
    %388 = arith.mulf %386, %387 : vector<16x8xf32>
    %cst_154 = arith.constant dense<0xFF800000> : vector<16xf32>
    %389 = vector.multi_reduction <maximumf>, %388, %cst_154 [1] : vector<16x8xf32> to vector<16xf32>
    %390 = vector.shape_cast %389 : vector<16xf32> to vector<16x1xf32>
    %391 = vector.broadcast %390 : vector<16x1xf32> to vector<16x8xf32>
    %392 = arith.subf %388, %391 : vector<16x8xf32>
    %393 = math.exp %392 : vector<16x8xf32>
    %cst_155 = arith.constant dense<0.000000e+00> : vector<16xf32>
    %394 = vector.multi_reduction <add>, %393, %cst_155 [1] : vector<16x8xf32> to vector<16xf32>
    %395 = vector.shape_cast %394 : vector<16xf32> to vector<16x1xf32>
    %396 = tpu.reciprocal %395 : vector<16x1xf32> -> vector<16x1xf32>
    %397 = vector.broadcast %396 : vector<16x1xf32> to vector<16x8xf32>
    %398 = arith.mulf %393, %397 : vector<16x8xf32>
    %399 = vector.extract_strided_slice %362 {offsets = [0, 8], sizes = [8, 8], strides = [1, 1]} : vector<8x16xf32> to vector<8x8xf32>
    %cst_156 = arith.constant dense<0.000000e+00> : vector<16x8xf32>
    %400 = tpu.matmul %398, %399, %cst_156 {dimension_numbers = #tpu.dot_dimension_numbers<[1], [0], [0], [1], [0, 0, 1, 1], [], []>} : vector<16x8xf32>, vector<8x8xf32>, vector<16x8xf32> -> vector<16x8xf32>
    %401 = vector.extract_strided_slice %314 {offsets = [8, 0], sizes = [8, 32], strides = [1, 1]} : vector<16x32xf32> to vector<8x32xf32>
    %cst_157 = arith.constant dense<0.000000e+00> : vector<16x32xf32>
    %402 = tpu.matmul %400, %401, %cst_157 {dimension_numbers = #tpu.dot_dimension_numbers<[1], [0], [0], [1], [0, 0, 1, 1], [], []>} : vector<16x8xf32>, vector<8x32xf32>, vector<16x32xf32> -> vector<16x32xf32>
    %403 = arith.addf %383, %402 : vector<16x32xf32>
    %404 = tpu.concatenate %359, %403 in 0 : vector<16x32xf32>, vector<16x32xf32> -> vector<32x32xf32>
    %405 = arith.addf %1, %404 : vector<32x32xf32>
    %c40_158 = arith.constant 40 : index
    %c64_159 = arith.constant 64 : index
    %406 = vector.load %arg5[%c40_158, %c64_159] : memref<48x128xf32, #tpu.memory_space<vmem>>, vector<1x32xf32>
    %c40_160 = arith.constant 40 : index
    %c96_161 = arith.constant 96 : index
    %407 = vector.load %arg5[%c40_160, %c96_161] : memref<48x128xf32, #tpu.memory_space<vmem>>, vector<1x32xf32>
    %cst_162 = arith.constant dense<0.000000e+00> : vector<32xf32>
    %408 = vector.multi_reduction <add>, %405, %cst_162 [1] : vector<32x32xf32> to vector<32xf32>
    %409 = vector.shape_cast %408 : vector<32xf32> to vector<32x1xf32>
    %cst_163 = arith.constant 3.200000e+01 : f32
    %410 = vector.broadcast %cst_163 : f32 to vector<32x1xf32>
    %411 = arith.divf %409, %410 : vector<32x1xf32>
    %412 = vector.broadcast %411 : vector<32x1xf32> to vector<32x32xf32>
    %413 = arith.subf %405, %412 : vector<32x32xf32>
    %414 = arith.mulf %413, %413 : vector<32x32xf32>
    %cst_164 = arith.constant dense<0.000000e+00> : vector<32xf32>
    %415 = vector.multi_reduction <add>, %414, %cst_164 [1] : vector<32x32xf32> to vector<32xf32>
    %416 = vector.shape_cast %415 : vector<32xf32> to vector<32x1xf32>
    %cst_165 = arith.constant 3.200000e+01 : f32
    %417 = vector.broadcast %cst_165 : f32 to vector<32x1xf32>
    %418 = arith.divf %416, %417 : vector<32x1xf32>
    %cst_166 = arith.constant 9.99999997E-7 : f32
    %419 = vector.broadcast %cst_166 : f32 to vector<32x1xf32>
    %420 = arith.addf %418, %419 : vector<32x1xf32>
    %421 = math.rsqrt %420 : vector<32x1xf32>
    %422 = vector.broadcast %421 : vector<32x1xf32> to vector<32x32xf32>
    %423 = arith.mulf %413, %422 : vector<32x32xf32>
    %424 = vector.broadcast %406 : vector<1x32xf32> to vector<32x32xf32>
    %425 = arith.mulf %423, %424 : vector<32x32xf32>
    %426 = vector.broadcast %407 : vector<1x32xf32> to vector<32x32xf32>
    %427 = arith.addf %425, %426 : vector<32x32xf32>
    %c0_167 = arith.constant 0 : index
    %c0_168 = arith.constant 0 : index
    %428 = vector.load %arg6[%c0_167, %c0_168] : memref<48x32xf32, #tpu.memory_space<vmem>>, vector<16x32xf32>
    tpu.vector_store %arg6[%c0_167, %c0_168], %296 {strides = array<i32>} : memref<48x32xf32, #tpu.memory_space<vmem>>, vector<16x32xf32>,
    %c16_169 = arith.constant 16 : index
    %c0_170 = arith.constant 0 : index
    %429 = vector.load %arg6[%c16_169, %c0_170] : memref<48x32xf32, #tpu.memory_space<vmem>>, vector<32x32xf32>
    tpu.vector_store %arg6[%c16_169, %c0_170], %427 {strides = array<i32>} : memref<48x32xf32, #tpu.memory_space<vmem>>, vector<32x32xf32>,
    return
  }
}

</mosaic_0001>

<bundles_post_ra>
// kernel: two_way_attention_block.1
= control target key start
LH: loop header
LB: loop body
LE: loop exit
PB: predicated region body
PF: predicated region fallthrough
CT: control target
= control target key end

     0   :  { %vm43_vm0 = vcmask 261120   ;;  %s2598_s11 = smov 96   ;;  %s2599_s12 = smov 64   ;;  %vm125_vm1 = vcmask 130048   ;;  %vm151_vm2 = vcmask 64512   ;;  %s3312_s4 = inlined_call_operand.vmem [shape: f32[176,128], index: 4, kind: input, shape index: {}]   ;;  %s3313_s0 = inlined_call_operand.vmem [shape: f32[16,32], index: 0, kind: input, shape index: {}]   ;;  %s3314_s2 = inlined_call_operand.vmem [shape: f32[16,32], index: 2, kind: input, shape index: {}]   ;;  %s3315_s5 = inlined_call_operand.vmem [shape: f32[48,128], index: 5, kind: input, shape index: {}]   ;;  %s3316_s1 = inlined_call_operand.vmem [shape: f32[32,32], index: 1, kind: input, shape index: {}]   ;;  %s3317_s3 = inlined_call_operand.vmem [shape: f32[32,32], index: 3, kind: input, shape index: {}]   ;;  %s3318_s6 = inlined_call_operand.vmem [shape: f32[48,32], index: 6, kind: output, shape index: {}]  }
   0x1   :  { %v38_v0 = vld [vmem:[%s3312_s4 + $0x18] sm:$0xff]  ;;  %v37_v1 = vld [vmem:[%s3312_s4 + $0x10] sm:$0xff]  ;;  %v2650_v2 = vld [vmem:[%s3313_s0] sm:$0xff]  ;;  %s2600_s13 = smov 80   ;;  %s2601_s14 = smov 112  }
   0x2   :  { %62 = vmatpush.msra.mxu0 %v38_v0  ;;  %v2655_v3 = vld [vmem:[%s3314_s2] sm:$0xff]  ;;  %v36_v4 = vld [vmem:[%s3312_s4 + $0x8] sm:$0xff]  ;;  %v2673_v10 = vpack.i.bf16 %v37_v1, %v38_v0  ;;  %s2605_s7 = smov 48  }
   0x3   :  { %v35_v5 = vld [vmem:[%s3312_s4] sm:$0xff]  ;;  %v40_v6 = vadd.f32 %v2655_v3, %v2650_v2  ;;  %v2688_v22 = vld [vmem:[%s3313_s0 + $0x8] sm:$0xff]  ;;  %s2602_s0 = smov 32  }
   0x4   :  { %63 = vmatpush.msra.mxu0 %v37_v1  ;;  %v2669_v7 = vld [vmem:[%s3315_s5] ss:$0 sm:$0xff]  ;;  %v2421_v11 = vpack.i.bf16 %v35_v5, %v36_v4  ;;  %v2698_v29 = vld [vmem:[%s3314_s2 + $0x8] sm:$0xff] }
   0x5   :  { %v41_v30 = vadd.f32 %v2698_v29, %v2688_v22 }
   0x6   :  { %64 = vmatpush.msra.mxu0 %v36_v4  ;;  %2422 = vrot.lane.b32.xlu1 %v2421_v11, %s2599_s12 }
   0x8   :  { %65 = vmatpush.msra.mxu0 %v35_v5 }
   0x9   :  { %2318 = vmatmul.msk.f32.vlgmr.msra.gmra.mxu0 %vm43_vm0, %v40_v6 }
  0x11   :  { %2319 = vmatmul.msk.f32.gmra.mxu0 %vm43_vm0, %v41_v30 }
  0x78   :  { %v2423_v16 = vpop.permute.xlu1 %2422 }
  0x79   :  { %v2424_v17 = vunpack.i.l.bf16 %v2423_v16  ;;  %v2425_v18 = vunpack.i.h.bf16 %v2423_v16 }
  0x86   :  { %v67_v8 = vpop.f32.mrf.mxu0 }
  0x87   :  { %v68_v9 = vadd.f32 %v2669_v7, %v67_v8 }
  0x89   :  { %123 = vrot.lane.b32.xlu0 %v68_v9, %s2598_s11 }
  0x8e   :  { %v70_v56 = vpop.f32.mrf.mxu0 }
  0x8f   :  { %v71_v57 = vadd.f32 %v2669_v7, %v70_v56 }
  0x91   :  { %2417 = vrot.lane.b32.xlu0 %v2673_v10, %s2599_s12 }
  0x99   :  { %235 = vrot.lane.b32.xlu0 %v68_v9, %s2600_s13 }
  0xa1   :  { %233 = vrot.lane.b32.xlu0 %v68_v9, %s2601_s14 }
  0xfb   :  { %v124_v12 = vpop.permute.xlu0 %123 }
  0xfc   :  { %2322 = vmatpush.xpose.msk.msra.mxu2 %vm125_vm1, %v124_v12 }
  0xff   :  { %2323 = vmatmul.msk.f32.vlgmr.msra.gmra.mxu2 %vm125_vm1, %v68_v9 }
 0x103   :  { %v2418_v13 = vpop.permute.xlu0 %2417 }
 0x104   :  { %v2419_v14 = vunpack.i.l.bf16 %v2418_v13  ;;  %v2420_v15 = vunpack.i.h.bf16 %v2418_v13 }
 0x106   :  { %111 = vmatpush.msra.mxu1 %v2419_v14 }
 0x108   :  { %112 = vmatpush.msra.mxu1 %v2420_v15 }
 0x10a   :  { %113 = vmatpush.msra.mxu1 %v2424_v17 }
 0x10b   :  { %v236_v39 = vpop.permute.xlu0 %235 }
 0x10c   :  { %114 = vmatpush.msra.mxu1 %v2425_v18 }
 0x10d   :  { %2320 = vmatmul.msk.f32.vlgmr.msra.gmra.mxu1 %vm43_vm0, %v2650_v2 }
 0x113   :  { %v234_v48 = vpop.permute.xlu0 %233 }
 0x115   :  { %2321 = vmatmul.msk.f32.gmra.mxu1 %vm43_vm0, %v2688_v22 }
 0x182   :  { %v147_v19 = vpop.f32.mrf.mxu2 }
 0x183   :  { %v150_v20 = vmul.f32 0.25, %v147_v19 }
 0x185   :  { %v152_v21 = vsel %vm151_vm2, %v150_v20, -inf }
 0x186   :  { %153 = vmax.xlane.f32.xlu1 %v152_v21 }
 0x18a   :  { %v116_v28 = vpop.f32.mrf.mxu1 }
 0x192   :  { %v119_v32 = vpop.f32.mrf.mxu1 }
 0x19f   :  { %2427 = vrot.lane.b32.xlu1 %v2421_v11, %s2602_s0 }
 0x1a7   :  { %2432 = vrot.lane.b32.xlu1 %v2673_v10, %s2602_s0 }
 0x1af   :  { %452 = vrot.lane.b32.xlu1 %v71_v57, %s2600_s13 }
 0x1b7   :  { %450 = vrot.lane.b32.xlu1 %v71_v57, %s2601_s14 }
 0x1f9   :  { %v154_v23 = vpop.xlane.xlu1 %153 }
 0x1fa   :  { %v155_v24 = vsub.f32 %v150_v20, %v154_v23 }
 0x1fc   :  { %v156_v25 = vmul.f32 1.442695, %v155_v24 }
 0x1fe   :  { %2502 = vpow2.f32 %v156_v25  ;;  %v634_v25 = vld [vmem:[%s3312_s4 + $0x38] sm:$0xff] }
 0x204   :  { %v2503_v26 = vpop.eup %2502 }
 0x205   :  { %v158_v27 = vsel %vm151_vm2, %v2503_v26, 0.0 }
 0x206   :  { %159 = vadd.xlane.f32.xlu2 %v158_v27 }
 0x211   :  { %v2428_v49 = vpop.permute.xlu1 %2427 }
 0x212   :  { %v2429_v50 = vunpack.i.l.bf16 %v2428_v49  ;;  %v2430_v51 = vunpack.i.h.bf16 %v2428_v49 }
 0x214   :  { %222 = vmatpush.msra.mxu3 %v2429_v50 }
 0x216   :  { %223 = vmatpush.msra.mxu3 %v2430_v51 }
 0x219   :  { %v2433_v20 = vpop.permute.xlu1 %2432 }
 0x21a   :  { %v2435_v21 = vunpack.i.h.bf16 %v2433_v20  ;;  %v2434_v23 = vunpack.i.l.bf16 %v2433_v20  ;;  %v632_v20 = vld [vmem:[%s3312_s4 + $0x28] sm:$0xff] }
 0x21e   :  { %90 = vrot.lane.b32.xlu2 %v2669_v7, %s2599_s12 }
 0x221   :  { %v453_v24 = vpop.permute.xlu1 %452 }
 0x279   :  { %v160_v31 = vpop.xlane.xlu2 %159 }
 0x27a   :  { %2504 = vrcp.f32 %v160_v31  ;;  %v172_v40 = vand.u32 2147483648, %v160_v31  ;;  %v170_v42 = vand.u32 2147483647, %v160_v31  ;;  %vm166_vm4 = vweird.f32 %v160_v31 }
 0x27c   :  { %v173_v44 = vor.u32 1.1754944e-38, %v172_v40  ;;  %vm171_vm6 = vcmp.eq.f32.partialorder %v170_v42, 8.507059e+37 }
 0x280   :  { %v2505_v33 = vpop.eup %2504 }
 0x281   :  { %v162_v34 = vmul.f32 %v2505_v33, %v160_v31  ;;  %v91_v35 = vpop.permute.xlu2 %90  ;;  %vm167_vm3 = vweird.f32 %v2505_v33 }
 0x282   :  { %v117_v36 = vadd.f32 %v116_v28, %v91_v35  ;;  %v2704_v37 = vadd.f32 %v119_v32, %v91_v35  ;;  %vm168_vm5 = vmor %vm166_vm4, %vm167_vm3 }
 0x283   :  { %v163_v38 = vsub.f32 1.0, %v162_v34  ;;  %v451_v34 = vpop.permute.xlu1 %450 }
 0x284   :  { %194 = vmatpush.msrb.mxu2 %v117_v36  ;;  %417 = vmatpush.msrb.mxu1 %v2704_v37 }
 0x285   :  { %v164_v41 = vmul.f32 %v2505_v33, %v163_v38 }
 0x286   :  { %2326 = vmatpush.xpose.msk.msra.mxu2 %vm125_vm1, %v236_v39  ;;  %547 = vmatpush.msra.mxu1 %v2434_v23 }
 0x287   :  { %v165_v43 = vadd.f32 %v2505_v33, %v164_v41 }
 0x288   :  { %548 = vmatpush.msra.mxu1 %v2435_v21 }
 0x289   :  { %v169_v45 = vsel %vm168_vm5, %v2505_v33, %v165_v43 }
 0x28a   :  { %v174_v46 = vsel %vm171_vm6, %v173_v44, %v169_v45 }
 0x28b   :  { %v175_v47 = vmul.f32 %v2503_v26, %v174_v46  ;;  %v633_v26 = vld [vmem:[%s3312_s4 + $0x30] sm:$0xff] }
 0x28c   :  { %v2735_v35 = vpack.i.bf16 %v633_v26, %v634_v25 }
 0x28d   :  { %2324 = vmatmul.msk.f32.vlgmr.msrb.gmra.mxu2 %vm151_vm2, %v175_v47 }
 0x28e   :  { %336 = vmatpush.msrb.mxu2 %v2434_v23  ;;  %v2603_v23 = vmov 32.0  }
 0x290   :  { %337 = vmatpush.msrb.mxu2 %v2435_v21 }
 0x295   :  { %2327 = vmatmul.msk.f32.vlgmr.msra.gmra.mxu2 %vm125_vm1, %v234_v48 }
 0x296   :  { %2334 = vmatpush.xpose.msk.msra.mxu2 %vm125_vm1, %v453_v24 }
 0x310   :  { %v196_v52 = vpop.f32.mrf.mxu2 }
 0x311   :  { %2325 = vmatmul.msk.f32.vlgmr.msra.gmra.mxu3 %vm125_vm1, %v196_v52 }
 0x318   :  { %v258_v53 = vpop.f32.mrf.mxu2 }
 0x319   :  { %v261_v54 = vmul.f32 0.25, %v258_v53 }
 0x31b   :  { %v262_v55 = vsel %vm151_vm2, %v261_v54, -inf }
 0x31c   :  { %263 = vmax.xlane.f32.xlu0 %v262_v55 }
 0x330   :  { %348 = vrot.lane.b32.xlu0 %v71_v57, %s2598_s11 }
 0x38f   :  { %v264_v58 = vpop.xlane.xlu0 %263 }
 0x390   :  { %v265_v59 = vsub.f32 %v261_v54, %v264_v58 }
 0x392   :  { %v266_v60 = vmul.f32 1.442695, %v265_v59 }
 0x394   :  { %2506 = vpow2.f32 %v266_v60  ;;  %v225_v0 = vpop.f32.mrf.mxu3 }
 0x39a   :  { %v2507_v61 = vpop.eup %2506 }
 0x39b   :  { %v268_v62 = vsel %vm151_vm2, %v2507_v61, 0.0 }
 0x39c   :  { %269 = vadd.xlane.f32.xlu2 %v268_v62 }
 0x3a2   :  { %v349_v63 = vpop.permute.xlu0 %348 }
 0x3a3   :  { %2330 = vmatpush.xpose.msk.msrb.mxu0 %vm125_vm1, %v349_v63 }
 0x3a6   :  { %2331 = vmatmul.msk.f32.vlgmr.msrb.gmra.mxu0 %vm125_vm1, %v71_v57 }
 0x3b4   :  { %287 = vrot.lane.b32.xlu2 %v117_v36, %s2601_s14 }
 0x3bc   :  { %229 = vrot.lane.b32.xlu2 %v225_v0, %s2598_s11 }
 0x40f   :  { %v270_v1 = vpop.xlane.xlu2 %269 }
 0x410   :  { %2508 = vrcp.f32 %v270_v1  ;;  %v282_v9 = vand.u32 2147483648, %v270_v1  ;;  %v280_v12 = vand.u32 2147483647, %v270_v1  ;;  %vm276_vm8 = vweird.f32 %v270_v1 }
 0x412   :  { %v283_v10 = vor.u32 1.1754944e-38, %v282_v9  ;;  %vm281_vm10 = vcmp.eq.f32.partialorder %v280_v12, 8.507059e+37 }
 0x416   :  { %v2509_v4 = vpop.eup %2508 }
 0x417   :  { %v272_v5 = vmul.f32 %v2509_v4, %v270_v1  ;;  %v288_v6 = vpop.permute.xlu2 %287  ;;  %vm277_vm7 = vweird.f32 %v2509_v4 }
 0x418   :  { %308 = vmatpush.msrb.mxu3 %v288_v6  ;;  %vm278_vm9 = vmor %vm276_vm8, %vm277_vm7 }
 0x419   :  { %v273_v8 = vsub.f32 1.0, %v272_v5 }
 0x41a   :  { %439 = vmatpush.msra.mxu3 %v2429_v50 }
 0x41b   :  { %v274_v11 = vmul.f32 %v2509_v4, %v273_v8 }
 0x41c   :  { %440 = vmatpush.msra.mxu3 %v2430_v51 }
 0x41d   :  { %v275_v13 = vadd.f32 %v2509_v4, %v274_v11 }
 0x41f   :  { %v279_v14 = vsel %vm278_vm9, %v2509_v4, %v275_v13  ;;  %v230_v36 = vpop.permute.xlu2 %229 }
 0x420   :  { %v284_v15 = vsel %vm281_vm10, %v283_v10, %v279_v14  ;;  %v232_v57 = vadd.f32 %v2669_v7, %v230_v36 }
 0x421   :  { %v285_v16 = vmul.f32 %v2507_v61, %v284_v15 }
 0x423   :  { %2328 = vmatmul.msk.f32.vlgmr.msrb.gmra.mxu3 %vm151_vm2, %v285_v16  ;;  %v371_v17 = vpop.f32.mrf.mxu0 }
 0x424   :  { %v374_v18 = vmul.f32 0.25, %v371_v17  ;;  %655 = vmatpush.msrb.mxu3 %v634_v25 }
 0x426   :  { %v375_v19 = vsel %vm151_vm2, %v374_v18, -inf  ;;  %656 = vmatpush.msrb.mxu3 %v633_v26 }
 0x427   :  { %376 = vmax.xlane.f32.xlu0 %v375_v19  ;;  %v631_v19 = vld [vmem:[%s3312_s4 + $0x20] sm:$0xff] }
 0x428   :  { %v2757_v21 = vpack.i.bf16 %v631_v19, %v632_v20  ;;  %657 = vmatpush.msrb.mxu3 %v632_v20 }
 0x42a   :  { %658 = vmatpush.msrb.mxu3 %v631_v19 }
 0x49a   :  { %v377_v27 = vpop.xlane.xlu0 %376 }
 0x49b   :  { %v378_v28 = vsub.f32 %v374_v18, %v377_v27 }
 0x49d   :  { %v379_v30 = vmul.f32 1.442695, %v378_v28 }
 0x49f   :  { %2510 = vpow2.f32 %v379_v30 }
 0x4a5   :  { %v2511_v31 = vpop.eup %2510 }
 0x4a6   :  { %v310_v32 = vpop.f32.mrf.mxu3  ;;  %v381_v33 = vsel %vm151_vm2, %v2511_v31, 0.0 }
 0x4a7   :  { %382 = vadd.xlane.f32.xlu2 %v381_v33  ;;  %2329 = vmatmul.msk.f32.vlgmr.msrb.gmra.mxu2 %vm125_vm1, %v310_v32 }
 0x4af   :  { %2335 = vmatmul.msk.f32.vlgmr.msra.gmra.mxu2 %vm125_vm1, %v451_v34 }
 0x4bf   :  { %2437 = vrot.lane.b32.xlu2 %v2735_v35, %s2601_s14 }
 0x4c7   :  { %504 = vrot.lane.b32.xlu2 %v2704_v37, %s2601_s14 }
 0x51a   :  { %v383_v38 = vpop.xlane.xlu2 %382 }
 0x51b   :  { %2512 = vrcp.f32 %v383_v38  ;;  %v395_v42 = vand.u32 2147483648, %v383_v38  ;;  %vm389_vm11 = vweird.f32 %v383_v38  ;;  %v393_v46 = vand.u32 2147483647, %v383_v38 }
 0x51d   :  { %v396_v48 = vor.u32 1.1754944e-38, %v395_v42  ;;  %vm394_vm14 = vcmp.eq.f32.partialorder %v393_v46, 8.507059e+37  ;;  %v26_v46 = vld [vmem:[%s3316_s1 + $0x8] sm:$0xff] }
 0x521   :  { %v2513_v39 = vpop.eup %2512 }
 0x522   :  { %v385_v40 = vmul.f32 %v2513_v39, %v383_v38  ;;  %v2438_v41 = vpop.permute.xlu2 %2437  ;;  %vm390_vm12 = vweird.f32 %v2513_v39  ;;  %v2768_v38 = vld [vmem:[%s3315_s5 + $0x20] ss:$0 sm:$0xff] }
 0x523   :  { %v2440_v43 = vunpack.i.h.bf16 %v2438_v41  ;;  %v2439_v44 = vunpack.i.l.bf16 %v2438_v41  ;;  %vm391_vm13 = vmor %vm389_vm11, %vm390_vm12  ;;  %v31_v41 = vld [vmem:[%s3317_s3] sm:$0xff] }
 0x524   :  { %v386_v45 = vsub.f32 1.0, %v385_v40  ;;  %v25_v40 = vld [vmem:[%s3316_s1] sm:$0xff] }
 0x525   :  { %714 = vmatpush.msrb.mxu2 %v2439_v44 }
 0x526   :  { %v387_v47 = vmul.f32 %v2513_v39, %v386_v45  ;;  %v2781_v45 = vadd.f32 %v31_v41, %v25_v40 }
 0x527   :  { %715 = vmatpush.msrb.mxu2 %v2440_v43 }
 0x528   :  { %v388_v49 = vadd.f32 %v2513_v39, %v387_v47  ;;  %v32_v47 = vld [vmem:[%s3317_s3 + $0x8] sm:$0xff] }
 0x52a   :  { %v505_v37 = vpop.permute.xlu2 %504  ;;  %v339_v50 = vpop.f32.mrf.mxu2  ;;  %v392_v51 = vsel %vm391_vm13, %v2513_v39, %v388_v49  ;;  %v27_v49 = vld [vmem:[%s3316_s1 + $0x10] sm:$0xff] }
 0x52b   :  { %525 = vmatpush.msra.mxu0 %v505_v37  ;;  %343 = vrot.lane.b32.xlu1 %v339_v50, %s2598_s11  ;;  %v397_v52 = vsel %vm394_vm14, %v396_v48, %v392_v51  ;;  %v2793_v48 = vadd.f32 %v32_v47, %v26_v46  ;;  %v33_v37 = vld [vmem:[%s3317_s3 + $0x10] sm:$0xff]  ;;  %v28_v51 = vld [vmem:[%s3316_s1 + $0x18] sm:$0xff] }
 0x52c   :  { %v398_v53 = vmul.f32 %v2511_v31, %v397_v52  ;;  %v2803_v50 = vadd.f32 %v33_v37, %v27_v49  ;;  %v34_v52 = vld [vmem:[%s3317_s3 + $0x18] sm:$0xff]  ;;  %s2604_s3 = smov 120  }
 0x52e   :  { %2332 = vmatmul.msk.f32.vlgmr.msrb.gmra.mxu1 %vm151_vm2, %v398_v53  ;;  %v2813_v53 = vadd.f32 %v34_v52, %v28_v51 }
 0x532   :  { %v475_v54 = vpop.f32.mrf.mxu2 }
 0x533   :  { %v478_v55 = vmul.f32 0.25, %v475_v54  ;;  %v2820_v54 = vld [vmem:[%s3315_s5 + $0x8] ss:$0 sm:$0xff] }
 0x534   :  { %687 = vrot.lane.b32.xlu2 %v2820_v54, %s2601_s14 }
 0x535   :  { %v479_v56 = vsel %vm151_vm2, %v478_v55, -inf }
 0x536   :  { %480 = vmax.xlane.f32.xlu0 %v479_v56 }
 0x59d   :  { %v344_v58 = vpop.permute.xlu1 %343 }
 0x59e   :  { %v346_v59 = vadd.f32 %v344_v58, %v232_v57 }
 0x5a0   :  { %560 = vrot.lane.b32.xlu1 %v346_v59, %s2602_s0 }
 0x5a9   :  { %v481_v60 = vpop.xlane.xlu0 %480 }
 0x5aa   :  { %v482_v61 = vsub.f32 %v478_v55, %v481_v60 }
 0x5ab   :  { %v419_v62 = vpop.f32.mrf.mxu1 }
 0x5ac   :  { %v483_v63 = vmul.f32 1.442695, %v482_v61  ;;  %2333 = vmatmul.msk.f32.vlgmr.msra.gmra.mxu3 %vm125_vm1, %v419_v62 }
 0x5ae   :  { %2514 = vpow2.f32 %v483_v63 }
 0x5b4   :  { %v2515_v0 = vpop.eup %2514 }
 0x5b5   :  { %v485_v1 = vsel %vm151_vm2, %v2515_v0, 0.0 }
 0x5b6   :  { %486 = vadd.xlane.f32.xlu0 %v485_v1 }
 0x612   :  { %v561_v4 = vpop.permute.xlu1 %560 }
 0x613   :  { %v566_v5 = vadd.f32 %v561_v4, %v2650_v2 }
 0x615   :  { %v569_v6 = vsel %vm43_vm0, %v566_v5, 0.0 }
 0x616   :  { %570 = vadd.xlane.f32.xlu1 %v569_v6 }
 0x629   :  { %v487_v8 = vpop.xlane.xlu0 %486 }
 0x62a   :  { %2516 = vrcp.f32 %v487_v8  ;;  %v499_v13 = vand.u32 2147483648, %v487_v8  ;;  %v497_v14 = vand.u32 2147483647, %v487_v8  ;;  %vm493_vm3 = vweird.f32 %v487_v8 }
 0x62b   :  { %2518 = vrcp.f32 %v2603_v23 }
 0x62c   :  { %v500_v16 = vor.u32 1.1754944e-38, %v499_v13  ;;  %vm498_vm5 = vcmp.eq.f32.partialorder %v497_v14, 8.507059e+37 }
 0x62f   :  { %2442 = vrot.lane.b32.xlu1 %v2757_v21, %s2601_s14 }
 0x630   :  { %v2517_v9 = vpop.eup %2516 }
 0x631   :  { %v489_v11 = vmul.f32 %v2517_v9, %v487_v8  ;;  %vm494_vm15 = vweird.f32 %v2517_v9  ;;  %v2519_v24 = vpop.eup %2518 }
 0x632   :  { %vm495_vm4 = vmor %vm493_vm3, %vm494_vm15  ;;  %v576_v25 = vmul.f32 32.0, %v2519_v24  ;;  %vm580_vm6 = vweird.f32 %v2519_v24 }
 0x633   :  { %v490_v12 = vsub.f32 1.0, %v489_v11 }
 0x634   :  { %v577_v26 = vsub.f32 1.0, %v576_v25 }
 0x635   :  { %v491_v10 = vmul.f32 %v2517_v9, %v490_v12 }
 0x636   :  { %v578_v27 = vmul.f32 %v2519_v24, %v577_v26 }
 0x637   :  { %v492_v15 = vadd.f32 %v2517_v9, %v491_v10  ;;  %2452 = vrot.lane.b32.xlu1 %v2757_v21, %s2598_s11 }
 0x638   :  { %v579_v28 = vadd.f32 %v2519_v24, %v578_v27 }
 0x639   :  { %v496_v17 = vsel %vm495_vm4, %v2517_v9, %v492_v15 }
 0x63a   :  { %v501_v18 = vsel %vm498_vm5, %v500_v16, %v496_v17  ;;  %v2761_v30 = vsel %vm580_vm6, %v2519_v24, %v579_v28  ;;  %v2838_v16 = vpop.permute.xlu2 %687 }
 0x63b   :  { %v502_v2 = vmul.f32 %v2515_v0, %v501_v18 }
 0x63d   :  { %2336 = vmatmul.msk.f32.vlgmr.msra.gmra.mxu0 %vm151_vm2, %v502_v2  ;;  %v442_v2 = vpop.f32.mrf.mxu3 }
 0x63f   :  { %743 = vrot.lane.b32.xlu1 %v2820_v54, %s2598_s11 }
 0x689   :  { %v571_v31 = vpop.xlane.xlu1 %570 }
 0x68a   :  { %v582_v32 = vmul.f32 %v2761_v30, %v571_v31 }
 0x68c   :  { %v584_v33 = vsub.f32 %v566_v5, %v582_v32 }
 0x68e   :  { %v586_v34 = vmul.f32 %v584_v33, %v584_v33 }
 0x690   :  { %v588_v36 = vsel %vm43_vm0, %v586_v34, 0.0 }
 0x691   :  { %589 = vadd.xlane.f32.xlu0 %v588_v36 }
 0x6a1   :  { %v2443_v42 = vpop.permute.xlu1 %2442 }
 0x6a2   :  { %v2445_v43 = vunpack.i.h.bf16 %v2443_v42  ;;  %v2444_v44 = vunpack.i.l.bf16 %v2443_v42 }
 0x6a4   :  { %716 = vmatpush.msrb.mxu2 %v2444_v44 }
 0x6a5   :  { %624 = vrot.lane.b32.xlu0 %v2768_v38, %s2598_s11 }
 0x6a6   :  { %717 = vmatpush.msrb.mxu2 %v2445_v43 }
 0x6a7   :  { %2340 = vmatmul.msk.f32.vlgmr.msrb.gmra.mxu2 %vm43_vm0, %v2781_v45 }
 0x6a9   :  { %v2453_v13 = vpop.permute.xlu1 %2452 }
 0x6aa   :  { %v2455_v10 = vunpack.i.h.bf16 %v2453_v13  ;;  %v2454_v14 = vunpack.i.l.bf16 %v2453_v13 }
 0x6ad   :  { %2447 = vrot.lane.b32.xlu0 %v2735_v35, %s2598_s11 }
 0x6af   :  { %2341 = vmatmul.msk.f32.gmra.mxu2 %vm43_vm0, %v2793_v48 }
 0x6b1   :  { %v744_v23 = vpop.permute.xlu1 %743 }
 0x6b7   :  { %2342 = vmatmul.msk.f32.gmra.mxu2 %vm43_vm0, %v2803_v50 }
 0x6ba   :  { %v527_v39 = vpop.f32.mrf.mxu0 }
 0x6bb   :  { %2337 = vmatmul.msk.f32.vlgmr.msra.gmra.mxu1 %vm125_vm1, %v527_v39 }
 0x6bf   :  { %2343 = vmatmul.msk.f32.gmra.mxu2 %vm43_vm0, %v2813_v53 }
 0x704   :  { %v590_v55 = vpop.xlane.xlu0 %589 }
 0x705   :  { %v594_v56 = vmul.f32 %v590_v55, %v2761_v30 }
 0x707   :  { %v596_v57 = vadd.f32 1e-06, %v594_v56 }
 0x709   :  { %2520 = vrsqrt.f32 %v596_v57  ;;  %vm604_vm8 = vweird.f32 %v596_v57 }
 0x70f   :  { %v2521_v58 = vpop.eup %2520 }
 0x710   :  { %v599_v59 = vmul.f32 %v2521_v58, %v596_v57  ;;  %vm605_vm7 = vweird.f32 %v2521_v58 }
 0x711   :  { %vm606_vm9 = vmor %vm604_vm8, %vm605_vm7 }
 0x712   :  { %v600_v60 = vmul.f32 %v2521_v58, %v599_v59 }
 0x714   :  { %v601_v61 = vmul.f32 0.5, %v600_v60 }
 0x716   :  { %v602_v62 = vsub.f32 1.5, %v601_v61 }
 0x717   :  { %v2827_v4 = vpop.permute.xlu0 %624 }
 0x718   :  { %v603_v63 = vmul.f32 %v2521_v58, %v602_v62 }
 0x71a   :  { %v607_v0 = vsel %vm606_vm9, %v2521_v58, %v603_v63 }
 0x71b   :  { %v618_v1 = vmul.f32 %v607_v0, %v584_v33 }
 0x71d   :  { %v621_v5 = vmul.f32 %v2768_v38, %v618_v1 }
 0x71f   :  { %v2831_v6 = vadd.f32 %v2827_v4, %v621_v5  ;;  %v2448_v9 = vpop.permute.xlu0 %2447 }
 0x720   :  { %v2450_v11 = vunpack.i.h.bf16 %v2448_v9  ;;  %v2449_v12 = vunpack.i.l.bf16 %v2448_v9 }
 0x721   :  { %v629_v8 = vadd.f32 %v2831_v6, %v2655_v3 }
 0x722   :  { %770 = vmatpush.msrb.mxu0 %v2449_v12 }
 0x723   :  { %2338 = vmatmul.msk.f32.vlgmr.msrb.gmra.mxu3 %vm43_vm0, %v629_v8 }
 0x724   :  { %771 = vmatpush.msrb.mxu0 %v2450_v11 }
 0x726   :  { %772 = vmatpush.msrb.mxu0 %v2454_v14 }
 0x728   :  { %773 = vmatpush.msrb.mxu0 %v2455_v10 }
 0x729   :  { %2344 = vmatmul.msk.f32.vlgmr.msrb.gmra.mxu0 %vm43_vm0, %v25_v40 }
 0x72a   :  { %v719_v15 = vpop.f32.mrf.mxu2 }
 0x72b   :  { %v720_v18 = vadd.f32 %v719_v15, %v2838_v16 }
 0x731   :  { %2345 = vmatmul.msk.f32.gmra.mxu0 %vm43_vm0, %v26_v46 }
 0x732   :  { %v722_v3 = vpop.f32.mrf.mxu2 }
 0x733   :  { %v723_v17 = vadd.f32 %v722_v3, %v2838_v16 }
 0x735   :  { %898 = vrot.lane.b32.xlu1 %v723_v17, %s2604_s3  ;;  %2348 = vmatpush.xpose.msk.msrb.mxu1 %vm151_vm2, %v723_v17 }
 0x738   :  { %v550_v33 = vpop.f32.mrf.mxu1 }
 0x739   :  { %2346 = vmatmul.msk.f32.gmra.mxu0 %vm43_vm0, %v27_v49  ;;  %2349 = vmatpush.xpose.msk.msrb.mxu1 %vm151_vm2, %v720_v18 }
 0x73d   :  { %896 = vrot.lane.b32.xlu1 %v720_v18, %s2604_s3 }
 0x741   :  { %2347 = vmatmul.msk.f32.gmra.mxu0 %vm43_vm0, %v28_v51 }
 0x7a6   :  { %v660_v19 = vpop.f32.mrf.mxu3  ;;  %v775_v24 = vpop.f32.mrf.mxu0 }
 0x7a7   :  { %v661_v20 = vadd.f32 %v2820_v54, %v660_v19  ;;  %v2852_v26 = vadd.f32 %v775_v24, %v744_v23  ;;  %v899_v28 = vpop.permute.xlu1 %898 }
 0x7a9   :  { %894 = vrot.lane.b32.xlu1 %v661_v20, %s2604_s3  ;;  %2350 = vmatmul.msk.f32.vlgmr.msrb.gmra.mxu1 %vm151_vm2, %v661_v20 }
 0x7ae   :  { %v778_v25 = vpop.f32.mrf.mxu0 }
 0x7af   :  { %v2854_v27 = vadd.f32 %v778_v25, %v744_v23  ;;  %v897_v32 = vpop.permute.xlu1 %896 }
 0x7b1   :  { %446 = vrot.lane.b32.xlu1 %v442_v2, %s2598_s11  ;;  %v2456_v31 = vpack.i.bf16 %v2852_v26, %v2854_v27  ;;  %860 = vmatpush.msra.mxu1 %v2854_v27 }
 0x7b3   :  { %861 = vmatpush.msra.mxu1 %v2852_v26 }
 0x7b5   :  { %2353 = vmatpush.xpose.msk.msrb.mxu1 %vm151_vm2, %v899_v28 }
 0x7b6   :  { %v781_v40 = vpop.f32.mrf.mxu0 }
 0x7b7   :  { %v2864_v41 = vadd.f32 %v781_v40, %v744_v23 }
 0x7b9   :  { %2354 = vmatpush.xpose.msk.msrb.mxu1 %vm151_vm2, %v897_v32  ;;  %v2895_v32 = vld [vmem:[%s3312_s4 + $0xa8] sm:$0xff] }
 0x7be   :  { %v784_v42 = vpop.f32.mrf.mxu0 }
 0x7bf   :  { %v2866_v43 = vadd.f32 %v784_v42, %v744_v23  ;;  %v725_v23 = vpop.f32.mrf.mxu2 }
 0x7c0   :  { %v2883_v24 = vadd.f32 %v725_v23, %v2838_v16 }
 0x7c1   :  { %v2461_v44 = vpack.i.bf16 %v2864_v41, %v2866_v43  ;;  %1081 = vmatpush.msra.mxu2 %v2866_v43 }
 0x7c3   :  { %1082 = vmatpush.msra.mxu2 %v2864_v41 }
 0x7c5   :  { %1221 = vmatpush.msrb.mxu2 %v2895_v32 }
 0x7c7   :  { %v728_v25 = vpop.f32.mrf.mxu2 }
 0x7c8   :  { %v2888_v28 = vadd.f32 %v728_v25, %v2838_v16  ;;  %v2903_v16 = vld [vmem:[%s3312_s4 + $0xa0] sm:$0xff] }
 0x7c9   :  { %884 = vmatpush.msra.mxu3 %v2903_v16  ;;  %1105 = vmatpush.msra.mxu0 %v2903_v16 }
 0x81b   :  { %v895_v52 = vpop.permute.xlu1 %894 }
 0x823   :  { %v447_v55 = vpop.permute.xlu1 %446 }
 0x824   :  { %v449_v57 = vadd.f32 %v2669_v7, %v447_v55 }
 0x826   :  { %v815_v34 = vpop.f32.mrf.mxu1 }
 0x827   :  { %v818_v36 = vmul.f32 0.35355338, %v815_v34 }
 0x829   :  { %v819_v39 = vsel %vm125_vm1, %v818_v36, -inf }
 0x82a   :  { %820 = vmax.xlane.f32.xlu2 %v819_v39 }
 0x842   :  { %554 = vrot.lane.b32.xlu2 %v550_v33, %s2598_s11 }
 0x89d   :  { %v821_v46 = vpop.xlane.xlu2 %820 }
 0x89e   :  { %v822_v47 = vsub.f32 %v818_v36, %v821_v46 }
 0x8a0   :  { %v823_v49 = vmul.f32 1.442695, %v822_v47 }
 0x8a2   :  { %2522 = vpow2.f32 %v823_v49 }
 0x8a5   :  { %v555_v56 = vpop.permute.xlu2 %554 }
 0x8a6   :  { %v557_v58 = vadd.f32 %v555_v56, %v449_v57 }
 0x8a8   :  { %v2523_v37 = vpop.eup %2522 }
 0x8a9   :  { %v825_v51 = vsel %vm125_vm1, %v2523_v37, 0.0 }
 0x8aa   :  { %826 = vadd.xlane.f32.xlu0 %v825_v51 }
 0x8be   :  { %562 = vrot.lane.b32.xlu0 %v557_v58, %s2602_s0 }
 0x91d   :  { %v827_v59 = vpop.xlane.xlu0 %826 }
 0x91e   :  { %2524 = vrcp.f32 %v827_v59  ;;  %v839_v63 = vand.u32 2147483648, %v827_v59  ;;  %v837_v1 = vand.u32 2147483647, %v827_v59  ;;  %vm833_vm11 = vweird.f32 %v827_v59 }
 0x920   :  { %v840_v8 = vor.u32 1.1754944e-38, %v839_v63  ;;  %vm838_vm13 = vcmp.eq.f32.partialorder %v837_v1, 8.507059e+37 }
 0x924   :  { %v2525_v60 = vpop.eup %2524 }
 0x925   :  { %v829_v61 = vmul.f32 %v2525_v60, %v827_v59  ;;  %vm834_vm10 = vweird.f32 %v2525_v60 }
 0x926   :  { %vm835_vm12 = vmor %vm833_vm11, %vm834_vm10 }
 0x927   :  { %v830_v62 = vsub.f32 1.0, %v829_v61 }
 0x929   :  { %v831_v0 = vmul.f32 %v2525_v60, %v830_v62 }
 0x92b   :  { %v832_v5 = vadd.f32 %v2525_v60, %v831_v0 }
 0x92d   :  { %v836_v9 = vsel %vm835_vm12, %v2525_v60, %v832_v5 }
 0x92e   :  { %v841_v11 = vsel %vm838_vm13, %v840_v8, %v836_v9 }
 0x92f   :  { %v842_v7 = vmul.f32 %v2523_v37, %v841_v11 }
 0x930   :  { %v563_v12 = vpop.permute.xlu0 %562 }
 0x931   :  { %v567_v13 = vadd.f32 %v563_v12, %v2688_v22  ;;  %2351 = vmatmul.msk.f32.vlgmr.msra.gmra.mxu1 %vm125_vm1, %v842_v7 }
 0x932   :  { %1000 = vmatpush.msra.mxu1 %v2895_v32 }
 0x933   :  { %v572_v10 = vsel %vm43_vm0, %v567_v13, 0.0 }
 0x934   :  { %573 = vadd.xlane.f32.xlu1 %v572_v10 }
 0x939   :  { %2355 = vmatmul.msk.f32.vlgmr.msrb.gmra.mxu1 %vm151_vm2, %v895_v52 }
 0x9a7   :  { %v574_v14 = vpop.xlane.xlu1 %573 }
 0x9a8   :  { %v583_v15 = vmul.f32 %v2761_v30, %v574_v14 }
 0x9aa   :  { %v585_v3 = vsub.f32 %v567_v13, %v583_v15 }
 0x9ac   :  { %v587_v17 = vmul.f32 %v585_v3, %v585_v3 }
 0x9ae   :  { %v863_v18 = vpop.f32.mrf.mxu1  ;;  %v591_v2 = vsel %vm43_vm0, %v587_v17, 0.0 }
 0x9af   :  { %592 = vadd.xlane.f32.xlu2 %v591_v2 }
 0x9b6   :  { %v923_v19 = vpop.f32.mrf.mxu1 }
 0x9b7   :  { %v926_v20 = vmul.f32 0.35355338, %v923_v19 }
 0x9b9   :  { %v927_v22 = vsel %vm125_vm1, %v926_v20, -inf }
 0x9ba   :  { %928 = vmax.xlane.f32.xlu0 %v927_v22 }
 0x9c7   :  { %1117 = vrot.lane.b32.xlu2 %v2883_v24, %s2604_s3 }
 0x9ce   :  { %1119 = vrot.lane.b32.xlu0 %v2888_v28, %s2604_s3 }
 0xa22   :  { %v593_v33 = vpop.xlane.xlu2 %592 }
 0xa23   :  { %v595_v34 = vmul.f32 %v593_v33, %v2761_v30 }
 0xa25   :  { %v597_v36 = vadd.f32 1e-06, %v595_v34 }
 0xa27   :  { %2526 = vrsqrt.f32 %v597_v36  ;;  %vm614_vm15 = vweird.f32 %v597_v36 }
 0xa2a   :  { %v1118_v63 = vpop.permute.xlu2 %1117 }
 0xa2d   :  { %v2527_v39 = vpop.eup %2526  ;;  %v929_v40 = vpop.xlane.xlu0 %928 }
 0xa2e   :  { %v609_v42 = vmul.f32 %v2527_v39, %v597_v36  ;;  %v930_v46 = vsub.f32 %v926_v20, %v929_v40  ;;  %vm615_vm14 = vweird.f32 %v2527_v39 }
 0xa2f   :  { %vm616_vm3 = vmor %vm614_vm15, %vm615_vm14 }
 0xa30   :  { %v610_v47 = vmul.f32 %v2527_v39, %v609_v42  ;;  %v931_v49 = vmul.f32 1.442695, %v930_v46 }
 0xa32   :  { %v611_v37 = vmul.f32 0.5, %v610_v47  ;;  %2528 = vpow2.f32 %v931_v49 }
 0xa34   :  { %v612_v51 = vsub.f32 1.5, %v611_v37 }
 0xa36   :  { %v613_v52 = vmul.f32 %v2527_v39, %v612_v51 }
 0xa38   :  { %v2529_v55 = vpop.eup %2528  ;;  %v617_v56 = vsel %vm616_vm3, %v2527_v39, %v613_v52 }
 0xa39   :  { %v619_v57 = vmul.f32 %v617_v56, %v585_v3  ;;  %v933_v58 = vsel %vm125_vm1, %v2529_v55, 0.0 }
 0xa3a   :  { %934 = vadd.xlane.f32.xlu1 %v933_v58 }
 0xa3b   :  { %v622_v59 = vmul.f32 %v2768_v38, %v619_v57 }
 0xa3d   :  { %v2910_v60 = vadd.f32 %v2827_v4, %v622_v59 }
 0xa3f   :  { %v630_v61 = vadd.f32 %v2910_v60, %v2698_v29 }
 0xa40   :  { %v1120_v62 = vpop.permute.xlu0 %1119 }
 0xa41   :  { %2339 = vmatmul.msk.f32.gmra.mxu3 %vm43_vm0, %v630_v61  ;;  %2363 = vmatpush.xpose.msk.msrb.mxu1 %vm151_vm2, %v1120_v62 }
 0xa45   :  { %2364 = vmatpush.xpose.msk.msrb.mxu1 %vm151_vm2, %v1118_v63 }
 0xa49   :  { %2352 = vmatmul.msk.f32.vlgmr.msra.gmra.mxu3 %vm151_vm2, %v863_v18 }
 0xa53   :  { %2457 = vrot.lane.b32.xlu1 %v2456_v31, %s2604_s3 }
 0xaad   :  { %v935_v4 = vpop.xlane.xlu1 %934 }
 0xaae   :  { %2530 = vrcp.f32 %v935_v4  ;;  %v947_v9 = vand.u32 2147483648, %v935_v4  ;;  %vm941_vm5 = vweird.f32 %v935_v4  ;;  %v945_v11 = vand.u32 2147483647, %v935_v4 }
 0xab0   :  { %v948_v12 = vor.u32 1.1754944e-38, %v947_v9  ;;  %vm946_vm7 = vcmp.eq.f32.partialorder %v945_v11, 8.507059e+37 }
 0xab4   :  { %v2531_v0 = vpop.eup %2530 }
 0xab5   :  { %v937_v1 = vmul.f32 %v2531_v0, %v935_v4  ;;  %vm942_vm4 = vweird.f32 %v2531_v0 }
 0xab6   :  { %vm943_vm6 = vmor %vm941_vm5, %vm942_vm4  ;;  %vm1344_vm5 = vcmask 523264  }
 0xab7   :  { %v938_v29 = vsub.f32 1.0, %v937_v1 }
 0xab9   :  { %v939_v5 = vmul.f32 %v2531_v0, %v938_v29 }
 0xabb   :  { %v940_v8 = vadd.f32 %v2531_v0, %v939_v5 }
 0xabd   :  { %v944_v7 = vsel %vm943_vm6, %v2531_v0, %v940_v8 }
 0xabe   :  { %v949_v27 = vsel %vm946_vm7, %v948_v12, %v944_v7 }
 0xabf   :  { %v950_v15 = vmul.f32 %v2529_v55, %v949_v27 }
 0xac4   :  { %v663_v13 = vpop.f32.mrf.mxu3 }
 0xac5   :  { %v664_v10 = vadd.f32 %v2820_v54, %v663_v13  ;;  %v2458_v26 = vpop.permute.xlu1 %2457 }
 0xac6   :  { %v2459_v31 = vunpack.i.l.bf16 %v2458_v26  ;;  %v2460_v14 = vunpack.i.h.bf16 %v2458_v26 }
 0xac7   :  { %1115 = vrot.lane.b32.xlu1 %v664_v10, %s2604_s3 }
 0xac8   :  { %976 = vmatpush.msrb.mxu3 %v2459_v31 }
 0xaca   :  { %977 = vmatpush.msrb.mxu3 %v2460_v14 }
 0xacb   :  { %2356 = vmatmul.msk.f32.vlgmr.msrb.gmra.mxu3 %vm125_vm1, %v950_v15 }
 0xacc   :  { %2358 = vmatpush.xpose.msk.msra.mxu3 %vm151_vm2, %v2888_v28  ;;  %v886_v3 = vpop.f32.mrf.mxu3 }
 0xad0   :  { %2359 = vmatpush.xpose.msk.msra.mxu3 %vm151_vm2, %v2883_v24 }
 0xad3   :  { %2360 = vmatmul.msk.f32.vlgmr.msra.gmra.mxu3 %vm151_vm2, %v664_v10 }
 0xb39   :  { %v1116_v18 = vpop.permute.xlu1 %1115 }
 0xb4e   :  { %v979_v17 = vpop.f32.mrf.mxu3 }
 0xb4f   :  { %2357 = vmatmul.msk.f32.vlgmr.msra.gmra.mxu1 %vm151_vm2, %v979_v17 }
 0xb56   :  { %v1036_v2 = vpop.f32.mrf.mxu3 }
 0xb57   :  { %v1039_v19 = vmul.f32 0.35355338, %v1036_v2  ;;  %2365 = vmatmul.msk.f32.vlgmr.msrb.gmra.mxu1 %vm151_vm2, %v1116_v18 }
 0xb59   :  { %v1040_v20 = vsel %vm125_vm1, %v1039_v19, -inf }
 0xb5a   :  { %1041 = vmax.xlane.f32.xlu1 %v1040_v20 }
 0xb73   :  { %2462 = vrot.lane.b32.xlu1 %v2461_v44, %s2604_s3 }
 0xbcc   :  { %v1002_v22 = vpop.f32.mrf.mxu1 }
 0xbcd   :  { %v1042_v23 = vpop.xlane.xlu1 %1041 }
 0xbce   :  { %v1043_v24 = vsub.f32 %v1039_v19, %v1042_v23 }
 0xbd0   :  { %v1044_v25 = vmul.f32 1.442695, %v1043_v24 }
 0xbd2   :  { %2532 = vpow2.f32 %v1044_v25 }
 0xbd4   :  { %v1144_v28 = vpop.f32.mrf.mxu1 }
 0xbd5   :  { %v1147_v33 = vmul.f32 0.35355338, %v1144_v28 }
 0xbd7   :  { %v1148_v34 = vsel %vm125_vm1, %v1147_v33, -inf }
 0xbd8   :  { %1149 = vmax.xlane.f32.xlu0 %v1148_v34  ;;  %v2533_v36 = vpop.eup %2532  ;;  %v1296_v34 = vld [vmem:[%s3312_s4 + $0x48] sm:$0xff] }
 0xbd9   :  { %v1046_v39 = vsel %vm125_vm1, %v2533_v36, 0.0 }
 0xbe0   :  { %1047 = vadd.xlane.f32.xlu0 %v1046_v39 }
 0xbe5   :  { %v2463_v40 = vpop.permute.xlu1 %2462 }
 0xbe6   :  { %v2464_v42 = vunpack.i.l.bf16 %v2463_v40  ;;  %v2465_v46 = vunpack.i.h.bf16 %v2463_v40  ;;  %v1339_v40 = vld [vmem:[%s3312_s4 + $0x98] sm:$0xff] }
 0xbe7   :  { %1359 = vmatpush.msra.mxu1 %v1339_v40 }
 0xbe8   :  { %1197 = vmatpush.msrb.mxu3 %v2464_v42  ;;  %v1338_v42 = vld [vmem:[%s3312_s4 + $0x90] sm:$0xff] }
 0xbe9   :  { %1360 = vmatpush.msra.mxu1 %v1338_v42 }
 0xbea   :  { %1198 = vmatpush.msrb.mxu3 %v2465_v46 }
 0xbf4   :  { %1006 = vrot.lane.b32.xlu0 %v1002_v22, %s2605_s7 }
 0xc4b   :  { %v1150_v41 = vpop.xlane.xlu0 %1149 }
 0xc4c   :  { %v1151_v43 = vsub.f32 %v1147_v33, %v1150_v41  ;;  %v1297_v33 = vld [vmem:[%s3312_s4 + $0x50] sm:$0xff] }
 0xc4e   :  { %v1152_v44 = vmul.f32 1.442695, %v1151_v43 }
 0xc50   :  { %2534 = vpow2.f32 %v1152_v44 }
 0xc53   :  { %v1048_v47 = vpop.xlane.xlu0 %1047 }
 0xc54   :  { %2536 = vrcp.f32 %v1048_v47  ;;  %v1060_v56 = vand.u32 2147483648, %v1048_v47  ;;  %v1058_v58 = vand.u32 2147483647, %v1048_v47  ;;  %vm1054_vm9 = vweird.f32 %v1048_v47 }
 0xc56   :  { %v2535_v49 = vpop.eup %2534  ;;  %v1061_v61 = vor.u32 1.1754944e-38, %v1060_v56  ;;  %vm1059_vm11 = vcmp.eq.f32.partialorder %v1058_v58, 8.507059e+37 }
 0xc57   :  { %v1154_v37 = vsel %vm125_vm1, %v2535_v49, 0.0 }
 0xc58   :  { %1155 = vadd.xlane.f32.xlu2 %v1154_v37 }
 0xc5a   :  { %v2537_v51 = vpop.eup %2536 }
 0xc5b   :  { %v1050_v52 = vmul.f32 %v2537_v51, %v1048_v47  ;;  %vm1055_vm8 = vweird.f32 %v2537_v51 }
 0xc5c   :  { %vm1056_vm10 = vmor %vm1054_vm9, %vm1055_vm8 }
 0xc5d   :  { %v1051_v55 = vsub.f32 1.0, %v1050_v52 }
 0xc5f   :  { %v1052_v57 = vmul.f32 %v2537_v51, %v1051_v55 }
 0xc61   :  { %v1053_v59 = vadd.f32 %v2537_v51, %v1052_v57 }
 0xc63   :  { %v1057_v62 = vsel %vm1056_vm10, %v2537_v51, %v1053_v59 }
 0xc64   :  { %v1062_v63 = vsel %vm1059_vm11, %v1061_v61, %v1057_v62 }
 0xc65   :  { %v1063_v4 = vmul.f32 %v2533_v36, %v1062_v63  ;;  %v1295_v36 = vld [vmem:[%s3312_s4 + $0x40] sm:$0xff] }
 0xc66   :  { %v1007_v9 = vpop.permute.xlu0 %1006 }
 0xc67   :  { %2361 = vmatmul.msk.f32.vlgmr.msra.gmra.mxu2 %vm125_vm1, %v1063_v4 }
 0xc70   :  { %890 = vrot.lane.b32.xlu2 %v886_v3, %s2605_s7 }
 0xccb   :  { %v1156_v0 = vpop.xlane.xlu2 %1155 }
 0xccc   :  { %2538 = vrcp.f32 %v1156_v0  ;;  %v1168_v7 = vand.u32 2147483648, %v1156_v0  ;;  %v1166_v10 = vand.u32 2147483647, %v1156_v0  ;;  %vm1162_vm13 = vweird.f32 %v1156_v0 }
 0xcce   :  { %v1169_v27 = vor.u32 1.1754944e-38, %v1168_v7  ;;  %vm1167_vm15 = vcmp.eq.f32.partialorder %v1166_v10, 8.507059e+37 }
 0xcd2   :  { %v2539_v1 = vpop.eup %2538 }
 0xcd3   :  { %v1158_v29 = vmul.f32 %v2539_v1, %v1156_v0  ;;  %v891_v5 = vpop.permute.xlu2 %890  ;;  %vm1163_vm12 = vweird.f32 %v2539_v1  ;;  %v1337_v0 = vld [vmem:[%s3312_s4 + $0x88] sm:$0xff] }
 0xcd4   :  { %v893_v8 = vadd.f32 %v2820_v54, %v891_v5  ;;  %vm1164_vm14 = vmor %vm1162_vm13, %vm1163_vm12  ;;  %1361 = vmatpush.msra.mxu1 %v1337_v0  ;;  %v1334_v5 = vld [vmem:[%s3312_s4 + $0x70] sm:$0xff] }
 0xcd5   :  { %v1159_v11 = vsub.f32 1.0, %v1158_v29  ;;  %v2998_v29 = vld [vmem:[%s3315_s5 + $0x18] ss:$0 sm:$0xff] }
 0xcd6   :  { %v1009_v12 = vadd.f32 %v1007_v9, %v893_v8  ;;  %v1333_v8 = vld [vmem:[%s3312_s4 + $0x68] sm:$0xff]  ;;  %v1332_v9 = vld [vmem:[%s3312_s4 + $0x60] sm:$0xff] }
 0xcd7   :  { %v1160_v13 = vmul.f32 %v2539_v1, %v1159_v11 }
 0xcd8   :  { %1233 = vrot.lane.b32.xlu1 %v1009_v12, %s2600_s13 }
 0xcd9   :  { %v1161_v26 = vadd.f32 %v2539_v1, %v1160_v13 }
 0xcdb   :  { %v1165_v31 = vsel %vm1164_vm14, %v2539_v1, %v1161_v26  ;;  %v1336_v1 = vld [vmem:[%s3312_s4 + $0x80] sm:$0xff] }
 0xcdc   :  { %v1170_v14 = vsel %vm1167_vm15, %v1169_v27, %v1165_v31  ;;  %1362 = vmatpush.msra.mxu1 %v1336_v1 }
 0xcdd   :  { %v1171_v15 = vmul.f32 %v2535_v49, %v1170_v14 }
 0xcdf   :  { %2366 = vmatmul.msk.f32.vlgmr.msrb.gmra.mxu3 %vm125_vm1, %v1171_v15 }
 0xce0   :  { %1285 = vrot.lane.b32.xlu1 %v2768_v38, %s2599_s12 }
 0xce8   :  { %1290 = vrot.lane.b32.xlu1 %v2768_v38, %s2602_s0 }
 0xcea   :  { %v1084_v3 = vpop.f32.mrf.mxu2 }
 0xceb   :  { %2362 = vmatmul.msk.f32.vlgmr.msra.gmra.mxu0 %vm151_vm2, %v1084_v3 }
 0xd4a   :  { %v1234_v17 = vpop.permute.xlu1 %1233 }
 0xd4b   :  { %v1239_v18 = vadd.f32 %v1234_v17, %v2831_v6  ;;  %v1298_v6 = vld [vmem:[%s3312_s4 + $0x58] sm:$0xff] }
 0xd4c   :  { %1319 = vmatpush.msrb.mxu0 %v1298_v6 }
 0xd4d   :  { %v1241_v2 = vsel %vm43_vm0, %v1239_v18, 0.0 }
 0xd4e   :  { %1242 = vadd.xlane.f32.xlu2 %v1241_v2  ;;  %1320 = vmatpush.msrb.mxu0 %v1297_v33 }
 0xd50   :  { %1321 = vmatpush.msrb.mxu0 %v1296_v34 }
 0xd52   :  { %1322 = vmatpush.msrb.mxu0 %v1295_v36  ;;  %v2976_v46 = vpop.permute.xlu1 %1285  ;;  %v3039_v36 = vld [vmem:[%s3315_s5 + $0x10] ss:$0 sm:$0xff] }
 0xd5a   :  { %v2979_v47 = vpop.permute.xlu1 %1290 }
 0xd62   :  { %v1200_v19 = vpop.f32.mrf.mxu3 }
 0xd63   :  { %2367 = vmatmul.msk.f32.vlgmr.msrb.gmra.mxu2 %vm151_vm2, %v1200_v19 }
 0xd68   :  { %v1107_v20 = vpop.f32.mrf.mxu0 }
 0xd69   :  { %1111 = vrot.lane.b32.xlu1 %v1107_v20, %s2605_s7 }
 0xdc1   :  { %v1243_v22 = vpop.xlane.xlu2 %1242 }
 0xdc2   :  { %v1247_v23 = vmul.f32 %v1243_v22, %v2761_v30 }
 0xdc4   :  { %v1249_v24 = vsub.f32 %v1239_v18, %v1247_v23 }
 0xdc6   :  { %v1251_v38 = vmul.f32 %v1249_v24, %v1249_v24 }
 0xdc8   :  { %v1253_v25 = vsel %vm43_vm0, %v1251_v38, 0.0 }
 0xdc9   :  { %1254 = vadd.xlane.f32.xlu0 %v1253_v25  ;;  %v3029_v25 = vld [vmem:[%s3315_s5 + $0x28] ss:$0 sm:$0xff] }
 0xddb   :  { %v1112_v56 = vpop.permute.xlu1 %1111 }
 0xddc   :  { %v1114_v62 = vadd.f32 %v2820_v54, %v1112_v56  ;;  %v1335_v54 = vld [vmem:[%s3312_s4 + $0x78] sm:$0xff] }
 0xddd   :  { %1363 = vmatpush.msra.mxu1 %v1335_v54 }
 0xddf   :  { %1364 = vmatpush.msra.mxu1 %v1334_v5 }
 0xde1   :  { %1365 = vmatpush.msra.mxu1 %v1333_v8 }
 0xde3   :  { %1366 = vmatpush.msra.mxu1 %v1332_v9 }
 0xde6   :  { %v1223_v28 = vpop.f32.mrf.mxu2 }
 0xde7   :  { %1227 = vrot.lane.b32.xlu1 %v1223_v28, %s2605_s7 }
 0xe3c   :  { %v1255_v39 = vpop.xlane.xlu0 %1254 }
 0xe3d   :  { %v1259_v41 = vmul.f32 %v1255_v39, %v2761_v30 }
 0xe3f   :  { %v1261_v43 = vadd.f32 1e-06, %v1259_v41 }
 0xe41   :  { %2540 = vrsqrt.f32 %v1261_v43  ;;  %vm1269_vm3 = vweird.f32 %v1261_v43 }
 0xe47   :  { %v2541_v44 = vpop.eup %2540 }
 0xe48   :  { %v1264_v49 = vmul.f32 %v2541_v44, %v1261_v43  ;;  %vm1270_vm1 = vweird.f32 %v2541_v44 }
 0xe49   :  { %vm1271_vm4 = vmor %vm1269_vm3, %vm1270_vm1 }
 0xe4a   :  { %v1265_v37 = vmul.f32 %v2541_v44, %v1264_v49 }
 0xe4c   :  { %v1266_v51 = vmul.f32 0.5, %v1265_v37  ;;  %v2588_v37 = vld [vmem:[%s3312_s4 + $0x38] sm:$0xff] }
 0xe4e   :  { %v1267_v52 = vsub.f32 1.5, %v1266_v51  ;;  %v2589_v51 = vld [vmem:[%s3312_s4 + $0x30] sm:$0xff] }
 0xe50   :  { %v1268_v55 = vmul.f32 %v2541_v44, %v1267_v52  ;;  %v3053_v52 = vpack.i.bf16 %v2589_v51, %v2588_v37 }
 0xe52   :  { %v1272_v57 = vsel %vm1271_vm4, %v2541_v44, %v1268_v55 }
 0xe53   :  { %v1283_v58 = vmul.f32 %v1272_v57, %v1249_v24 }
 0xe55   :  { %v1288_v59 = vmul.f32 %v2976_v46, %v1283_v58 }
 0xe57   :  { %v1293_v61 = vadd.f32 %v2979_v47, %v1288_v59 }
 0xe59   :  { %2368 = vmatmul.msk.f32.vlgmr.msrb.gmra.mxu0 %vm43_vm0, %v1293_v61  ;;  %v1228_v63 = vpop.permute.xlu1 %1227 }
 0xe5a   :  { %v1230_v4 = vadd.f32 %v1228_v63, %v1114_v62 }
 0xe5c   :  { %1235 = vrot.lane.b32.xlu1 %v1230_v4, %s2600_s13 }
 0xe64   :  { %1341 = vrot.lane.b32.xlu1 %v2998_v29, %s2599_s12 }
 0xe6c   :  { %2467 = vrot.lane.b32.xlu1 %v2735_v35, %s2599_s12 }
 0xe74   :  { %2477 = vrot.lane.b32.xlu1 %v2757_v21, %s2599_s12 }
 0xe7c   :  { %2482 = vrot.lane.b32.xlu1 %v2757_v21, %s2600_s13 }
 0xe84   :  { %1488 = vrot.lane.b32.xlu1 %v3039_v36, %s2601_s14 }
 0xece   :  { %v1236_v11 = vpop.permute.xlu1 %1235 }
 0xecf   :  { %v1240_v7 = vadd.f32 %v1236_v11, %v2910_v60 }
 0xed1   :  { %v1244_v12 = vsel %vm43_vm0, %v1240_v7, 0.0 }
 0xed2   :  { %1245 = vadd.xlane.f32.xlu2 %v1244_v12 }
 0xed6   :  { %v1324_v13 = vpop.f32.mrf.mxu0  ;;  %v3017_v17 = vpop.permute.xlu1 %1341 }
 0xed7   :  { %v1325_v10 = vadd.f32 %v2998_v29, %v1324_v13 }
 0xed9   :  { %v1330_v26 = vmax.f32 %v1325_v10, 0.0 }
 0xedb   :  { %2370 = vmatmul.msk.f32.vlgmr.msra.gmra.mxu1 %vm1344_vm5, %v1330_v26 }
 0xede   :  { %v2468_v55 = vpop.permute.xlu1 %2467 }
 0xedf   :  { %v2470_v56 = vunpack.i.h.bf16 %v2468_v55 }
 0xf45   :  { %v1246_v27 = vpop.xlane.xlu2 %1245 }
 0xf46   :  { %v1248_v31 = vmul.f32 %v1246_v27, %v2761_v30 }
 0xf48   :  { %v1250_v14 = vsub.f32 %v1240_v7, %v1248_v31 }
 0xf4a   :  { %v1252_v15 = vmul.f32 %v1250_v14, %v1250_v14 }
 0xf4c   :  { %v1256_v3 = vsel %vm43_vm0, %v1252_v15, 0.0 }
 0xf4d   :  { %1257 = vadd.xlane.f32.xlu0 %v1256_v3 }
 0xf58   :  { %v1368_v60 = vpop.f32.mrf.mxu1 }
 0xf59   :  { %v1369_v18 = vadd.f32 %v1368_v60, %v3017_v17  ;;  %v2590_v60 = vld [vmem:[%s3314_s2] sm:$0xff] }
 0xf5b   :  { %v1374_v2 = vadd.f32 %v1369_v18, %v1293_v61 }
 0xf5d   :  { %v1377_v19 = vsel %vm43_vm0, %v1374_v2, 0.0 }
 0xf5e   :  { %1378 = vadd.xlane.f32.xlu2 %v1377_v19 }
 0xf76   :  { %1425 = vrot.lane.b32.xlu2 %v3029_v25, %s2598_s11 }
 0xfc0   :  { %v1258_v20 = vpop.xlane.xlu0 %1257 }
 0xfc1   :  { %v1260_v22 = vmul.f32 %v1258_v20, %v2761_v30 }
 0xfc3   :  { %v1262_v23 = vadd.f32 1e-06, %v1260_v22 }
 0xfc5   :  { %2542 = vrsqrt.f32 %v1262_v23  ;;  %vm1279_vm7 = vweird.f32 %v1262_v23 }
 0xfcb   :  { %v2543_v24 = vpop.eup %2542 }
 0xfcc   :  { %v1274_v38 = vmul.f32 %v2543_v24, %v1262_v23  ;;  %vm1280_vm6 = vweird.f32 %v2543_v24 }
 0xfcd   :  { %vm1281_vm8 = vmor %vm1279_vm7, %vm1280_vm6 }
 0xfce   :  { %v1275_v28 = vmul.f32 %v2543_v24, %v1274_v38 }
 0xfd0   :  { %v1276_v35 = vmul.f32 0.5, %v1275_v28  ;;  %v2592_v28 = vld [vmem:[%s3312_s4 + $0x28] sm:$0xff] }
 0xfd1   :  { %v1379_v6 = vpop.xlane.xlu2 %1378 }
 0xfd2   :  { %v1277_v33 = vsub.f32 1.5, %v1276_v35  ;;  %v1383_v34 = vmul.f32 %v1379_v6, %v2761_v30 }
 0xfd4   :  { %v1278_v39 = vmul.f32 %v2543_v24, %v1277_v33  ;;  %v1385_v40 = vsub.f32 %v1374_v2, %v1383_v34 }
 0xfd6   :  { %v1282_v42 = vsel %vm1281_vm8, %v2543_v24, %v1278_v39  ;;  %v1387_v21 = vmul.f32 %v1385_v40, %v1385_v40 }
 0xfd7   :  { %v1284_v41 = vmul.f32 %v1282_v42, %v1250_v14 }
 0xfd8   :  { %v1389_v43 = vsel %vm43_vm0, %v1387_v21, 0.0 }
 0xfd9   :  { %1390 = vadd.xlane.f32.xlu0 %v1389_v43  ;;  %v1289_v44 = vmul.f32 %v2976_v46, %v1284_v41  ;;  %v2469_v46 = vunpack.i.l.bf16 %v2468_v55  ;;  %v3060_v14 = vpop.permute.xlu2 %1425 }
 0xfdb   :  { %v1294_v49 = vadd.f32 %v2979_v47, %v1289_v44  ;;  %1509 = vmatpush.msra.mxu2 %v2469_v46  ;;  %v2478_v47 = vpop.permute.xlu1 %2477 }
 0xfdc   :  { %v2480_v57 = vunpack.i.h.bf16 %v2478_v47  ;;  %v2479_v58 = vunpack.i.l.bf16 %v2478_v47 }
 0xfdd   :  { %2369 = vmatmul.msk.f32.gmra.mxu0 %vm43_vm0, %v1294_v49  ;;  %1510 = vmatpush.msra.mxu2 %v2470_v56 }
 0xfdf   :  { %1511 = vmatpush.msra.mxu2 %v2479_v58 }
 0xfe1   :  { %1512 = vmatpush.msra.mxu2 %v2480_v57 }
 0xfe3   :  { %v2483_v7 = vpop.permute.xlu1 %2482 }
 0xfe4   :  { %v2484_v27 = vunpack.i.l.bf16 %v2483_v7 }
 0xfeb   :  { %v3082_v23 = vpop.permute.xlu1 %1488 }
 0xfed   :  { %2472 = vrot.lane.b32.xlu0 %v3053_v52, %s2600_s13 }
0x104c   :  { %v1391_v59 = vpop.xlane.xlu0 %1390 }
0x104d   :  { %v1395_v61 = vmul.f32 %v1391_v59, %v2761_v30 }
0x104f   :  { %v1397_v62 = vadd.f32 1e-06, %v1395_v61 }
0x1051   :  { %2544 = vrsqrt.f32 %v1397_v62  ;;  %vm1405_vm10 = vweird.f32 %v1397_v62 }
0x1057   :  { %v2545_v63 = vpop.eup %2544 }
0x1058   :  { %v1400_v4 = vmul.f32 %v2545_v63, %v1397_v62  ;;  %vm1406_vm9 = vweird.f32 %v2545_v63 }
0x1059   :  { %vm1407_vm11 = vmor %vm1405_vm10, %vm1406_vm9 }
0x105a   :  { %v1401_v0 = vmul.f32 %v2545_v63, %v1400_v4  ;;  %v1327_v1 = vpop.f32.mrf.mxu0 }
0x105b   :  { %v1328_v54 = vadd.f32 %v2998_v29, %v1327_v1  ;;  %v2485_v29 = vunpack.i.h.bf16 %v2483_v7 }
0x105c   :  { %v1402_v5 = vmul.f32 0.5, %v1401_v0 }
0x105d   :  { %v1331_v8 = vmax.f32 %v1328_v54, 0.0 }
0x105e   :  { %v1403_v9 = vsub.f32 1.5, %v1402_v5 }
0x105f   :  { %2371 = vmatmul.msk.f32.gmra.mxu1 %vm1344_vm5, %v1331_v8  ;;  %v2473_v11 = vpop.permute.xlu0 %2472  ;;  %v2593_v8 = vld [vmem:[%s3314_s2 + $0x8] sm:$0xff] }
0x1060   :  { %v1404_v12 = vmul.f32 %v2545_v63, %v1403_v9  ;;  %v2475_v13 = vunpack.i.h.bf16 %v2473_v11  ;;  %v2474_v10 = vunpack.i.l.bf16 %v2473_v11 }
0x1062   :  { %v1408_v26 = vsel %vm1407_vm11, %v2545_v63, %v1404_v12  ;;  %1456 = vmatpush.msra.mxu3 %v2474_v10 }
0x1063   :  { %v1419_v31 = vmul.f32 %v1408_v26, %v1385_v40 }
0x1064   :  { %1457 = vmatpush.msra.mxu3 %v2475_v13 }
0x1065   :  { %v1422_v15 = vmul.f32 %v3029_v25, %v1419_v31 }
0x1066   :  { %1458 = vmatpush.msra.mxu3 %v2484_v27 }
0x1067   :  { %v1428_v3 = vadd.f32 %v3060_v14, %v1422_v15 }
0x1068   :  { %1459 = vmatpush.msra.mxu3 %v2485_v29 }
0x1069   :  { %v1473_v18 = vadd.f32 %v2590_v60, %v1428_v3  ;;  %2308 = vst.msk [vmem:[%s3318_s6] sm:$0xff] %vm43_vm0, %v1428_v3  ;;  %2372 = vmatmul.msk.f32.vlgmr.msra.gmra.mxu3 %vm43_vm0, %v2781_v45 }
0x106b   :  { %2376 = vmatmul.msk.f32.vlgmr.msra.gmra.mxu2 %vm43_vm0, %v1473_v18 }
0x1071   :  { %2373 = vmatmul.msk.f32.gmra.mxu3 %vm43_vm0, %v2793_v48 }
0x1079   :  { %2374 = vmatmul.msk.f32.gmra.mxu3 %vm43_vm0, %v2803_v50 }
0x1081   :  { %2375 = vmatmul.msk.f32.gmra.mxu3 %vm43_vm0, %v2813_v53 }
0x10dc   :  { %v1371_v2 = vpop.f32.mrf.mxu1 }
0x10dd   :  { %v1372_v19 = vadd.f32 %v1371_v2, %v3017_v17  ;;  %v2591_v17 = vld [vmem:[%s3312_s4 + $0x20] sm:$0xff] }
0x10de   :  { %v2491_v35 = vpack.i.bf16 %v2591_v17, %v2592_v28 }
0x10df   :  { %v1375_v20 = vadd.f32 %v1372_v19, %v1294_v49 }
0x10e1   :  { %v1380_v22 = vsel %vm43_vm0, %v1375_v20, 0.0 }
0x10e2   :  { %1381 = vadd.xlane.f32.xlu0 %v1380_v22 }
0x10ec   :  { %v1461_v38 = vpop.f32.mrf.mxu3 }
0x10ed   :  { %v1462_v48 = vadd.f32 %v3039_v36, %v1461_v38 }
0x10ee   :  { %v1514_v45 = vpop.f32.mrf.mxu2 }
0x10ef   :  { %v1515_v24 = vadd.f32 %v1514_v45, %v3082_v23 }
0x10f1   :  { %1722 = vrot.lane.b32.xlu1 %v1515_v24, %s2604_s3  ;;  %2380 = vmatpush.xpose.msk.msrb.mxu2 %vm151_vm2, %v1515_v24 }
0x10f4   :  { %v1464_v50 = vpop.f32.mrf.mxu3 }
0x10f5   :  { %v1465_v53 = vadd.f32 %v3039_v36, %v1464_v50 }
0x10f9   :  { %1718 = vrot.lane.b32.xlu1 %v1462_v48, %s2604_s3 }
0x10fc   :  { %v1467_v57 = vpop.f32.mrf.mxu3 }
0x1101   :  { %1720 = vrot.lane.b32.xlu1 %v1465_v53, %s2604_s3 }
0x1104   :  { %v3107_v4 = vpop.f32.mrf.mxu3 }
0x1109   :  { %2487 = vrot.lane.b32.xlu1 %v3053_v52, %s2605_s7 }
0x1111   :  { %2492 = vrot.lane.b32.xlu1 %v2491_v35, %s2605_s7 }
0x1155   :  { %v1382_v6 = vpop.xlane.xlu0 %1381 }
0x1156   :  { %v1384_v33 = vmul.f32 %v1382_v6, %v2761_v30 }
0x1158   :  { %v1386_v34 = vsub.f32 %v1375_v20, %v1384_v33 }
0x115a   :  { %v1388_v39 = vmul.f32 %v1386_v34, %v1386_v34 }
0x115c   :  { %v1392_v40 = vsel %vm43_vm0, %v1388_v39, 0.0 }
0x115d   :  { %1393 = vadd.xlane.f32.xlu2 %v1392_v40 }
0x1163   :  { %v1723_v42 = vpop.permute.xlu1 %1722 }
0x1164   :  { %2387 = vmatpush.xpose.msk.msrb.mxu3 %vm151_vm2, %v1723_v42 }
0x116b   :  { %v1719_v21 = vpop.permute.xlu1 %1718 }
0x116c   :  { %2388 = vmatmul.msk.f32.vlgmr.msrb.gmra.mxu3 %vm151_vm2, %v1719_v21 }
0x1173   :  { %v1721_v41 = vpop.permute.xlu1 %1720 }
0x1174   :  { %2389 = vmatmul.msk.f32.gmra.mxu3 %vm151_vm2, %v1721_v41 }
0x117b   :  { %v2488_v43 = vpop.permute.xlu1 %2487 }
0x117c   :  { %v2490_v44 = vunpack.i.h.bf16 %v2488_v43  ;;  %v2489_v49 = vunpack.i.l.bf16 %v2488_v43 }
0x117e   :  { %1553 = vmatpush.msra.mxu0 %v2489_v49 }
0x1180   :  { %1554 = vmatpush.msra.mxu0 %v2490_v44 }
0x1183   :  { %v2493_v37 = vpop.permute.xlu1 %2492 }
0x1184   :  { %v2495_v51 = vunpack.i.h.bf16 %v2493_v37  ;;  %v2494_v52 = vunpack.i.l.bf16 %v2493_v37 }
0x1186   :  { %1555 = vmatpush.msra.mxu0 %v2494_v52  ;;  %v3159_v52 = vadd.f32 %v3039_v36, %v3107_v4 }
0x1188   :  { %1556 = vmatpush.msra.mxu0 %v2495_v51 }
0x1189   :  { %2378 = vmatmul.msk.f32.vlgmr.msra.gmra.mxu0 %vm43_vm0, %v1428_v3 }
0x11d0   :  { %v1394_v55 = vpop.xlane.xlu2 %1393 }
0x11d1   :  { %v1396_v56 = vmul.f32 %v1394_v55, %v2761_v30 }
0x11d3   :  { %v1398_v46 = vadd.f32 1e-06, %v1396_v56 }
0x11d5   :  { %2546 = vrsqrt.f32 %v1398_v46  ;;  %vm1415_vm13 = vweird.f32 %v1398_v46 }
0x11db   :  { %v2547_v47 = vpop.eup %2546 }
0x11dc   :  { %v1410_v58 = vmul.f32 %v2547_v47, %v1398_v46  ;;  %vm1416_vm12 = vweird.f32 %v2547_v47 }
0x11dd   :  { %vm1417_vm14 = vmor %vm1415_vm13, %vm1416_vm12 }
0x11de   :  { %v1411_v59 = vmul.f32 %v2547_v47, %v1410_v58 }
0x11e0   :  { %v1412_v61 = vmul.f32 0.5, %v1411_v59 }
0x11e2   :  { %v1413_v62 = vsub.f32 1.5, %v1412_v61 }
0x11e4   :  { %v1414_v63 = vmul.f32 %v2547_v47, %v1413_v62 }
0x11e6   :  { %v1418_v0 = vsel %vm1417_vm14, %v2547_v47, %v1414_v63 }
0x11e7   :  { %v1420_v1 = vmul.f32 %v1418_v0, %v1386_v34 }
0x11e9   :  { %v1423_v54 = vmul.f32 %v3029_v25, %v1420_v1 }
0x11eb   :  { %v1429_v5 = vadd.f32 %v3060_v14, %v1423_v54 }
0x11ed   :  { %2379 = vmatmul.msk.f32.gmra.mxu0 %vm43_vm0, %v1429_v5  ;;  %2309 = vst.msk [vmem:[%s3318_s6 + $0x8] sm:$0xff] %vm43_vm0, %v1429_v5  ;;  %v1474_v9 = vadd.f32 %v2593_v8, %v1429_v5 }
0x11ef   :  { %2377 = vmatmul.msk.f32.gmra.mxu2 %vm43_vm0, %v1474_v9  ;;  %v1747_v11 = vpop.f32.mrf.mxu3 }
0x11f0   :  { %v1753_v7 = vmul.f32 0.35355338, %v1747_v11 }
0x11f2   :  { %v1755_v12 = vsel %vm151_vm2, %v1753_v7, -inf }
0x11f3   :  { %1756 = vmax.xlane.f32.xlu2 %v1755_v12 }
0x11f7   :  { %2381 = vmatmul.msk.f32.vlgmr.msrb.gmra.mxu2 %vm151_vm2, %v1462_v48  ;;  %v1750_v18 = vpop.f32.mrf.mxu3 }
0x11f8   :  { %v1754_v19 = vmul.f32 0.35355338, %v1750_v18 }
0x11fa   :  { %v1758_v24 = vsel %vm151_vm2, %v1754_v19, -inf }
0x11ff   :  { %2382 = vmatmul.msk.f32.gmra.mxu2 %vm151_vm2, %v1465_v53  ;;  %v3138_v53 = vadd.f32 %v3039_v36, %v1467_v57 }
0x1206   :  { %v1558_v13 = vpop.f32.mrf.mxu0 }
0x120b   :  { %1532 = vrot.lane.b32.xlu2 %v3039_v36, %s2598_s11 }
0x1266   :  { %v1757_v10 = vpop.xlane.xlu2 %1756 }
0x1267   :  { %v1761_v60 = vsub.f32 %v1753_v7, %v1757_v10 }
0x1269   :  { %v1763_v20 = vmul.f32 1.442695, %v1761_v60 }
0x126a   :  { %v1561_v26 = vpop.f32.mrf.mxu0 }
0x126b   :  { %2548 = vpow2.f32 %v1763_v20 }
0x126e   :  { %v1533_v27 = vpop.permute.xlu2 %1532 }
0x126f   :  { %v1559_v31 = vadd.f32 %v1558_v13, %v1533_v27  ;;  %v3125_v14 = vadd.f32 %v1561_v26, %v1533_v27 }
0x1271   :  { %1667 = vmatpush.msrb.mxu1 %v1559_v31  ;;  %1982 = vmatpush.msra.mxu3 %v3125_v14  ;;  %v3131_v48 = vpop.eup %2548 }
0x1272   :  { %v1517_v29 = vpop.f32.mrf.mxu2  ;;  %v1767_v50 = vsel %vm151_vm2, %v3131_v48, 0.0 }
0x1273   :  { %v1518_v37 = vadd.f32 %v1517_v29, %v3082_v23 }
0x127a   :  { %v1590_v15 = vpop.f32.mrf.mxu2 }
0x127b   :  { %v1596_v3 = vmul.f32 0.35355338, %v1590_v15 }
0x127d   :  { %v1598_v2 = vsel %vm151_vm2, %v1596_v3, -inf }
0x127e   :  { %1599 = vmax.xlane.f32.xlu0 %v1598_v2 }
0x1282   :  { %v1593_v22 = vpop.f32.mrf.mxu2 }
0x1283   :  { %v1597_v45 = vmul.f32 0.35355338, %v1593_v22 }
0x1285   :  { %v1601_v38 = vsel %vm151_vm2, %v1597_v45, -inf }
0x1286   :  { %1759 = vmax.xlane.f32.xlu0 %v1758_v24  ;;  %1602 = vmax.xlane.f32.xlu1 %v1601_v38 }
0x128e   :  { %1768 = vadd.xlane.f32.xlu0 %v1767_v50 }
0x129f   :  { %1676 = vrot.lane.b32.xlu1 %v2903_v16, %s2598_s11 }
0x12a7   :  { %2029 = vrot.lane.b32.xlu1 %v3138_v53, %s2604_s3 }
0x12f1   :  { %v1600_v17 = vpop.xlane.xlu0 %1599 }
0x12f2   :  { %v1604_v28 = vsub.f32 %v1596_v3, %v1600_v17 }
0x12f4   :  { %v1606_v35 = vmul.f32 1.442695, %v1604_v28 }
0x12f6   :  { %2550 = vpow2.f32 %v1606_v35 }
0x12f9   :  { %v1760_v6 = vpop.xlane.xlu0 %1759  ;;  %v1603_v33 = vpop.xlane.xlu1 %1602 }
0x12fa   :  { %v1762_v34 = vsub.f32 %v1754_v19, %v1760_v6  ;;  %v1605_v39 = vsub.f32 %v1597_v45, %v1603_v33 }
0x12fc   :  { %v2551_v40 = vpop.eup %2550  ;;  %v1765_v42 = vmul.f32 1.442695, %v1762_v34  ;;  %v1608_v21 = vmul.f32 1.442695, %v1605_v39 }
0x12fd   :  { %v1610_v41 = vsel %vm151_vm2, %v2551_v40, 0.0 }
0x12fe   :  { %2552 = vpow2.f32 %v1765_v42  ;;  %1611 = vadd.xlane.f32.xlu0 %v1610_v41 }
0x12ff   :  { %2554 = vpow2.f32 %v1608_v21 }
0x1301   :  { %v1769_v23 = vpop.xlane.xlu0 %1768 }
0x1302   :  { %2556 = vrcp.f32 %v1769_v23  ;;  %v1784_v27 = vand.u32 2147483648, %v1769_v23  ;;  %vm1778_vm6 = vweird.f32 %v1769_v23  ;;  %v1782_v29 = vand.u32 2147483647, %v1769_v23 }
0x1304   :  { %v3143_v16 = vpop.eup %2552  ;;  %v1785_v19 = vor.u32 1.1754944e-38, %v1784_v27  ;;  %vm1783_vm10 = vcmp.eq.f32.partialorder %v1782_v29, 8.507059e+37 }
0x1305   :  { %v3145_v43 = vpop.eup %2554  ;;  %v1770_v44 = vsel %vm151_vm2, %v3143_v16, 0.0 }
0x1306   :  { %1771 = vadd.xlane.f32.xlu2 %v1770_v44  ;;  %v1613_v49 = vsel %vm151_vm2, %v3145_v43, 0.0 }
0x1307   :  { %1614 = vadd.xlane.f32.xlu0 %v1613_v49 }
0x1308   :  { %v2557_v56 = vpop.eup %2556 }
0x1309   :  { %v1774_v46 = vmul.f32 %v2557_v56, %v1769_v23  ;;  %vm1779_vm5 = vweird.f32 %v2557_v56 }
0x130a   :  { %vm1780_vm7 = vmor %vm1778_vm6, %vm1779_vm5 }
0x130b   :  { %v1775_v61 = vsub.f32 1.0, %v1774_v46 }
0x130d   :  { %v1776_v0 = vmul.f32 %v2557_v56, %v1775_v61 }
0x130f   :  { %v1777_v13 = vadd.f32 %v2557_v56, %v1776_v0 }
0x1311   :  { %v3152_v51 = vpop.permute.xlu1 %1676  ;;  %v1781_v18 = vsel %vm1780_vm7, %v2557_v56, %v1777_v13 }
0x1312   :  { %1700 = vmatpush.msrb.mxu0 %v3152_v51  ;;  %v1786_v45 = vsel %vm1783_vm10, %v1785_v19, %v1781_v18 }
0x1313   :  { %v1801_v6 = vmul.f32 %v3131_v48, %v1786_v45 }
0x1314   :  { %2394 = vmatpush.xpose.msk.msra.mxu0 %vm151_vm2, %v1518_v37 }
0x1319   :  { %v2030_v49 = vpop.permute.xlu1 %2029 }
0x131b   :  { %1804 = vrot.lane.b32.xlu0 %v1559_v31, %s2604_s3 }
0x131e   :  { %2031 = vrot.lane.b32.xlu2 %v3159_v52, %s2604_s3 }
0x1323   :  { %1837 = vrot.lane.b32.xlu0 %v2895_v32, %s2598_s11 }
0x132b   :  { %2033 = vrot.lane.b32.xlu0 %v1518_v37, %s2604_s3 }
0x1371   :  { %v1612_v55 = vpop.xlane.xlu0 %1611 }
0x1372   :  { %2558 = vrcp.f32 %v1612_v55  ;;  %v1627_v63 = vand.u32 2147483648, %v1612_v55  ;;  %v1625_v4 = vand.u32 2147483647, %v1612_v55  ;;  %vm1621_vm1 = vweird.f32 %v1612_v55 }
0x1374   :  { %v1628_v5 = vor.u32 1.1754944e-38, %v1627_v63  ;;  %vm1626_vm4 = vcmp.eq.f32.partialorder %v1625_v4, 8.507059e+37 }
0x1378   :  { %v2559_v47 = vpop.eup %2558 }
0x1379   :  { %v1617_v57 = vmul.f32 %v2559_v47, %v1612_v55  ;;  %v3166_v58 = vpop.xlane.xlu2 %1771  ;;  %vm1622_vm15 = vweird.f32 %v2559_v47 }
0x137a   :  { %2560 = vrcp.f32 %v3166_v58  ;;  %v1615_v59 = vpop.xlane.xlu0 %1614  ;;  %vm1623_vm3 = vmor %vm1621_vm1, %vm1622_vm15  ;;  %v1798_v17 = vand.u32 2147483648, %v3166_v58  ;;  %vm1792_vm14 = vweird.f32 %v3166_v58  ;;  %v1796_v33 = vand.u32 2147483647, %v3166_v58 }
0x137b   :  { %v1618_v62 = vsub.f32 1.0, %v1617_v57  ;;  %2562 = vrcp.f32 %v1615_v59  ;;  %v1641_v15 = vand.u32 2147483648, %v1615_v59  ;;  %v1639_v60 = vand.u32 2147483647, %v1615_v59 }
0x137c   :  { %vm1635_vm9 = vweird.f32 %v1615_v59  ;;  %v1799_v39 = vor.u32 1.1754944e-38, %v1798_v17  ;;  %vm1797_vm1 = vcmp.eq.f32.partialorder %v1796_v33, 8.507059e+37 }
0x137d   :  { %v1619_v32 = vmul.f32 %v2559_v47, %v1618_v62  ;;  %v1642_v22 = vor.u32 1.1754944e-38, %v1641_v15  ;;  %vm1640_vm12 = vcmp.eq.f32.partialorder %v1639_v60, 8.507059e+37 }
0x137f   :  { %v1620_v1 = vadd.f32 %v2559_v47, %v1619_v32 }
0x1380   :  { %v2561_v54 = vpop.eup %2560 }
0x1381   :  { %v2563_v8 = vpop.eup %2562  ;;  %v1624_v9 = vsel %vm1623_vm3, %v2559_v47, %v1620_v1  ;;  %v1788_v11 = vmul.f32 %v2561_v54, %v3166_v58  ;;  %vm1793_vm13 = vweird.f32 %v2561_v54  ;;  %v2032_v37 = vpop.permute.xlu2 %2031 }
0x1382   :  { %v1629_v7 = vsel %vm1626_vm4, %v1628_v5, %v1624_v9  ;;  %v1631_v12 = vmul.f32 %v2563_v8, %v1615_v59  ;;  %vm1636_vm8 = vweird.f32 %v2563_v8  ;;  %vm1794_vm15 = vmor %vm1792_vm14, %vm1793_vm13 }
0x1383   :  { %v1789_v10 = vsub.f32 1.0, %v1788_v11  ;;  %v1644_v26 = vmul.f32 %v2551_v40, %v1629_v7  ;;  %vm1637_vm11 = vmor %vm1635_vm9, %vm1636_vm8 }
0x1384   :  { %v1632_v31 = vsub.f32 1.0, %v1631_v12 }
0x1385   :  { %2383 = vmatmul.msk.f32.vlgmr.msrb.gmra.mxu1 %vm151_vm2, %v1644_v26  ;;  %v1790_v2 = vmul.f32 %v2561_v54, %v1789_v10 }
0x1386   :  { %v1633_v3 = vmul.f32 %v2563_v8, %v1632_v31 }
0x1387   :  { %v1791_v50 = vadd.f32 %v2561_v54, %v1790_v2 }
0x1388   :  { %v1634_v20 = vadd.f32 %v2563_v8, %v1633_v3 }
0x1389   :  { %v1795_v34 = vsel %vm1794_vm15, %v2561_v54, %v1791_v50 }
0x138a   :  { %v1638_v24 = vsel %vm1637_vm11, %v2563_v8, %v1634_v20  ;;  %v1800_v40 = vsel %vm1797_vm1, %v1799_v39, %v1795_v34 }
0x138b   :  { %v1643_v38 = vsel %vm1640_vm12, %v1642_v22, %v1638_v24  ;;  %v1802_v21 = vmul.f32 %v3143_v16, %v1800_v40 }
0x138c   :  { %v1645_v28 = vmul.f32 %v3145_v43, %v1643_v38 }
0x138d   :  { %v1805_v35 = vpop.permute.xlu0 %1804 }
0x138e   :  { %2384 = vmatmul.msk.f32.gmra.mxu1 %vm151_vm2, %v1645_v28  ;;  %1828 = vmatpush.msra.mxu2 %v1805_v35 }
0x138f   :  { %2390 = vmatmul.msk.f32.vlgmr.msra.gmra.mxu2 %vm151_vm2, %v1801_v6 }
0x1390   :  { %2011 = vmatpush.msrb.mxu2 %v3152_v51 }
0x1395   :  { %v1838_v42 = vpop.permute.xlu0 %1837 }
0x1396   :  { %1861 = vmatpush.msra.mxu1 %v1838_v42  ;;  %2168 = vmatpush.msrb.mxu3 %v1838_v42 }
0x1397   :  { %2391 = vmatmul.msk.f32.gmra.mxu2 %vm151_vm2, %v1802_v21 }
0x139d   :  { %v2034_v48 = vpop.permute.xlu0 %2033 }
0x139e   :  { %2401 = vmatpush.xpose.msk.msrb.mxu1 %vm151_vm2, %v2034_v48 }
0x1402   :  { %v1669_v41 = vpop.f32.mrf.mxu1 }
0x1403   :  { %2385 = vmatmul.msk.f32.vlgmr.msrb.gmra.mxu0 %vm151_vm2, %v1669_v41 }
0x140b   :  { %v1672_v43 = vpop.f32.mrf.mxu1 }
0x140c   :  { %2386 = vmatmul.msk.f32.gmra.mxu0 %vm151_vm2, %v1672_v43 }
0x1412   :  { %v1830_v44 = vpop.f32.mrf.mxu2 }
0x1413   :  { %2392 = vmatmul.msk.f32.vlgmr.msra.gmra.mxu1 %vm151_vm2, %v1830_v44 }
0x1414   :  { %2395 = vmatmul.msk.f32.vlgmr.msra.gmra.mxu0 %vm151_vm2, %v3138_v53 }
0x141a   :  { %v1833_v16 = vpop.f32.mrf.mxu2 }
0x141b   :  { %2393 = vmatmul.msk.f32.gmra.mxu1 %vm151_vm2, %v1833_v16 }
0x141c   :  { %2396 = vmatmul.msk.f32.gmra.mxu0 %vm151_vm2, %v3159_v52 }
0x1423   :  { %2402 = vmatmul.msk.f32.vlgmr.msrb.gmra.mxu1 %vm151_vm2, %v2030_v49 }
0x142b   :  { %2403 = vmatmul.msk.f32.gmra.mxu1 %vm151_vm2, %v2032_v37 }
0x1480   :  { %v1702_v51 = vpop.f32.mrf.mxu0 }
0x1489   :  { %v1705_v23 = vpop.f32.mrf.mxu0 }
0x1490   :  { %v1863_v55 = vpop.f32.mrf.mxu1 }
0x1491   :  { %v1905_v56 = vpop.f32.mrf.mxu0 }
0x1492   :  { %v1911_v46 = vmul.f32 0.35355338, %v1905_v56 }
0x1494   :  { %v1913_v47 = vsel %vm151_vm2, %v1911_v46, -inf }
0x1495   :  { %1914 = vmax.xlane.f32.xlu0 %v1913_v47 }
0x1498   :  { %v3193_v53 = vpop.f32.mrf.mxu1 }
0x1499   :  { %v1908_v57 = vpop.f32.mrf.mxu0 }
0x149a   :  { %v1912_v58 = vmul.f32 0.35355338, %v1908_v57 }
0x149c   :  { %v1916_v52 = vsel %vm151_vm2, %v1912_v58, -inf }
0x149d   :  { %1917 = vmax.xlane.f32.xlu1 %v1916_v52 }
0x14a0   :  { %v2058_v59 = vpop.f32.mrf.mxu1 }
0x14a1   :  { %v2064_v61 = vmul.f32 0.35355338, %v2058_v59 }
0x14a3   :  { %v2066_v62 = vsel %vm151_vm2, %v2064_v61, -inf }
0x14a4   :  { %2067 = vmax.xlane.f32.xlu2 %v2066_v62 }
0x14a8   :  { %v2061_v63 = vpop.f32.mrf.mxu1 }
0x14a9   :  { %v2065_v32 = vmul.f32 0.35355338, %v2061_v63 }
0x14ab   :  { %v2069_v4 = vsel %vm151_vm2, %v2065_v32, -inf }
0x14ac   :  { %2070 = vmax.xlane.f32.xlu0 %v2069_v4 }
0x14bc   :  { %1710 = vrot.lane.b32.xlu2 %v1702_v51, %s2605_s7 }
0x1508   :  { %v1915_v5 = vpop.xlane.xlu0 %1914 }
0x1509   :  { %v1919_v11 = vsub.f32 %v1911_v46, %v1915_v5 }
0x150b   :  { %v1921_v10 = vmul.f32 1.442695, %v1919_v11 }
0x1510   :  { %v1918_v0 = vpop.xlane.xlu1 %1917 }
0x1511   :  { %v1920_v1 = vsub.f32 %v1912_v58, %v1918_v0 }
0x1513   :  { %v1923_v54 = vmul.f32 1.442695, %v1920_v1 }
0x1515   :  { %2564 = vpow2.f32 %v1923_v54 }
0x1517   :  { %v2068_v8 = vpop.xlane.xlu2 %2067 }
0x1518   :  { %v2072_v9 = vsub.f32 %v2064_v61, %v2068_v8 }
0x151a   :  { %v2074_v7 = vmul.f32 1.442695, %v2072_v9 }
0x151b   :  { %v3199_v12 = vpop.eup %2564 }
0x151c   :  { %2566 = vpow2.f32 %v2074_v7  ;;  %v1928_v13 = vsel %vm151_vm2, %v3199_v12, 0.0 }
0x151d   :  { %1929 = vadd.xlane.f32.xlu0 %v1928_v13  ;;  %2568 = vpow2.f32 %v1921_v10 }
0x151f   :  { %v2071_v26 = vpop.xlane.xlu0 %2070 }
0x1520   :  { %v2073_v27 = vsub.f32 %v2065_v32, %v2071_v26 }
0x1522   :  { %v3203_v31 = vpop.eup %2566  ;;  %v2076_v29 = vmul.f32 1.442695, %v2073_v27 }
0x1523   :  { %v2078_v15 = vsel %vm151_vm2, %v3203_v31, 0.0  ;;  %v2569_v3 = vpop.eup %2568 }
0x1524   :  { %2570 = vpow2.f32 %v2076_v29  ;;  %2079 = vadd.xlane.f32.xlu1 %v2078_v15  ;;  %v1925_v18 = vsel %vm151_vm2, %v2569_v3, 0.0 }
0x152a   :  { %v3207_v60 = vpop.eup %2570 }
0x152b   :  { %v2081_v2 = vsel %vm151_vm2, %v3207_v60, 0.0 }
0x152c   :  { %1926 = vadd.xlane.f32.xlu1 %v1925_v18  ;;  %2082 = vadd.xlane.f32.xlu0 %v2081_v2  ;;  %v1711_v18 = vpop.permute.xlu2 %1710 }
0x1540   :  { %1712 = vrot.lane.b32.xlu0 %v1705_v23, %s2605_s7 }
0x1545   :  { %2115 = vrot.lane.b32.xlu1 %v3125_v14, %s2604_s3 }
0x154d   :  { %1871 = vrot.lane.b32.xlu1 %v1863_v55, %s2605_s7 }
0x1590   :  { %v1930_v19 = vpop.xlane.xlu0 %1929 }
0x1591   :  { %v1956_v46 = vand.u32 2147483648, %v1930_v19  ;;  %vm1950_vm11 = vweird.f32 %v1930_v19  ;;  %v1954_v61 = vand.u32 2147483647, %v1930_v19 }
0x1593   :  { %v1957_v32 = vor.u32 1.1754944e-38, %v1956_v46  ;;  %vm1955_vm15 = vcmp.eq.f32.partialorder %v1954_v61, 8.507059e+37 }
0x1597   :  { %v2080_v20 = vpop.xlane.xlu1 %2079 }
0x1598   :  { %2572 = vrcp.f32 %v2080_v20  ;;  %v2095_v16 = vand.u32 2147483648, %v2080_v20  ;;  %vm2089_vm6 = vweird.f32 %v2080_v20  ;;  %v2093_v37 = vand.u32 2147483647, %v2080_v20 }
0x1599   :  { %2574 = vrcp.f32 %v1930_v19 }
0x159a   :  { %v2096_v52 = vor.u32 1.1754944e-38, %v2095_v16  ;;  %vm2094_vm12 = vcmp.eq.f32.partialorder %v2093_v37, 8.507059e+37 }
0x159e   :  { %v2573_v22 = vpop.eup %2572 }
0x159f   :  { %v3216_v45 = vpop.xlane.xlu0 %2082  ;;  %v1927_v24 = vpop.xlane.xlu1 %1926  ;;  %v2085_v50 = vmul.f32 %v2573_v22, %v2080_v20  ;;  %vm2090_vm4 = vweird.f32 %v2573_v22 }
0x15a0   :  { %2576 = vrcp.f32 %v3216_v45  ;;  %v2575_v38 = vpop.eup %2574  ;;  %v1942_v42 = vand.u32 2147483648, %v1927_v24  ;;  %v1940_v41 = vand.u32 2147483647, %v1927_v24  ;;  %vm1936_vm5 = vweird.f32 %v1927_v24  ;;  %vm3220_vm8 = vmor %vm2089_vm6, %vm2090_vm4 }
0x15a1   :  { %2578 = vrcp.f32 %v1927_v24  ;;  %v1946_v17 = vmul.f32 %v2575_v38, %v1930_v19  ;;  %v2086_v28 = vsub.f32 1.0, %v2085_v50  ;;  %vm1951_vm10 = vweird.f32 %v2575_v38 }
0x15a2   :  { %v1943_v51 = vor.u32 1.1754944e-38, %v1942_v42  ;;  %vm1941_vm9 = vcmp.eq.f32.partialorder %v1940_v41, 8.507059e+37  ;;  %vm1952_vm13 = vmor %vm1950_vm11, %vm1951_vm10  ;;  %v2109_v0 = vand.u32 2147483648, %v3216_v45  ;;  %vm2103_vm1 = vweird.f32 %v3216_v45 }
0x15a3   :  { %v1947_v14 = vsub.f32 1.0, %v1946_v17  ;;  %v2087_v34 = vmul.f32 %v2573_v22, %v2086_v28  ;;  %v2107_v8 = vand.u32 2147483647, %v3216_v45  ;;  %v1716_v19 = vadd.f32 %v3039_v36, %v1711_v18 }
0x15a4   :  { %v2110_v11 = vor.u32 1.1754944e-38, %v2109_v0 }
0x15a5   :  { %v1948_v21 = vmul.f32 %v2575_v38, %v1947_v14  ;;  %v2088_v43 = vadd.f32 %v2573_v22, %v2087_v34  ;;  %vm2108_vm4 = vcmp.eq.f32.partialorder %v2107_v8, 8.507059e+37 }
0x15a6   :  { %v2577_v35 = vpop.eup %2576 }
0x15a7   :  { %v2579_v6 = vpop.eup %2578  ;;  %v2099_v39 = vmul.f32 %v2577_v35, %v3216_v45  ;;  %v1949_v56 = vadd.f32 %v2575_v38, %v1948_v21  ;;  %v2092_v47 = vsel %vm3220_vm8, %v2573_v22, %v2088_v43  ;;  %vm2104_vm14 = vweird.f32 %v2577_v35 }
0x15a8   :  { %v1932_v33 = vmul.f32 %v2579_v6, %v1927_v24  ;;  %vm1937_vm3 = vweird.f32 %v2579_v6  ;;  %v2097_v62 = vsel %vm2094_vm12, %v2096_v52, %v2092_v47 }
0x15a9   :  { %v2100_v44 = vsub.f32 1.0, %v2099_v39  ;;  %vm1938_vm7 = vmor %vm1936_vm5, %vm1937_vm3  ;;  %v1953_v63 = vsel %vm1952_vm13, %v2575_v38, %v1949_v56  ;;  %v2112_v54 = vmul.f32 %v3203_v31, %v2097_v62  ;;  %v2594_v39 = vld [vmem:[%s3316_s1] sm:$0xff] }
0x15aa   :  { %v1933_v40 = vsub.f32 1.0, %v1932_v33  ;;  %v1958_v5 = vsel %vm1955_vm15, %v1957_v32, %v1953_v63  ;;  %vm2105_vm3 = vmor %vm2103_vm1, %vm2104_vm14 }
0x15ab   :  { %v2101_v57 = vmul.f32 %v2577_v35, %v2100_v44  ;;  %v1960_v7 = vmul.f32 %v3199_v12, %v1958_v5  ;;  %v2596_v44 = vld [vmem:[%s3316_s1 + $0x10] sm:$0xff] }
0x15ac   :  { %v1934_v48 = vmul.f32 %v2579_v6, %v1933_v40 }
0x15ad   :  { %v2102_v4 = vadd.f32 %v2577_v35, %v2101_v57 }
0x15ae   :  { %v1935_v49 = vadd.f32 %v2579_v6, %v1934_v48 }
0x15af   :  { %v2106_v9 = vsel %vm2105_vm3, %v2577_v35, %v2102_v4 }
0x15b0   :  { %v1939_v55 = vsel %vm1938_vm7, %v2579_v6, %v1935_v49  ;;  %v2111_v13 = vsel %vm2108_vm4, %v2110_v11, %v2106_v9 }
0x15b1   :  { %v1944_v58 = vsel %vm1941_vm9, %v1943_v51, %v1939_v55  ;;  %v2113_v10 = vmul.f32 %v3207_v60, %v2111_v13  ;;  %v2597_v51 = vld [vmem:[%s3316_s1 + $0x18] sm:$0xff] }
0x15b2   :  { %v1959_v59 = vmul.f32 %v2569_v3, %v1944_v58  ;;  %v1713_v22 = vpop.permute.xlu0 %1712 }
0x15b3   :  { %v1717_v28 = vadd.f32 %v3039_v36, %v1713_v22 }
0x15b4   :  { %2397 = vmatmul.msk.f32.vlgmr.msra.gmra.mxu3 %vm151_vm2, %v1959_v59 }
0x15b7   :  { %v2116_v1 = vpop.permute.xlu1 %2115 }
0x15b8   :  { %2139 = vmatpush.msrb.mxu0 %v2116_v1 }
0x15b9   :  { %2404 = vmatmul.msk.f32.vlgmr.msrb.gmra.mxu0 %vm151_vm2, %v2112_v54 }
0x15bc   :  { %2398 = vmatmul.msk.f32.gmra.mxu3 %vm151_vm2, %v1960_v7 }
0x15bf   :  { %v1872_v2 = vpop.permute.xlu1 %1871 }
0x15c0   :  { %v1877_v20 = vadd.f32 %v1872_v2, %v1716_v19 }
0x15c1   :  { %2405 = vmatmul.msk.f32.gmra.mxu0 %vm151_vm2, %v2113_v10 }
0x1636   :  { %v2141_v26 = vpop.f32.mrf.mxu0 }
0x1637   :  { %v1984_v27 = vpop.f32.mrf.mxu3  ;;  %2406 = vmatmul.msk.f32.vlgmr.msrb.gmra.mxu3 %vm151_vm2, %v2141_v26 }
0x1638   :  { %2399 = vmatmul.msk.f32.vlgmr.msrb.gmra.mxu2 %vm151_vm2, %v1984_v27 }
0x163e   :  { %v2144_v31 = vpop.f32.mrf.mxu0 }
0x163f   :  { %v1987_v29 = vpop.f32.mrf.mxu3  ;;  %2407 = vmatmul.msk.f32.gmra.mxu3 %vm151_vm2, %v2144_v31 }
0x1640   :  { %2400 = vmatmul.msk.f32.gmra.mxu2 %vm151_vm2, %v1987_v29 }
0x16ba   :  { %v2170_v12 = vpop.f32.mrf.mxu3 }
0x16bb   :  { %v2013_v15 = vpop.f32.mrf.mxu2 }
0x16bc   :  { %2021 = vrot.lane.b32.xlu0 %v2013_v15, %s2605_s7 }
0x16c2   :  { %v2173_v3 = vpop.f32.mrf.mxu3 }
0x16c3   :  { %v2016_v60 = vpop.f32.mrf.mxu2  ;;  %2180 = vrot.lane.b32.xlu1 %v2173_v3, %s2605_s7 }
0x16c4   :  { %1873 = vrot.lane.b32.xlu0 %v3193_v53, %s2605_s7  ;;  %2023 = vrot.lane.b32.xlu2 %v2016_v60, %s2605_s7 }
0x16cc   :  { %2178 = vrot.lane.b32.xlu2 %v2170_v12, %s2605_s7  ;;  %2190 = vrot.lane.b32.xlu0 %v1877_v20, %s2600_s13 }
0x171e   :  { %v2024_v45 = vpop.permute.xlu2 %2023 }
0x171f   :  { %v2028_v53 = vadd.f32 %v3039_v36, %v2024_v45 }
0x1726   :  { %v2179_v50 = vpop.permute.xlu2 %2178 }
0x172e   :  { %v2022_v24 = vpop.permute.xlu0 %2021 }
0x172f   :  { %v2027_v38 = vadd.f32 %v3039_v36, %v2022_v24  ;;  %v2595_v36 = vld [vmem:[%s3316_s1 + $0x8] sm:$0xff] }
0x1731   :  { %v2184_v17 = vadd.f32 %v2179_v50, %v2027_v38 }
0x1733   :  { %2194 = vrot.lane.b32.xlu1 %v2184_v17, %s2600_s13 }
0x1735   :  { %v2181_v35 = vpop.permute.xlu1 %2180 }
0x1736   :  { %v1874_v6 = vpop.permute.xlu0 %1873  ;;  %v2185_v14 = vadd.f32 %v2181_v35, %v2028_v53 }
0x1737   :  { %v1878_v33 = vadd.f32 %v1874_v6, %v1717_v28 }
0x1738   :  { %2196 = vrot.lane.b32.xlu0 %v2185_v14, %s2600_s13 }
0x1739   :  { %2192 = vrot.lane.b32.xlu2 %v1878_v33, %s2600_s13 }
0x173e   :  { %v2191_v34 = vpop.permute.xlu0 %2190 }
0x173f   :  { %v2202_v40 = vadd.f32 %v2594_v39, %v2191_v34 }
0x1741   :  { %v2206_v42 = vsel %vm43_vm0, %v2202_v40, 0.0 }
0x1762   :  { %2207 = vadd.xlane.f32.xlu2 %v2206_v42 }
0x1793   :  { %v2193_v21 = vpop.permute.xlu2 %2192 }
0x1794   :  { %v2203_v48 = vadd.f32 %v2595_v36, %v2193_v21 }
0x1796   :  { %v2209_v41 = vsel %vm43_vm0, %v2203_v48, 0.0 }
0x1797   :  { %2210 = vadd.xlane.f32.xlu1 %v2209_v41 }
0x17a5   :  { %v2195_v43 = vpop.permute.xlu1 %2194 }
0x17a6   :  { %v2204_v16 = vadd.f32 %v2596_v44, %v2195_v43 }
0x17a8   :  { %v2212_v49 = vsel %vm43_vm0, %v2204_v16, 0.0 }
0x17a9   :  { %2213 = vadd.xlane.f32.xlu0 %v2212_v49 }
0x17aa   :  { %v2197_v37 = vpop.permute.xlu0 %2196 }
0x17ab   :  { %v2205_v23 = vadd.f32 %v2597_v51, %v2197_v37 }
0x17ad   :  { %v2215_v55 = vsel %vm43_vm0, %v2205_v23, 0.0 }
0x17ae   :  { %2216 = vadd.xlane.f32.xlu2 %v2215_v55 }
0x17d5   :  { %v2208_v56 = vpop.xlane.xlu2 %2207 }
0x17d6   :  { %v2218_v46 = vmul.f32 %v2208_v56, %v2761_v30 }
0x17d8   :  { %v2222_v47 = vsub.f32 %v2202_v40, %v2218_v46 }
0x17da   :  { %v2226_v57 = vmul.f32 %v2222_v47, %v2222_v47 }
0x17dc   :  { %v2230_v58 = vsel %vm43_vm0, %v2226_v57, 0.0 }
0x17dd   :  { %2231 = vadd.xlane.f32.xlu1 %v2230_v58 }
0x180a   :  { %v2211_v52 = vpop.xlane.xlu1 %2210 }
0x180b   :  { %v2219_v59 = vmul.f32 %v2211_v52, %v2761_v30 }
0x180d   :  { %v2223_v61 = vsub.f32 %v2203_v48, %v2219_v59 }
0x180f   :  { %v2227_v62 = vmul.f32 %v2223_v61, %v2223_v61 }
0x1811   :  { %v2233_v63 = vsel %vm43_vm0, %v2227_v62, 0.0 }
0x1812   :  { %2234 = vadd.xlane.f32.xlu0 %v2233_v63 }
0x181c   :  { %v2214_v32 = vpop.xlane.xlu0 %2213 }
0x181d   :  { %v2220_v4 = vmul.f32 %v2214_v32, %v2761_v30 }
0x181f   :  { %v3275_v0 = vsub.f32 %v2204_v16, %v2220_v4 }
0x1821   :  { %v2217_v1 = vpop.xlane.xlu2 %2216  ;;  %v2228_v54 = vmul.f32 %v3275_v0, %v3275_v0 }
0x1822   :  { %v2221_v5 = vmul.f32 %v2217_v1, %v2761_v30 }
0x1823   :  { %v2236_v8 = vsel %vm43_vm0, %v2228_v54, 0.0 }
0x1824   :  { %v3281_v9 = vsub.f32 %v2205_v23, %v2221_v5  ;;  %2237 = vadd.xlane.f32.xlu2 %v2236_v8 }
0x1826   :  { %2294 = vrot.lane.b32.xlu0 %v3029_v25, %s2599_s12  ;;  %v2229_v11 = vmul.f32 %v3281_v9, %v3281_v9 }
0x1828   :  { %v2239_v7 = vsel %vm43_vm0, %v2229_v11, 0.0 }
0x1829   :  { %2240 = vadd.xlane.f32.xlu1 %v2239_v7 }
0x183c   :  { %2301 = vrot.lane.b32.xlu2 %v3029_v25, %s2602_s0 }
0x1850   :  { %v2232_v13 = vpop.xlane.xlu1 %2231 }
0x1851   :  { %v2242_v10 = vmul.f32 %v2232_v13, %v2761_v30 }
0x1853   :  { %v2246_v26 = vadd.f32 1e-06, %v2242_v10 }
0x1855   :  { %2580 = vrsqrt.f32 %v2246_v26  ;;  %vm2256_vm5 = vweird.f32 %v2246_v26 }
0x185b   :  { %v2581_v27 = vpop.eup %2580 }
0x185c   :  { %v2251_v31 = vmul.f32 %v2581_v27, %v2246_v26  ;;  %vm2257_vm2 = vweird.f32 %v2581_v27 }
0x185d   :  { %vm2258_vm7 = vmor %vm2256_vm5, %vm2257_vm2 }
0x185e   :  { %v2252_v3 = vmul.f32 %v2581_v27, %v2251_v31 }
0x1860   :  { %v2253_v60 = vmul.f32 0.5, %v2252_v3 }
0x1862   :  { %v2254_v2 = vsub.f32 1.5, %v2253_v60 }
0x1864   :  { %v2255_v22 = vmul.f32 %v2581_v27, %v2254_v2 }
0x1866   :  { %v2259_v17 = vsel %vm2258_vm7, %v2581_v27, %v2255_v22 }
0x1867   :  { %v2290_v14 = vmul.f32 %v2259_v17, %v2222_v47 }
0x1885   :  { %v2235_v29 = vpop.xlane.xlu0 %2234 }
0x1886   :  { %v2243_v12 = vmul.f32 %v2235_v29, %v2761_v30 }
0x1888   :  { %v2247_v15 = vadd.f32 1e-06, %v2243_v12 }
0x188a   :  { %2582 = vrsqrt.f32 %v2247_v15  ;;  %vm2266_vm8 = vweird.f32 %v2247_v15 }
0x1890   :  { %v2583_v18 = vpop.eup %2582 }
0x1891   :  { %v2261_v19 = vmul.f32 %v2583_v18, %v2247_v15  ;;  %vm2267_vm6 = vweird.f32 %v2583_v18 }
0x1892   :  { %vm2268_vm9 = vmor %vm2266_vm8, %vm2267_vm6 }
0x1893   :  { %v2262_v20 = vmul.f32 %v2583_v18, %v2261_v19 }
0x1895   :  { %v2263_v25 = vmul.f32 0.5, %v2262_v20 }
0x1897   :  { %v2264_v45 = vsub.f32 1.5, %v2263_v25  ;;  %v2238_v24 = vpop.xlane.xlu2 %2237 }
0x1898   :  { %v2244_v38 = vmul.f32 %v2238_v24, %v2761_v30  ;;  %v2295_v35 = vpop.permute.xlu0 %2294 }
0x1899   :  { %v2265_v50 = vmul.f32 %v2583_v18, %v2264_v45  ;;  %v2297_v39 = vmul.f32 %v2295_v35, %v2290_v14 }
0x189a   :  { %v2248_v53 = vadd.f32 1e-06, %v2244_v38 }
0x189b   :  { %v2269_v28 = vsel %vm2268_vm9, %v2583_v18, %v2265_v50 }
0x189c   :  { %2584 = vrsqrt.f32 %v2248_v53  ;;  %v2291_v6 = vmul.f32 %v2269_v28, %v2223_v61  ;;  %v2241_v33 = vpop.xlane.xlu1 %2240  ;;  %vm2276_vm11 = vweird.f32 %v2248_v53 }
0x189d   :  { %v2245_v34 = vmul.f32 %v2241_v33, %v2761_v30 }
0x189e   :  { %v2298_v40 = vmul.f32 %v2295_v35, %v2291_v6 }
0x189f   :  { %v2249_v42 = vadd.f32 1e-06, %v2245_v34  ;;  %v2302_v21 = vpop.permute.xlu2 %2301 }
0x18a0   :  { %v2304_v36 = vadd.f32 %v2302_v21, %v2297_v39  ;;  %v2305_v48 = vadd.f32 %v2302_v21, %v2298_v40 }
0x18a1   :  { %2586 = vrsqrt.f32 %v2249_v42  ;;  %vm2286_vm14 = vweird.f32 %v2249_v42 }
0x18a2   :  { %v2585_v41 = vpop.eup %2584  ;;  %2310 = vst.msk [vmem:[%s3318_s6 + $0x10] sm:$0xff] %vm43_vm0, %v2304_v36 }
0x18a3   :  { %v2271_v43 = vmul.f32 %v2585_v41, %v2248_v53  ;;  %2311 = vst.msk [vmem:[%s3318_s6 + $0x18] sm:$0xff] %vm43_vm0, %v2305_v48  ;;  %vm2277_vm10 = vweird.f32 %v2585_v41 }
0x18a4   :  { %vm2278_vm12 = vmor %vm2276_vm11, %vm2277_vm10 }
0x18a5   :  { %v2272_v30 = vmul.f32 %v2585_v41, %v2271_v43 }
0x18a7   :  { %v2587_v44 = vpop.eup %2586  ;;  %v2273_v16 = vmul.f32 0.5, %v2272_v30 }
0x18a8   :  { %v2281_v49 = vmul.f32 %v2587_v44, %v2249_v42  ;;  %vm2287_vm13 = vweird.f32 %v2587_v44 }
0x18a9   :  { %v2274_v37 = vsub.f32 1.5, %v2273_v16  ;;  %vm2288_vm15 = vmor %vm2286_vm14, %vm2287_vm13 }
0x18aa   :  { %v2282_v51 = vmul.f32 %v2587_v44, %v2281_v49 }
0x18ab   :  { %v2275_v23 = vmul.f32 %v2585_v41, %v2274_v37 }
0x18ac   :  { %v2283_v55 = vmul.f32 0.5, %v2282_v51 }
0x18ad   :  { %v2279_v56 = vsel %vm2278_vm12, %v2585_v41, %v2275_v23 }
0x18ae   :  { %v2292_v46 = vmul.f32 %v2279_v56, %v3275_v0  ;;  %v2284_v47 = vsub.f32 1.5, %v2283_v55 }
0x18b0   :  { %v2299_v57 = vmul.f32 %v2295_v35, %v2292_v46  ;;  %v2285_v58 = vmul.f32 %v2587_v44, %v2284_v47 }
0x18b2   :  { %v2289_v52 = vsel %vm2288_vm15, %v2587_v44, %v2285_v58  ;;  %v2306_v59 = vadd.f32 %v2302_v21, %v2299_v57 }
0x18b3   :  { %v2293_v61 = vmul.f32 %v2289_v52, %v3281_v9 }
0x18b4   :  { %2312 = vst.msk [vmem:[%s3318_s6 + $0x20] sm:$0xff] %vm43_vm0, %v2306_v59 }
0x18b5   :  { %v2300_v62 = vmul.f32 %v2295_v35, %v2293_v61 }
0x18b7   :  { %v2307_v63 = vadd.f32 %v2302_v21, %v2300_v62 }
0x18b9   :  { %2313 = vst.msk [vmem:[%s3318_s6 + $0x28] sm:$0xff] %vm43_vm0, %v2307_v63 }

</bundles_post_ra>
